<compile_context>
chip_gen: v6e
topology: v6e:2x2x1
jax: 0.10.0
libtpu: 0.0.40
codegen_flags: <defaults>
</compile_context>

<pallas_src>
import math

import numpy as np
import jax
import jax.numpy as jnp
from jax import lax
from jax.experimental import pallas as pl
from jax.experimental.pallas import tpu as pltpu


# ----------------------------------------------------------------------------
# The fused Net1 kernel: one grid step == one tile of B_TILE images
# ----------------------------------------------------------------------------
def _net1_kernel(x_ref, m1_ref, b1_ref, s1_ref, p1_ref, m2_ref, b2_ref,
                 s2_ref, c2_ref, w1_ref, bf1_ref, w2_ref, bf2_ref,
                 w3_ref, bf3_ref, o_ref):
    f32 = jnp.float32
    bt = x_ref.shape[0]                                  # images per step

    # ---- conv1 (1->6, 5x5, valid): ONE banded matmul over all bt images ----
    x = x_ref[...].reshape(bt, 28, 28)
    xcat = jnp.concatenate([x[:, di:di + 24, :] for di in range(5)], axis=-1)
    acc1 = jnp.dot(xcat.reshape(bt * 24, 5 * 28), m1_ref[...],
                   preferred_element_type=f32)           # [bt*24, 144]
    h1 = jnp.maximum(acc1 + b1_ref[...], 0.0)            # bias + relu

    # ---- pool1 (2x2/2): stacked row selectors + channel-interleaved cols ---
    t1 = jnp.maximum(jnp.dot(s1_ref[0], h1, preferred_element_type=f32),
                     jnp.dot(s1_ref[1], h1, preferred_element_type=f32))
    p1 = jnp.maximum(jnp.dot(t1, p1_ref[0], preferred_element_type=f32),
                     jnp.dot(t1, p1_ref[1], preferred_element_type=f32))
    p1 = p1.reshape(bt, 16, 72)          # 16 (=2 sublane tiles) rows/image,
                                         # rows 12..15 are zero padding

    # ---- conv2 (6->16, 5x5, valid): ONE banded matmul on [*,72] layout -----
    pcat = jnp.concatenate([p1[:, di:di + 8, :] for di in range(5)], axis=-1)
    acc2 = jnp.dot(pcat.reshape(bt * 8, 5 * 72), m2_ref[...],
                   preferred_element_type=f32)           # [bt*8, 128]
    h2 = jnp.maximum(acc2 + b2_ref[...], 0.0)

    # ---- pool2 (2x2/2): rows come out ii-major so fc slices are aligned ----
    t2 = jnp.maximum(jnp.dot(s2_ref[0], h2, preferred_element_type=f32),
                     jnp.dot(s2_ref[1], h2, preferred_element_type=f32))
    pooled2 = jnp.maximum(jnp.dot(t2, c2_ref[0], preferred_element_type=f32),
                          jnp.dot(t2, c2_ref[1], preferred_element_type=f32))
    # pooled2[ii*bt + b, jj*16 + oc], shape [4*bt, 64]

    # ---- fc1 (256->120): aligned row slices -> [bt, 256] feature matrix ----
    feat = jnp.concatenate([pooled2[ii * bt:(ii + 1) * bt, :]
                            for ii in range(4)], axis=-1)      # [bt, 256]
    fc1 = jnp.maximum(jnp.dot(feat, w1_ref[...], preferred_element_type=f32)
                      + bf1_ref[...], 0.0)                     # [bt, 120]

    # ---- fc2 (120->84) + relu, fc3 (84->100, lane-padded to 128) -----------
    fc2 = jnp.maximum(jnp.dot(fc1, w2_ref[...], preferred_element_type=f32)
                      + bf2_ref[...], 0.0)                     # [bt, 84]
    fc3 = jnp.dot(fc2, w3_ref[...], preferred_element_type=f32) + bf3_ref[...]

    o_ref[...] = fc3                                           # [bt, 128]


# ----------------------------------------------------------------------------
# Forward wrapper: one pallas_call for the whole network, grid over batch tiles
# ----------------------------------------------------------------------------
def net1_forward(x, prep):
    bt = prep["S1"].shape[1] // 16        # B_TILE baked into the selectors
    B = x.shape[0]
    nb = -(-B // bt)
    bpad = nb * bt
    if bpad != B:
        x = jnp.pad(x, ((0, bpad - B), (0, 0), (0, 0), (0, 0)))

    c2 = lambda g: (0, 0)
    c3 = lambda g: (0, 0, 0)

    out = pl.pallas_call(
        _net1_kernel,
        out_shape=jax.ShapeDtypeStruct((bpad, 128), jnp.float32),
        grid=(nb,),
        in_specs=[
            pl.BlockSpec((bt, 1, 28, 28), lambda g: (g, 0, 0, 0)),   # x tile
            pl.BlockSpec(prep["M1"].shape, c2),                      # conv1 band
            pl.BlockSpec(prep["b1t"].shape, c2),                     # conv1 bias
            pl.BlockSpec(prep["S1"].shape, c3),                      # pool1 rows
            pl.BlockSpec(prep["P1"].shape, c3),                      # pool1 cols
            pl.BlockSpec(prep["M2"].shape, c2),                      # conv2 band
            pl.BlockSpec(prep["b2t"].shape, c2),                     # conv2 bias
            pl.BlockSpec(prep["S2"].shape, c3),                      # pool2 rows
            pl.BlockSpec(prep["C2"].shape, c3),                      # pool2 cols
            pl.BlockSpec(prep["W1"].shape, c2),                      # fc1 W
            pl.BlockSpec(prep["bf1"].shape, c2),                     # fc1 b
            pl.BlockSpec(prep["W2"].shape, c2),                      # fc2 W
            pl.BlockSpec(prep["bf2"].shape, c2),                     # fc2 b
            pl.BlockSpec(prep["W3"].shape, c2),                      # fc3 W (128-pad)
            pl.BlockSpec(prep["bf3"].shape, c2),                     # fc3 b (128-pad)
        ],
        out_specs=pl.BlockSpec((bt, 128), lambda g: (g, 0)),
        compiler_params=pltpu.CompilerParams(
            dimension_semantics=("parallel",)),
    )(x, prep["M1"], prep["b1t"], prep["S1"], prep["P1"], prep["M2"],
      prep["b2t"], prep["S2"], prep["C2"], prep["W1"], prep["bf1"],
      prep["W2"], prep["bf2"], prep["W3"], prep["bf3"])
    return out[:B, :100]


# ----------------------------------------------------------------------------
# One-time host-side weight preparation (outside jit): band matrices for the
# convs, batch-stacked 0/1 pooling selectors, permuted / padded FC weights.
# ----------------------------------------------------------------------------
def prepare_params(params, bt=8):
    w1 = np.asarray(params["conv1_w"], np.float32)   # [6,1,5,5]
    b1 = np.asarray(params["conv1_b"], np.float32)   # [6]
    w2 = np.asarray(params["conv2_w"], np.float32)   # [16,6,5,5]
    b2 = np.asarray(params["conv2_b"], np.float32)   # [16]
    f1w = np.asarray(params["fc1_w"], np.float32)    # [120,256]
    f1b = np.asarray(params["fc1_b"], np.float32)
    f2w = np.asarray(params["fc2_w"], np.float32)    # [84,120]
    f2b = np.asarray(params["fc2_b"], np.float32)
    f3w = np.asarray(params["fc3_w"], np.float32)    # [100,84]
    f3b = np.asarray(params["fc3_b"], np.float32)

    # conv1 band matrix, K concatenated over di:
    #   acc1[i, j*6+oc] = sum_{di,w} x[i+di, w] * M1[di*28 + w, j*6+oc]
    M1 = np.zeros((5 * 28, 24 * 6), np.float32)
    for di in range(5):
        for j in range(24):
            for dj in range(5):
                M1[di * 28 + j + dj, j * 6:(j + 1) * 6] = w1[:, 0, di, dj]

    # conv2 band matrix on the channel-interleaved pool1 layout (w*6+c):
    #   acc2[i, j*16+oc] = sum_{di,w,c} p1[i+di, w*6+c] * M2[di*72 + w*6+c, j*16+oc]
    M2 = np.zeros((5 * 72, 8 * 16), np.float32)
    for di in range(5):
        for j in range(8):
            for dj in range(5):
                for c in range(6):
                    M2[di * 72 + (j + dj) * 6 + c,
                       j * 16:(j + 1) * 16] = w2[:, c, di, dj]

    # pool1 row selectors, batch-stacked, 16 (padded) output rows per image:
    #   t1[b*16+r, :] = h1[b*24 + 2r + a, :]
    S1 = np.zeros((2, bt * 16, bt * 24), np.float32)
    for a in range(2):
        for b in range(bt):
            for r in range(12):
                S1[a, b * 16 + r, b * 24 + 2 * r + a] = 1.0

    # pool1 column selectors, channels stay interleaved:
    #   p1[., jw*6+c] = t1[., (2*jw+a)*6+c]
    P1 = np.zeros((2, 24 * 6, 12 * 6), np.float32)
    for a in range(2):
        for jw in range(12):
            for c in range(6):
                P1[a, (2 * jw + a) * 6 + c, jw * 6 + c] = 1.0

    # pool2 row selectors, ii-major output rows (so fc1 slices are aligned):
    #   t2[ii*bt + b, :] = h2[b*8 + 2*ii + a, :]
    S2 = np.zeros((2, 4 * bt, bt * 8), np.float32)
    for a in range(2):
        for b in range(bt):
            for ii in range(4):
                S2[a, ii * bt + b, b * 8 + 2 * ii + a] = 1.0

    # pool2 column selectors:
    #   pooled2[., jj*16+oc] = t2[., (2*jj+a)*16+oc]
    C2 = np.zeros((2, 8 * 16, 4 * 16), np.float32)
    for a in range(2):
        for jj in range(4):
            for oc in range(16):
                C2[a, (2 * jj + a) * 16 + oc, jj * 16 + oc] = 1.0

    # fc1 weight permuted to the kernel's [ii*64 + jj*16 + oc] feature layout
    # (torch flatten index = oc*16 + ii*4 + jj)
    W1 = np.zeros((256, 120), np.float32)
    for ii in range(4):
        for jj in range(4):
            for oc in range(16):
                W1[ii * 64 + jj * 16 + oc, :] = f1w[:, oc * 16 + ii * 4 + jj]

    # fc3 padded to 128 output lanes (lane-dense store; wrapper slices :100)
    W3 = np.zeros((84, 128), np.float32)
    W3[:, :100] = f3w.T
    bf3 = np.zeros((1, 128), np.float32)
    bf3[0, :100] = f3b

    prep = {
        "M1": M1, "b1t": np.tile(b1, 24)[None, :],
        "S1": S1, "P1": P1,
        "M2": M2, "b2t": np.tile(b2, 8)[None, :],
        "S2": S2, "C2": C2,
        "W1": W1, "bf1": f1b[None, :],
        "W2": f2w.T.copy(), "bf2": f2b[None, :],
        "W3": W3, "bf3": bf3,
    }
    return {k: jnp.asarray(v) for k, v in prep.items()}


# ----------------------------------------------------------------------------
# Pure-JAX reference (for correctness check) and PyTorch-style init
# ----------------------------------------------------------------------------
def net1_reference(x, params):
    hi = lax.Precision.HIGHEST
    out = lax.conv_general_dilated(
        x, params["conv1_w"], window_strides=(1, 1), padding="VALID",
        dimension_numbers=("NCHW", "OIHW", "NCHW"), precision=hi)
    out = jnp.maximum(out + params["conv1_b"].reshape(1, 6, 1, 1), 0.0)
    out = lax.reduce_window(out, -jnp.inf, lax.max,
                            (1, 1, 2, 2), (1, 1, 2, 2), "VALID")
    out = lax.conv_general_dilated(
        out, params["conv2_w"], window_strides=(1, 1), padding="VALID",
        dimension_numbers=("NCHW", "OIHW", "NCHW"), precision=hi)
    out = jnp.maximum(out + params["conv2_b"].reshape(1, 16, 1, 1), 0.0)
    out = lax.reduce_window(out, -jnp.inf, lax.max,
                            (1, 1, 2, 2), (1, 1, 2, 2), "VALID")
    B = out.shape[0]
    out = out.reshape(B, 16 * 4 * 4)
    out = jnp.maximum(jnp.dot(out, params["fc1_w"].T, precision=hi)
                      + params["fc1_b"], 0.0)
    out = jnp.maximum(jnp.dot(out, params["fc2_w"].T, precision=hi)
                      + params["fc2_b"], 0.0)
    out = jnp.dot(out, params["fc3_w"].T, precision=hi) + params["fc3_b"]
    return out


def init_params(key):
    def uni(k, shape, fan_in):
        bound = 1.0 / math.sqrt(fan_in)
        return jax.random.uniform(k, shape, jnp.float32, -bound, bound)

    keys = jax.random.split(key, 10)
    return {
        "conv1_w": uni(keys[0], (6, 1, 5, 5), 1 * 5 * 5),
        "conv1_b": uni(keys[1], (6,), 1 * 5 * 5),
        "conv2_w": uni(keys[2], (16, 6, 5, 5), 6 * 5 * 5),
        "conv2_b": uni(keys[3], (16,), 6 * 5 * 5),
        "fc1_w": uni(keys[4], (120, 256), 256),
        "fc1_b": uni(keys[5], (120,), 256),
        "fc2_w": uni(keys[6], (84, 120), 120),
        "fc2_b": uni(keys[7], (84,), 120),
        "fc3_w": uni(keys[8], (100, 84), 84),
        "fc3_b": uni(keys[9], (84,) and (100,), 84),
    }


if __name__ == "__main__":
    key = jax.random.PRNGKey(0)
    pkey, xkey = jax.random.split(key)
    params = init_params(pkey)
    prep = prepare_params(params, bt=8)    # one-time, outside jit

    # MNIST-shaped input implied by the module: [B, 1, 28, 28]
    # B=16 with B_TILE=8 -> grid=(2,): even grid keeps both v7x TCs busy.
    x = jax.random.normal(xkey, (16, 1, 28, 28), dtype=jnp.float32)

    fwd = jax.jit(net1_forward)
    out = jax.block_until_ready(fwd(x, prep))

    assert out.shape == (16, 100), out.shape
    assert out.dtype == jnp.float32
    assert bool(jnp.all(jnp.isfinite(out)))

    ref = jax.block_until_ready(net1_reference(x, params))
    assert bool(jnp.allclose(out, ref, atol=2e-2, rtol=2e-2)), (
        "max abs err = %f" % float(jnp.max(jnp.abs(out - ref))))

    print("KERNEL_OK")
</pallas_src>

<mosaic_0001>
module attributes {stable_mosaic.version = 11 : i64} {
  func.func @_net1_kernel(%arg0: i32, %arg1: memref<8x1x28x28xf32, #tpu.memory_space<vmem>>, %arg2: memref<140x144xf32, #tpu.memory_space<vmem>>, %arg3: memref<1x144xf32, #tpu.memory_space<vmem>>, %arg4: memref<2x128x192xf32, #tpu.memory_space<vmem>>, %arg5: memref<2x144x72xf32, #tpu.memory_space<vmem>>, %arg6: memref<360x128xf32, #tpu.memory_space<vmem>>, %arg7: memref<1x128xf32, #tpu.memory_space<vmem>>, %arg8: memref<2x32x64xf32, #tpu.memory_space<vmem>>, %arg9: memref<2x128x64xf32, #tpu.memory_space<vmem>>, %arg10: memref<256x120xf32, #tpu.memory_space<vmem>>, %arg11: memref<1x120xf32, #tpu.memory_space<vmem>>, %arg12: memref<120x84xf32, #tpu.memory_space<vmem>>, %arg13: memref<1x84xf32, #tpu.memory_space<vmem>>, %arg14: memref<84x128xf32, #tpu.memory_space<vmem>>, %arg15: memref<1x128xf32, #tpu.memory_space<vmem>>, %arg16: memref<8x128xf32, #tpu.memory_space<vmem>>) attributes {dimension_semantics = [#tpu.dimension_semantics<parallel>], iteration_bounds = array<i64: 2>, scalar_prefetch = 0 : i64, scratch_operands = 0 : i64, tpu.core_type = #tpu.core_type<tc>, window_params = [{transform_indices = @transform_0, window_bounds = array<i64: 8, 1, 28, 28>}, {pipeline_mode = #tpu.pipeline_mode<synchronous>, transform_indices = @transform_1, window_bounds = array<i64: 140, 144>}, {pipeline_mode = #tpu.pipeline_mode<synchronous>, transform_indices = @transform_2, window_bounds = array<i64: 1, 144>}, {pipeline_mode = #tpu.pipeline_mode<synchronous>, transform_indices = @transform_3, window_bounds = array<i64: 2, 128, 192>}, {pipeline_mode = #tpu.pipeline_mode<synchronous>, transform_indices = @transform_4, window_bounds = array<i64: 2, 144, 72>}, {pipeline_mode = #tpu.pipeline_mode<synchronous>, transform_indices = @transform_5, window_bounds = array<i64: 360, 128>}, {pipeline_mode = #tpu.pipeline_mode<synchronous>, transform_indices = @transform_6, window_bounds = array<i64: 1, 128>}, {pipeline_mode = #tpu.pipeline_mode<synchronous>, transform_indices = @transform_7, window_bounds = array<i64: 2, 32, 64>}, {pipeline_mode = #tpu.pipeline_mode<synchronous>, transform_indices = @transform_8, window_bounds = array<i64: 2, 128, 64>}, {pipeline_mode = #tpu.pipeline_mode<synchronous>, transform_indices = @transform_9, window_bounds = array<i64: 256, 120>}, {pipeline_mode = #tpu.pipeline_mode<synchronous>, transform_indices = @transform_10, window_bounds = array<i64: 1, 120>}, {pipeline_mode = #tpu.pipeline_mode<synchronous>, transform_indices = @transform_11, window_bounds = array<i64: 120, 84>}, {pipeline_mode = #tpu.pipeline_mode<synchronous>, transform_indices = @transform_12, window_bounds = array<i64: 1, 84>}, {pipeline_mode = #tpu.pipeline_mode<synchronous>, transform_indices = @transform_13, window_bounds = array<i64: 84, 128>}, {pipeline_mode = #tpu.pipeline_mode<synchronous>, transform_indices = @transform_14, window_bounds = array<i64: 1, 128>}, {transform_indices = @transform_15, window_bounds = array<i64: 8, 128>}]} {
    %c0 = arith.constant 0 : index
    %c0_0 = arith.constant 0 : index
    %c0_1 = arith.constant 0 : index
    %c0_2 = arith.constant 0 : index
    %0 = vector.load %arg1[%c0, %c0_0, %c0_1, %c0_2] : memref<8x1x28x28xf32, #tpu.memory_space<vmem>>, vector<8x1x28x28xf32>
    %1 = vector.shape_cast %0 : vector<8x1x28x28xf32> to vector<8x28x28xf32>
    %2 = vector.extract_strided_slice %1 {offsets = [0, 0, 0], sizes = [8, 24, 28], strides = [1, 1, 1]} : vector<8x28x28xf32> to vector<8x24x28xf32>
    %3 = vector.extract_strided_slice %1 {offsets = [0, 1, 0], sizes = [8, 24, 28], strides = [1, 1, 1]} : vector<8x28x28xf32> to vector<8x24x28xf32>
    %4 = vector.extract_strided_slice %1 {offsets = [0, 2, 0], sizes = [8, 24, 28], strides = [1, 1, 1]} : vector<8x28x28xf32> to vector<8x24x28xf32>
    %5 = vector.extract_strided_slice %1 {offsets = [0, 3, 0], sizes = [8, 24, 28], strides = [1, 1, 1]} : vector<8x28x28xf32> to vector<8x24x28xf32>
    %6 = vector.extract_strided_slice %1 {offsets = [0, 4, 0], sizes = [8, 24, 28], strides = [1, 1, 1]} : vector<8x28x28xf32> to vector<8x24x28xf32>
    %7 = tpu.concatenate %2, %3, %4, %5, %6 in 2 : vector<8x24x28xf32>, vector<8x24x28xf32>, vector<8x24x28xf32>, vector<8x24x28xf32>, vector<8x24x28xf32> -> vector<8x24x140xf32>
    %8 = vector.shape_cast %7 : vector<8x24x140xf32> to vector<192x140xf32>
    %c0_3 = arith.constant 0 : index
    %c0_4 = arith.constant 0 : index
    %9 = vector.load %arg2[%c0_3, %c0_4] : memref<140x144xf32, #tpu.memory_space<vmem>>, vector<140x144xf32>
    %cst = arith.constant dense<0.000000e+00> : vector<192x144xf32>
    %10 = tpu.matmul %8, %9, %cst {dimension_numbers = #tpu.dot_dimension_numbers<[1], [0], [0], [1], [0, 0, 1, 1], [], []>} : vector<192x140xf32>, vector<140x144xf32>, vector<192x144xf32> -> vector<192x144xf32>
    %c0_5 = arith.constant 0 : index
    %c0_6 = arith.constant 0 : index
    %11 = vector.load %arg3[%c0_5, %c0_6] : memref<1x144xf32, #tpu.memory_space<vmem>>, vector<1x144xf32>
    %12 = vector.broadcast %11 : vector<1x144xf32> to vector<192x144xf32>
    %13 = arith.addf %10, %12 : vector<192x144xf32>
    %cst_7 = arith.constant 0.000000e+00 : f32
    %14 = vector.broadcast %cst_7 : f32 to vector<192x144xf32>
    %15 = arith.maximumf %13, %14 : vector<192x144xf32>
    %c0_8 = arith.constant 0 : index
    %c0_9 = arith.constant 0 : index
    %c0_10 = arith.constant 0 : index
    %16 = vector.load %arg4[%c0_8, %c0_9, %c0_10] : memref<2x128x192xf32, #tpu.memory_space<vmem>>, vector<1x128x192xf32>
    %17 = vector.shape_cast %16 : vector<1x128x192xf32> to vector<128x192xf32>
    %cst_11 = arith.constant dense<0.000000e+00> : vector<128x144xf32>
    %18 = tpu.matmul %17, %15, %cst_11 {dimension_numbers = #tpu.dot_dimension_numbers<[1], [0], [0], [1], [0, 0, 1, 1], [], []>} : vector<128x192xf32>, vector<192x144xf32>, vector<128x144xf32> -> vector<128x144xf32>
    %c1 = arith.constant 1 : index
    %c0_12 = arith.constant 0 : index
    %c0_13 = arith.constant 0 : index
    %19 = vector.load %arg4[%c1, %c0_12, %c0_13] : memref<2x128x192xf32, #tpu.memory_space<vmem>>, vector<1x128x192xf32>
    %20 = vector.shape_cast %19 : vector<1x128x192xf32> to vector<128x192xf32>
    %cst_14 = arith.constant dense<0.000000e+00> : vector<128x144xf32>
    %21 = tpu.matmul %20, %15, %cst_14 {dimension_numbers = #tpu.dot_dimension_numbers<[1], [0], [0], [1], [0, 0, 1, 1], [], []>} : vector<128x192xf32>, vector<192x144xf32>, vector<128x144xf32> -> vector<128x144xf32>
    %22 = arith.maximumf %18, %21 : vector<128x144xf32>
    %c0_15 = arith.constant 0 : index
    %c0_16 = arith.constant 0 : index
    %c0_17 = arith.constant 0 : index
    %23 = vector.load %arg5[%c0_15, %c0_16, %c0_17] : memref<2x144x72xf32, #tpu.memory_space<vmem>>, vector<1x144x72xf32>
    %24 = vector.shape_cast %23 : vector<1x144x72xf32> to vector<144x72xf32>
    %cst_18 = arith.constant dense<0.000000e+00> : vector<128x72xf32>
    %25 = tpu.matmul %22, %24, %cst_18 {dimension_numbers = #tpu.dot_dimension_numbers<[1], [0], [0], [1], [0, 0, 1, 1], [], []>} : vector<128x144xf32>, vector<144x72xf32>, vector<128x72xf32> -> vector<128x72xf32>
    %c1_19 = arith.constant 1 : index
    %c0_20 = arith.constant 0 : index
    %c0_21 = arith.constant 0 : index
    %26 = vector.load %arg5[%c1_19, %c0_20, %c0_21] : memref<2x144x72xf32, #tpu.memory_space<vmem>>, vector<1x144x72xf32>
    %27 = vector.shape_cast %26 : vector<1x144x72xf32> to vector<144x72xf32>
    %cst_22 = arith.constant dense<0.000000e+00> : vector<128x72xf32>
    %28 = tpu.matmul %22, %27, %cst_22 {dimension_numbers = #tpu.dot_dimension_numbers<[1], [0], [0], [1], [0, 0, 1, 1], [], []>} : vector<128x144xf32>, vector<144x72xf32>, vector<128x72xf32> -> vector<128x72xf32>
    %29 = arith.maximumf %25, %28 : vector<128x72xf32>
    %30 = vector.shape_cast %29 : vector<128x72xf32> to vector<8x16x72xf32>
    %31 = vector.extract_strided_slice %30 {offsets = [0, 0, 0], sizes = [8, 8, 72], strides = [1, 1, 1]} : vector<8x16x72xf32> to vector<8x8x72xf32>
    %32 = vector.extract_strided_slice %30 {offsets = [0, 1, 0], sizes = [8, 8, 72], strides = [1, 1, 1]} : vector<8x16x72xf32> to vector<8x8x72xf32>
    %33 = vector.extract_strided_slice %30 {offsets = [0, 2, 0], sizes = [8, 8, 72], strides = [1, 1, 1]} : vector<8x16x72xf32> to vector<8x8x72xf32>
    %34 = vector.extract_strided_slice %30 {offsets = [0, 3, 0], sizes = [8, 8, 72], strides = [1, 1, 1]} : vector<8x16x72xf32> to vector<8x8x72xf32>
    %35 = vector.extract_strided_slice %30 {offsets = [0, 4, 0], sizes = [8, 8, 72], strides = [1, 1, 1]} : vector<8x16x72xf32> to vector<8x8x72xf32>
    %36 = tpu.concatenate %31, %32, %33, %34, %35 in 2 : vector<8x8x72xf32>, vector<8x8x72xf32>, vector<8x8x72xf32>, vector<8x8x72xf32>, vector<8x8x72xf32> -> vector<8x8x360xf32>
    %37 = vector.shape_cast %36 : vector<8x8x360xf32> to vector<64x360xf32>
    %c0_23 = arith.constant 0 : index
    %c0_24 = arith.constant 0 : index
    %38 = vector.load %arg6[%c0_23, %c0_24] : memref<360x128xf32, #tpu.memory_space<vmem>>, vector<360x128xf32>
    %cst_25 = arith.constant dense<0.000000e+00> : vector<64x128xf32>
    %39 = tpu.matmul %37, %38, %cst_25 {dimension_numbers = #tpu.dot_dimension_numbers<[1], [0], [0], [1], [0, 0, 1, 1], [], []>} : vector<64x360xf32>, vector<360x128xf32>, vector<64x128xf32> -> vector<64x128xf32>
    %c0_26 = arith.constant 0 : index
    %c0_27 = arith.constant 0 : index
    %40 = vector.load %arg7[%c0_26, %c0_27] : memref<1x128xf32, #tpu.memory_space<vmem>>, vector<1x128xf32>
    %41 = vector.broadcast %40 : vector<1x128xf32> to vector<64x128xf32>
    %42 = arith.addf %39, %41 : vector<64x128xf32>
    %cst_28 = arith.constant 0.000000e+00 : f32
    %43 = vector.broadcast %cst_28 : f32 to vector<64x128xf32>
    %44 = arith.maximumf %42, %43 : vector<64x128xf32>
    %c0_29 = arith.constant 0 : index
    %c0_30 = arith.constant 0 : index
    %c0_31 = arith.constant 0 : index
    %45 = vector.load %arg8[%c0_29, %c0_30, %c0_31] : memref<2x32x64xf32, #tpu.memory_space<vmem>>, vector<1x32x64xf32>
    %46 = vector.shape_cast %45 : vector<1x32x64xf32> to vector<32x64xf32>
    %cst_32 = arith.constant dense<0.000000e+00> : vector<32x128xf32>
    %47 = tpu.matmul %46, %44, %cst_32 {dimension_numbers = #tpu.dot_dimension_numbers<[1], [0], [0], [1], [0, 0, 1, 1], [], []>} : vector<32x64xf32>, vector<64x128xf32>, vector<32x128xf32> -> vector<32x128xf32>
    %c1_33 = arith.constant 1 : index
    %c0_34 = arith.constant 0 : index
    %c0_35 = arith.constant 0 : index
    %48 = vector.load %arg8[%c1_33, %c0_34, %c0_35] : memref<2x32x64xf32, #tpu.memory_space<vmem>>, vector<1x32x64xf32>
    %49 = vector.shape_cast %48 : vector<1x32x64xf32> to vector<32x64xf32>
    %cst_36 = arith.constant dense<0.000000e+00> : vector<32x128xf32>
    %50 = tpu.matmul %49, %44, %cst_36 {dimension_numbers = #tpu.dot_dimension_numbers<[1], [0], [0], [1], [0, 0, 1, 1], [], []>} : vector<32x64xf32>, vector<64x128xf32>, vector<32x128xf32> -> vector<32x128xf32>
    %51 = arith.maximumf %47, %50 : vector<32x128xf32>
    %c0_37 = arith.constant 0 : index
    %c0_38 = arith.constant 0 : index
    %c0_39 = arith.constant 0 : index
    %52 = vector.load %arg9[%c0_37, %c0_38, %c0_39] : memref<2x128x64xf32, #tpu.memory_space<vmem>>, vector<1x128x64xf32>
    %53 = vector.shape_cast %52 : vector<1x128x64xf32> to vector<128x64xf32>
    %cst_40 = arith.constant dense<0.000000e+00> : vector<32x64xf32>
    %54 = tpu.matmul %51, %53, %cst_40 {dimension_numbers = #tpu.dot_dimension_numbers<[1], [0], [0], [1], [0, 0, 1, 1], [], []>} : vector<32x128xf32>, vector<128x64xf32>, vector<32x64xf32> -> vector<32x64xf32>
    %c1_41 = arith.constant 1 : index
    %c0_42 = arith.constant 0 : index
    %c0_43 = arith.constant 0 : index
    %55 = vector.load %arg9[%c1_41, %c0_42, %c0_43] : memref<2x128x64xf32, #tpu.memory_space<vmem>>, vector<1x128x64xf32>
    %56 = vector.shape_cast %55 : vector<1x128x64xf32> to vector<128x64xf32>
    %cst_44 = arith.constant dense<0.000000e+00> : vector<32x64xf32>
    %57 = tpu.matmul %51, %56, %cst_44 {dimension_numbers = #tpu.dot_dimension_numbers<[1], [0], [0], [1], [0, 0, 1, 1], [], []>} : vector<32x128xf32>, vector<128x64xf32>, vector<32x64xf32> -> vector<32x64xf32>
    %58 = arith.maximumf %54, %57 : vector<32x64xf32>
    %59 = vector.extract_strided_slice %58 {offsets = [0, 0], sizes = [8, 64], strides = [1, 1]} : vector<32x64xf32> to vector<8x64xf32>
    %60 = vector.extract_strided_slice %58 {offsets = [8, 0], sizes = [8, 64], strides = [1, 1]} : vector<32x64xf32> to vector<8x64xf32>
    %61 = vector.extract_strided_slice %58 {offsets = [16, 0], sizes = [8, 64], strides = [1, 1]} : vector<32x64xf32> to vector<8x64xf32>
    %62 = vector.extract_strided_slice %58 {offsets = [24, 0], sizes = [8, 64], strides = [1, 1]} : vector<32x64xf32> to vector<8x64xf32>
    %63 = tpu.concatenate %59, %60, %61, %62 in 1 : vector<8x64xf32>, vector<8x64xf32>, vector<8x64xf32>, vector<8x64xf32> -> vector<8x256xf32>
    %c0_45 = arith.constant 0 : index
    %c0_46 = arith.constant 0 : index
    %64 = vector.load %arg10[%c0_45, %c0_46] : memref<256x120xf32, #tpu.memory_space<vmem>>, vector<256x120xf32>
    %cst_47 = arith.constant dense<0.000000e+00> : vector<8x120xf32>
    %65 = tpu.matmul %63, %64, %cst_47 {dimension_numbers = #tpu.dot_dimension_numbers<[1], [0], [0], [1], [0, 0, 1, 1], [], []>} : vector<8x256xf32>, vector<256x120xf32>, vector<8x120xf32> -> vector<8x120xf32>
    %c0_48 = arith.constant 0 : index
    %c0_49 = arith.constant 0 : index
    %66 = vector.load %arg11[%c0_48, %c0_49] : memref<1x120xf32, #tpu.memory_space<vmem>>, vector<1x120xf32>
    %67 = vector.broadcast %66 : vector<1x120xf32> to vector<8x120xf32>
    %68 = arith.addf %65, %67 : vector<8x120xf32>
    %cst_50 = arith.constant 0.000000e+00 : f32
    %69 = vector.broadcast %cst_50 : f32 to vector<8x120xf32>
    %70 = arith.maximumf %68, %69 : vector<8x120xf32>
    %c0_51 = arith.constant 0 : index
    %c0_52 = arith.constant 0 : index
    %71 = vector.load %arg12[%c0_51, %c0_52] : memref<120x84xf32, #tpu.memory_space<vmem>>, vector<120x84xf32>
    %cst_53 = arith.constant dense<0.000000e+00> : vector<8x84xf32>
    %72 = tpu.matmul %70, %71, %cst_53 {dimension_numbers = #tpu.dot_dimension_numbers<[1], [0], [0], [1], [0, 0, 1, 1], [], []>} : vector<8x120xf32>, vector<120x84xf32>, vector<8x84xf32> -> vector<8x84xf32>
    %c0_54 = arith.constant 0 : index
    %c0_55 = arith.constant 0 : index
    %73 = vector.load %arg13[%c0_54, %c0_55] : memref<1x84xf32, #tpu.memory_space<vmem>>, vector<1x84xf32>
    %74 = vector.broadcast %73 : vector<1x84xf32> to vector<8x84xf32>
    %75 = arith.addf %72, %74 : vector<8x84xf32>
    %cst_56 = arith.constant 0.000000e+00 : f32
    %76 = vector.broadcast %cst_56 : f32 to vector<8x84xf32>
    %77 = arith.maximumf %75, %76 : vector<8x84xf32>
    %c0_57 = arith.constant 0 : index
    %c0_58 = arith.constant 0 : index
    %78 = vector.load %arg14[%c0_57, %c0_58] : memref<84x128xf32, #tpu.memory_space<vmem>>, vector<84x128xf32>
    %cst_59 = arith.constant dense<0.000000e+00> : vector<8x128xf32>
    %79 = tpu.matmul %77, %78, %cst_59 {dimension_numbers = #tpu.dot_dimension_numbers<[1], [0], [0], [1], [0, 0, 1, 1], [], []>} : vector<8x84xf32>, vector<84x128xf32>, vector<8x128xf32> -> vector<8x128xf32>
    %c0_60 = arith.constant 0 : index
    %c0_61 = arith.constant 0 : index
    %80 = vector.load %arg15[%c0_60, %c0_61] : memref<1x128xf32, #tpu.memory_space<vmem>>, vector<1x128xf32>
    %81 = vector.broadcast %80 : vector<1x128xf32> to vector<8x128xf32>
    %82 = arith.addf %79, %81 : vector<8x128xf32>
    %c0_62 = arith.constant 0 : index
    %c0_63 = arith.constant 0 : index
    %83 = vector.load %arg16[%c0_62, %c0_63] : memref<8x128xf32, #tpu.memory_space<vmem>>, vector<8x128xf32>
    tpu.vector_store %arg16[%c0_62, %c0_63], %82 {strides = array<i32>} : memref<8x128xf32, #tpu.memory_space<vmem>>, vector<8x128xf32>,
    return
  }
  func.func @transform_0(%arg0: i32) -> (i32, i32, i32, i32) {
    %c0_i32 = arith.constant 0 : i32
    %c0_i32_0 = arith.constant 0 : i32
    %c0_i32_1 = arith.constant 0 : i32
    %c0_i32_2 = arith.constant 0 : i32
    return %arg0, %c0_i32, %c0_i32_0, %c0_i32_1 : i32, i32, i32, i32
  }
  func.func @transform_1(%arg0: i32) -> (i32, i32) {
    %c0_i32 = arith.constant 0 : i32
    %c0_i32_0 = arith.constant 0 : i32
    %c0_i32_1 = arith.constant 0 : i32
    return %c0_i32, %c0_i32_0 : i32, i32
  }
  func.func @transform_2(%arg0: i32) -> (i32, i32) {
    %c0_i32 = arith.constant 0 : i32
    %c0_i32_0 = arith.constant 0 : i32
    %c0_i32_1 = arith.constant 0 : i32
    return %c0_i32, %c0_i32_0 : i32, i32
  }
  func.func @transform_3(%arg0: i32) -> (i32, i32, i32) {
    %c0_i32 = arith.constant 0 : i32
    %c0_i32_0 = arith.constant 0 : i32
    %c0_i32_1 = arith.constant 0 : i32
    %c0_i32_2 = arith.constant 0 : i32
    return %c0_i32, %c0_i32_0, %c0_i32_1 : i32, i32, i32
  }
  func.func @transform_4(%arg0: i32) -> (i32, i32, i32) {
    %c0_i32 = arith.constant 0 : i32
    %c0_i32_0 = arith.constant 0 : i32
    %c0_i32_1 = arith.constant 0 : i32
    %c0_i32_2 = arith.constant 0 : i32
    return %c0_i32, %c0_i32_0, %c0_i32_1 : i32, i32, i32
  }
  func.func @transform_5(%arg0: i32) -> (i32, i32) {
    %c0_i32 = arith.constant 0 : i32
    %c0_i32_0 = arith.constant 0 : i32
    %c0_i32_1 = arith.constant 0 : i32
    return %c0_i32, %c0_i32_0 : i32, i32
  }
  func.func @transform_6(%arg0: i32) -> (i32, i32) {
    %c0_i32 = arith.constant 0 : i32
    %c0_i32_0 = arith.constant 0 : i32
    %c0_i32_1 = arith.constant 0 : i32
    return %c0_i32, %c0_i32_0 : i32, i32
  }
  func.func @transform_7(%arg0: i32) -> (i32, i32, i32) {
    %c0_i32 = arith.constant 0 : i32
    %c0_i32_0 = arith.constant 0 : i32
    %c0_i32_1 = arith.constant 0 : i32
    %c0_i32_2 = arith.constant 0 : i32
    return %c0_i32, %c0_i32_0, %c0_i32_1 : i32, i32, i32
  }
  func.func @transform_8(%arg0: i32) -> (i32, i32, i32) {
    %c0_i32 = arith.constant 0 : i32
    %c0_i32_0 = arith.constant 0 : i32
    %c0_i32_1 = arith.constant 0 : i32
    %c0_i32_2 = arith.constant 0 : i32
    return %c0_i32, %c0_i32_0, %c0_i32_1 : i32, i32, i32
  }
  func.func @transform_9(%arg0: i32) -> (i32, i32) {
    %c0_i32 = arith.constant 0 : i32
    %c0_i32_0 = arith.constant 0 : i32
    %c0_i32_1 = arith.constant 0 : i32
    return %c0_i32, %c0_i32_0 : i32, i32
  }
  func.func @transform_10(%arg0: i32) -> (i32, i32) {
    %c0_i32 = arith.constant 0 : i32
    %c0_i32_0 = arith.constant 0 : i32
    %c0_i32_1 = arith.constant 0 : i32
    return %c0_i32, %c0_i32_0 : i32, i32
  }
  func.func @transform_11(%arg0: i32) -> (i32, i32) {
    %c0_i32 = arith.constant 0 : i32
    %c0_i32_0 = arith.constant 0 : i32
    %c0_i32_1 = arith.constant 0 : i32
    return %c0_i32, %c0_i32_0 : i32, i32
  }
  func.func @transform_12(%arg0: i32) -> (i32, i32) {
    %c0_i32 = arith.constant 0 : i32
    %c0_i32_0 = arith.constant 0 : i32
    %c0_i32_1 = arith.constant 0 : i32
    return %c0_i32, %c0_i32_0 : i32, i32
  }
  func.func @transform_13(%arg0: i32) -> (i32, i32) {
    %c0_i32 = arith.constant 0 : i32
    %c0_i32_0 = arith.constant 0 : i32
    %c0_i32_1 = arith.constant 0 : i32
    return %c0_i32, %c0_i32_0 : i32, i32
  }
  func.func @transform_14(%arg0: i32) -> (i32, i32) {
    %c0_i32 = arith.constant 0 : i32
    %c0_i32_0 = arith.constant 0 : i32
    %c0_i32_1 = arith.constant 0 : i32
    return %c0_i32, %c0_i32_0 : i32, i32
  }
  func.func @transform_15(%arg0: i32) -> (i32, i32) {
    %c0_i32 = arith.constant 0 : i32
    %c0_i32_0 = arith.constant 0 : i32
    return %arg0, %c0_i32 : i32, i32
  }
}

</mosaic_0001>

<bundles_post_ra>
// kernel: net1_forward.1
= control target key start
LH: loop header
LB: loop body
LE: loop exit
PB: predicated region body
PF: predicated region fallthrough
CT: control target
= control target key end

     0   :  { %s7151_s0 = inlined_call_operand.vmem [shape: f32[16,1,28,28], index: 0, kind: input, shape index: {}]   ;;  %s7152_s1 = inlined_call_operand.vmem [shape: f32[140,144], index: 1, kind: input, shape index: {}]   ;;  %s7153_s2 = inlined_call_operand.vmem [shape: f32[1,144], index: 2, kind: input, shape index: {}]   ;;  %s7154_s3 = inlined_call_operand.vmem [shape: f32[2,128,192], index: 3, kind: input, shape index: {}]   ;;  %s7155_s4 = inlined_call_operand.vmem [shape: f32[2,144,72], index: 4, kind: input, shape index: {}]   ;;  %s7156_s5 = inlined_call_operand.vmem [shape: f32[360,128], index: 5, kind: input, shape index: {}]   ;;  %s7157_s6 = inlined_call_operand.vmem [shape: f32[1,128], index: 6, kind: input, shape index: {}]   ;;  %s7158_s7 = inlined_call_operand.vmem [shape: f32[2,32,64], index: 7, kind: input, shape index: {}]   ;;  %s7159_s8 = inlined_call_operand.vmem [shape: f32[2,128,64], index: 8, kind: input, shape index: {}]   ;;  %s7160_s9 = inlined_call_operand.vmem [shape: f32[256,120], index: 9, kind: input, shape index: {}]   ;;  %s7161_s10 = inlined_call_operand.vmem [shape: f32[1,120], index: 10, kind: input, shape index: {}]   ;;  %s7162_s11 = inlined_call_operand.vmem [shape: f32[120,84], index: 11, kind: input, shape index: {}]   ;;  %s7163_s12 = inlined_call_operand.vmem [shape: f32[1,84], index: 12, kind: input, shape index: {}]   ;;  %s7164_s13 = inlined_call_operand.vmem [shape: f32[84,128], index: 13, kind: input, shape index: {}]   ;;  %s7165_s14 = inlined_call_operand.vmem [shape: f32[1,128], index: 14, kind: input, shape index: {}]   ;;  %s7166_s15 = inlined_call_operand.hbm [shape: f32[16,128], index: 15, kind: output, shape index: {}]  }
   0x1   :  { %7214 = sst [smem:[#allocation10_spill]] %s7151_s0 }
   0x2   :  { %20 = vsyncpa [#allocation3], 0 }
   0x3   :  { %22 = vsyncpa [#allocation3 + $0x1], 0  ;;  %s4813_s18 = smov 0   ;;  %s4815_s19 = smov 0  }
   0x4   :  { %s4817_s20 = smov 0   ;;  %s4819_s21 = smov 0  }
   0x5 LB: > { %7215 = sst [smem:[#allocation5_spill]] %s4707_s18  ;;  %s4834_s22 = sadd.s32 4294967295, %s4719_s21   ;;  %s4719_s21 = sphi %s4819_s21, %s7265_s21   ;;  %s4715_s20 = sphi %s4817_s20, %s7267_s20   ;;  %s4711_s19 = sphi %s4815_s19, %s7269_s19   ;;  %s4707_s18 = sphi %s4813_s18, %s7268_s18  }
   0x6   : > { %7216 = sst [smem:[#allocation6_spill]] %s4715_s20  ;;  %s3783_s23 = sadd.s32 4294967294, %s4719_s21  }
   0x7   : > { %s4838_s24 = sadd.s32 1, %s4719_s21   ;;  %s355_s25 = sadd.s32 1, %s4715_s20 }
   0x8   : > { %7217 = sst [smem:[#allocation7_spill]] %s4838_s24  ;;  %s352_s26 = ssub.s32 %s4719_s21, %s4838_s24 }
   0x9   : > { %p365_p0 = scmp.ne.s32.totalorder %s4715_s20, %s4711_s19  ;;  %p353_p1 = scmp.eq.s32.totalorder %s352_s26, 0 }
   0xa   : > { %p366_p2 = scmp.eq.s32.totalorder %s4834_s22, 1  ;;  %p371_p3 = scmp.ne.s32.totalorder %s4711_s19, %s4707_s18 }
   0xb   : > { %p372_p4 = scmp.eq.s32.totalorder %s3783_s23, 1  ;;  %p3786_p7 = scmp.ge.s32.totalorder %s4719_s21, 1 }
   0xc   : > { %s4849_s27 = scalar_select %p353_p1, %s4715_s20, %s355_s25  }
   0xd   : > { %p4851_p5 = por %p366_p2, %p365_p0  ;;  %p4855_p6 = por %p372_p4, %p371_p3 }
   0xe   : > { %7218 = sst [smem:[#allocation8_spill]] %s4849_s27  ;;  %p442_p8 = scmp.lt.s32.totalorder %s4719_s21, 3 }
   0xf   : > { %s7220_s29 = scalar_select %p4855_p6, 1, 0 }
  0x10   : > { %p443_p9 = pnand %p3786_p7, %p442_p8 }
  0x11   : > { %7221 = sst [smem:[#allocation9_spill]] %s7220_s29  ;;  %s3788_s30 = sshll.u32 (!%p443_p9), %s4834_s22, 3 }
  0x12   : > { %446 = sbr.rel (%p443_p9) target bundleno = 2501 (0x9c5), region = 80  ;;  %p492_p10 = scmp.lt.s32.totalorder (!%p443_p9), %s3788_s30, 15 }
  0x13   : > { %s7222_s0 = sld [smem:[#allocation10_spill]] (!%p443_p9)  ;;  %s7174_s17 = smov (!%p443_p9), 84  }
  0x14   : > { %s4722_s25 = smov (!%p443_p9), 28   ;;  %s7172_s27 = smov (!%p443_p9), 56  }
  0x15   : > { %s7224_s20 = smov (!%p443_p9), 56   ;;  %s4729_s16 = smov (!%p443_p9), 32  }
  0x16   : > { %s3975_s26 = sshll.u32 (!%p443_p9), %s4834_s22, 7  ;;  %s4732_s29 = smov (!%p443_p9), [#allocation2]  }
  0x17   : > { %v1209_v0 = vld [vmem:[%s7152_s1 + $0xf8] sm:$0xff]  ;;  %v1208_v1 = vld [vmem:[%s7152_s1 + $0xf0] sm:$0xff]  ;;  %v1207_v2 = vld [vmem:[%s7152_s1 + $0xe8] sm:$0xff]  ;;  %s7271_s30 = smov (!%p492_p10, %s3788_s30), 15  ;;  %vm820_vm0 = vcmask 1044480   ;;  %vm562_vm1 = vcmask 1046528  }
  0x18   : > { %1281 = vmatprep.subr.mxu0 %v1209_v0  ;;  %v1206_v3 = vld [vmem:[%s7152_s1 + $0xe0] sm:$0xff]  ;;  %v1205_v4 = vld [vmem:[%s7152_s1 + $0xd8] sm:$0xff]  ;;  %v1204_v5 = vld [vmem:[%s7152_s1 + $0xd0] sm:$0xff]  ;;  %s3978_s23 = sshll.u32 %s7271_s30, 5  ;;  %vm949_vm2 = vcmask 1043456   ;;  %vm691_vm3 = vcmask 1045504  }
  0x19   : > { %1282 = vmatpush1.msra.mxu0 %v1208_v1  ;;  %v1203_v6 = vld [vmem:[%s7152_s1 + $0xc8] sm:$0xff]  ;;  %s4886_s24 = scalar_lea.vmem %s7222_s0, %s3978_s23  ;;  %v1202_v7 = vld [vmem:[%s7152_s1 + $0xc0] sm:$0xff]  ;;  %v1201_v8 = vld [vmem:[%s7152_s1 + $0xb8] sm:$0xff]  ;;  %s4723_s23 = smov 112   ;;  %vm1226_vm4 = vcmask 97280   ;;  %vm1078_vm5 = vcmask 228352  }
  0x1a   : > { %1283 = vmatprep.subr.mxu0 %v1207_v2  ;;  %v4895_v9 = vld [vmem:[%s4886_s24] sm:$0xff]  ;;  %v4898_v10 = vld [vmem:[%s4886_s24 + $0x8] sm:$0xff]  ;;  %v4901_v11 = vld [vmem:[%s4886_s24 + $0x10] sm:$0xff]  ;;  %s7223_s30 = smov 84   ;;  %vm1103_vm6 = vcmask 457728   ;;  %vm1128_vm7 = vcmask 687104  }
  0x1b   : > { %1284 = vmatpush1.msra.mxu0 %v1206_v3  ;;  %v821_v12 = vrot.slane %v4895_v9, 3  ;;  %v822_v13 = vrot.slane %v4898_v10, 3  ;;  %v824_v14 = vrot.slane %v4901_v11, 3  ;;  %v563_v15 = vrot.slane %v4895_v9, 1  ;;  %v1200_v16 = vld [vmem:[%s7152_s1 + $0xb0] sm:$0xff]  ;;  %v1199_v17 = vld [vmem:[%s7152_s1 + $0xa8] sm:$0xff] }
  0x1c   : > { %1285 = vmatprep.subr.mxu0 %v1205_v4  ;;  %v564_v18 = vrot.slane %v4898_v10, 1  ;;  %v566_v19 = vrot.slane %v4901_v11, 1  ;;  %v950_v20 = vrot.slane %v4895_v9, 4  ;;  %v951_v21 = vrot.slane %v4898_v10, 4  ;;  %v4918_v22 = vld [vmem:[%s4886_s24 + $0x18] sm:$0xf] }
  0x1d   : > { %1286 = vmatpush1.msra.mxu0 %v1204_v5  ;;  %v823_v23 = vsel %vm820_vm0, %v821_v12, %v822_v13  ;;  %v825_v24 = vsel %vm820_vm0, %v822_v13, %v824_v14  ;;  %v692_v25 = vrot.slane %v4895_v9, 2  ;;  %v693_v26 = vrot.slane %v4898_v10, 2  ;;  %v4927_v27 = vld [vmem:[%s4886_s24 + $0x20] sm:$0xff]  ;;  %v4930_v28 = vld [vmem:[%s4886_s24 + $0x28] sm:$0xff]  ;;  %v1197_v33 = vld [vmem:[%s7152_s1 + $0x98] sm:$0xff]  ;;  %s4663_s22 = sshll.u32 %s4732_s29, 4  ;;  %s4664_s22 = int_to_ptr.vmem [resolvable:$false] %s4663_s22 }
  0x1e   : > { %1287 = vmatprep.subr.mxu0 %v1203_v6  ;;  %v1198_v29 = vld [vmem:[%s7152_s1 + $0xa0] sm:$0xff]  ;;  %v4459_v30 = vpack.i.bf16 %v825_v24, %v823_v23  ;;  %v565_v31 = vsel %vm562_vm1, %v563_v15, %v564_v18  ;;  %v567_v32 = vsel %vm562_vm1, %v564_v18, %v566_v19  ;;  %v695_v36 = vrot.slane %v4901_v11, 2  ;;  %v1196_v38 = vld [vmem:[%s7152_s1 + $0x90] sm:$0xff]  ;;  %v1195_v43 = vld [vmem:[%s7152_s1 + $0x88] sm:$0xff] }
  0x1f   : > { %1288 = vmatpush1.msra.mxu0 %v1202_v7  ;;  %v4449_v34 = vpack.i.bf16 %v567_v32, %v565_v31  ;;  %v694_v35 = vsel %vm691_vm3, %v692_v25, %v693_v26  ;;  %v568_v37 = vrot.slane %v4918_v22, 1  ;;  %v952_v39 = vsel %vm949_vm2, %v950_v20, %v951_v21  ;;  %v1194_v48 = vld [vmem:[%s7152_s1 + $0x80] sm:$0xff]  ;;  %v1193_v52 = vld [vmem:[%s7152_s1 + $0x78] sm:$0xff]  ;;  %v1192_v55 = vld [vmem:[%s7152_s1 + $0x70] sm:$0xff] }
  0x20   : > { %1289 = vmatprep.subr.mxu0 %v1201_v8  ;;  %4460 = vrot.lane.b32.xlu1 %v4459_v30, %s7174_s17  ;;  %v570_v40 = vrot.slane %v4927_v27, 1  ;;  %v571_v41 = vrot.slane %v4930_v28, 1  ;;  %v826_v42 = vrot.slane %v4918_v22, 3  ;;  %v696_v44 = vsel %vm691_vm3, %v693_v26, %v695_v36  ;;  %v4984_v60 = vld [vmem:[%s4886_s24 + $0x30] sm:$0xff]  ;;  %v4987_v61 = vld [vmem:[%s4886_s24 + $0x38] sm:$0xf] }
  0x21   : > { %1290 = vmatpush1.msra.mxu0 %v1200_v16  ;;  %4450 = vrot.lane.b32.xlu0 %v4449_v34, %s4722_s25  ;;  %v569_v45 = vsel %vm562_vm1, %v566_v19, %v568_v37  ;;  %v828_v46 = vrot.slane %v4927_v27, 3  ;;  %v829_v47 = vrot.slane %v4930_v28, 3  ;;  %v4454_v49 = vpack.i.bf16 %v696_v44, %v694_v35  ;;  %v1191_v1 = vld [vmem:[%s7152_s1 + $0x68] sm:$0xff]  ;;  %v1190_v2 = vld [vmem:[%s7152_s1 + $0x60] sm:$0xff]  ;;  %v1189_v3 = vld [vmem:[%s7152_s1 + $0x58] sm:$0xff] }
  0x22   : > { %1291 = vmatprep.subr.mxu0 %v1199_v17  ;;  %v572_v50 = vsel %vm562_vm1, %v570_v40, %v571_v41  ;;  %v953_v51 = vrot.slane %v4901_v11, 4  ;;  %v697_v53 = vrot.slane %v4918_v22, 2  ;;  %v699_v54 = vrot.slane %v4927_v27, 2  ;;  %v1188_v4 = vld [vmem:[%s7152_s1 + $0x50] sm:$0xff]  ;;  %v1187_v8 = vld [vmem:[%s7152_s1 + $0x48] sm:$0xff]  ;;  %v1186_v18 = vld [vmem:[%s7152_s1 + $0x40] sm:$0xff] }
  0x23   : > { %1292 = vmatpush1.msra.mxu0 %v1198_v29  ;;  %v4464_v56 = vpack.i.bf16 %v572_v50, %v569_v45  ;;  %v700_v57 = vrot.slane %v4930_v28, 2  ;;  %v827_v58 = vsel %vm820_vm0, %v824_v14, %v826_v42  ;;  %v830_v59 = vsel %vm820_vm0, %v828_v46, %v829_v47  ;;  %v1185_v19 = vld [vmem:[%s7152_s1 + $0x38] sm:$0xff]  ;;  %v5032_v25 = vld [vmem:[%s4886_s24 + $0x40] sm:$0xff]  ;;  %v5041_v32 = vld [vmem:[%s4886_s24 + $0x48] sm:$0xff] }
  0x24   : > { %1293 = vmatprep.subr.mxu0 %v1197_v33  ;;  %1006 = vrot.lane.b32.xlu1 %v952_v39, %s4723_s23  ;;  %v954_v62 = vsel %vm949_vm2, %v951_v21, %v953_v51  ;;  %v698_v63 = vsel %vm691_vm3, %v695_v36, %v697_v53  ;;  %v4474_v5 = vpack.i.bf16 %v830_v59, %v827_v58  ;;  %v957_v6 = vrot.slane %v4927_v27, 4  ;;  %v1184_v21 = vld [vmem:[%s7152_s1 + $0x30] sm:$0xff]  ;;  %v1183_v34 = vld [vmem:[%s7152_s1 + $0x28] sm:$0xff]  ;;  %v1182_v35 = vld [vmem:[%s7152_s1 + $0x20] sm:$0xff] }
  0x25   : > { %1294 = vmatpush1.msra.mxu0 %v1196_v38  ;;  %4455 = vrot.lane.b32.xlu0 %v4454_v49, %s7172_s27  ;;  %v701_v0 = vsel %vm691_vm3, %v699_v54, %v700_v57  ;;  %v958_v7 = vrot.slane %v4930_v28, 4  ;;  %v955_v13 = vrot.slane %v4918_v22, 4  ;;  %v702_v14 = vrot.slane %v4984_v60, 2  ;;  %v5044_v33 = vld [vmem:[%s4886_s24 + $0x50] sm:$0xff]  ;;  %v1181_v38 = vld [vmem:[%s7152_s1 + $0x18] sm:$0xff]  ;;  %v1179_v46 = vld [vmem:[%s7152_s1 + $0x8] sm:$0xff] }
  0x26   : > { %1295 = vmatprep.subr.mxu0 %v1195_v43  ;;  %v4469_v12 = vpack.i.bf16 %v701_v0, %v698_v63  ;;  %v704_v15 = vrot.slane %v4987_v61, 2  ;;  %v573_v16 = vrot.slane %v4984_v60, 1  ;;  %v575_v17 = vrot.slane %v4987_v61, 1  ;;  %v1180_v45 = vld [vmem:[%s7152_s1 + $0x10] sm:$0xff]  ;;  %v1178_v50 = vld [vmem:[%s7152_s1] sm:$0xff] }
  0x27   : > { %1296 = vmatpush1.msra.mxu0 %v1194_v48  ;;  %v959_v20 = vsel %vm949_vm2, %v957_v6, %v958_v7  ;;  %v956_v22 = vsel %vm949_vm2, %v953_v51, %v955_v13  ;;  %v703_v23 = vsel %vm691_vm3, %v700_v57, %v702_v14  ;;  %v831_v30 = vrot.slane %v4984_v60, 3 }
  0x28   : > { %1297 = vmatprep.subr.mxu0 %v1193_v52  ;;  %4465 = vrot.lane.b32.xlu1 %v4464_v56, %s4722_s25  ;;  %v705_v24 = vsel %vm691_vm3, %v702_v14, %v704_v15  ;;  %v574_v26 = vsel %vm562_vm1, %v571_v41, %v573_v16  ;;  %v576_v29 = vsel %vm562_vm1, %v573_v16, %v575_v17  ;;  %v833_v31 = vrot.slane %v4987_v61, 3 }
  0x29   : > { %1298 = vmatpush1.msra.mxu0 %v1192_v55  ;;  %1008 = vrot.lane.b32.xlu0 %v954_v62, %s4723_s23  ;;  %v4484_v36 = vpack.i.bf16 %v705_v24, %v703_v23  ;;  %v960_v37 = vrot.slane %v4984_v60, 4  ;;  %v4479_v39 = vpack.i.bf16 %v576_v29, %v574_v26  ;;  %v577_v40 = vrot.slane %v5032_v25, 1  ;;  %v1213_v55 = vld [vmem:[%s7152_s1 + $0x118] sm:$0xf]  ;;  %v1212_v62 = vld [vmem:[%s7152_s1 + $0x110] sm:$0xf] }
  0x2a   : > { %1299 = vmatprep.subr.mxu0 %v1191_v1  ;;  %v578_v41 = vrot.slane %v5041_v32, 1  ;;  %v580_v42 = vrot.slane %v5044_v33, 1  ;;  %v832_v43 = vsel %vm820_vm0, %v829_v47, %v831_v30  ;;  %v834_v44 = vsel %vm820_vm0, %v831_v30, %v833_v31 }
  0x2b   : > { %1300 = vmatpush1.msra.mxu0 %v1190_v2  ;;  %v961_v48 = vsel %vm949_vm2, %v958_v7, %v960_v37  ;;  %v835_v49 = vrot.slane %v5032_v25, 3  ;;  %v836_v47 = vrot.slane %v5041_v32, 3  ;;  %v4489_v51 = vpack.i.bf16 %v834_v44, %v832_v43  ;;  %v509_v2 = vld [vmem:[%s4886_s24 + $0x58] sm:$0xf]  ;;  %v5110_v7 = vld [vmem:[%s4886_s24 + $0x60] sm:$0xff] }
  0x2c   : > { %1301 = vmatprep.subr.mxu0 %v1189_v3  ;;  %4475 = vrot.lane.b32.xlu1 %v4474_v5, %s7223_s30  ;;  %v579_v52 = vsel %vm562_vm1, %v577_v40, %v578_v41  ;;  %v581_v53 = vsel %vm562_vm1, %v578_v41, %v580_v42  ;;  %v838_v54 = vrot.slane %v5044_v33, 3  ;;  %v962_v56 = vrot.slane %v4987_v61, 4  ;;  %v1211_v61 = vld [vmem:[%s7152_s1 + $0x108] sm:$0xff]  ;;  %v1210_v3 = vld [vmem:[%s7152_s1 + $0x100] sm:$0xff] }
  0x2d   : > { %1302 = vmatpush1.msra.mxu0 %v1188_v4  ;;  %4470 = vrot.lane.b32.xlu0 %v4469_v12, %s7224_s20  ;;  %v706_v57 = vrot.slane %v5032_v25, 2  ;;  %v707_v58 = vrot.slane %v5041_v32, 2  ;;  %v709_v59 = vrot.slane %v5044_v33, 2  ;;  %v4494_v63 = vpack.i.bf16 %v581_v53, %v579_v52 }
  0x2e   : > { %1303 = vmatprep.subr.mxu0 %v1187_v8  ;;  %v837_v0 = vsel %vm820_vm0, %v835_v49, %v836_v47  ;;  %v839_v1 = vsel %vm820_vm0, %v836_v47, %v838_v54  ;;  %v963_v4 = vsel %vm949_vm2, %v960_v37, %v962_v56  ;;  %v5113_v8 = vld [vmem:[%s4886_s24 + $0x68] sm:$0xff]  ;;  %v965_v13 = vrot.slane %v5041_v32, 4 }
  0x2f   : > { %1304 = vmatpush1.msra.mxu0 %v1186_v18  ;;  %v708_v5 = vsel %vm691_vm3, %v706_v57, %v707_v58  ;;  %v710_v6 = vsel %vm691_vm3, %v707_v58, %v709_v59  ;;  %v4504_v12 = vpack.i.bf16 %v839_v1, %v837_v0  ;;  %v967_v14 = vrot.slane %v5044_v33, 4  ;;  %v5166_v0 = vld [vmem:[%s4886_s24 + $0x88] sm:$0xff]  ;;  %v5169_v1 = vld [vmem:[%s4886_s24 + $0x90] sm:$0xff] }
  0x30   : > { %1305 = vmatprep.subr.mxu0 %v1185_v19  ;;  %1012 = vrot.lane.b32.xlu1 %v959_v20, %s4723_s23  ;;  %v711_v15 = vrot.slane %v509_v2, 2  ;;  %v4499_v16 = vpack.i.bf16 %v710_v6, %v708_v5  ;;  %v713_v17 = vrot.slane %v5110_v7, 2  ;;  %v714_v18 = vrot.slane %v5113_v8, 2 }
  0x31   : > { %1306 = vmatpush1.msra.mxu0 %v1184_v21  ;;  %1010 = vrot.lane.b32.xlu0 %v956_v22, %s4723_s23  ;;  %v964_v19 = vrot.slane %v5032_v25, 4  ;;  %v582_v20 = vrot.slane %v509_v2, 1  ;;  %v584_v21 = vrot.slane %v5110_v7, 1  ;;  %v585_v22 = vrot.slane %v5113_v8, 1 }
  0x32   : > { %1307 = vmatprep.subr.mxu0 %v1183_v34  ;;  %v968_v23 = vsel %vm949_vm2, %v965_v13, %v967_v14  ;;  %v712_v24 = vsel %vm691_vm3, %v709_v59, %v711_v15  ;;  %v715_v26 = vsel %vm691_vm3, %v713_v17, %v714_v18  ;;  %v840_v29 = vrot.slane %v509_v2, 3  ;;  %v5133_v34 = vld [vmem:[%s4886_s24 + $0x70] sm:$0xff] }
  0x33   : > { %1308 = vmatpush1.msra.mxu0 %v1182_v35  ;;  %v842_v30 = vrot.slane %v5110_v7, 3  ;;  %v843_v31 = vrot.slane %v5113_v8, 3  ;;  %v966_v35 = vsel %vm949_vm2, %v964_v19, %v965_v13  ;;  %v586_v37 = vsel %vm562_vm1, %v584_v21, %v585_v22 }
  0x34   : > { %1309 = vmatprep.subr.mxu0 %v1181_v38  ;;  %4485 = vrot.lane.b32.xlu1 %v4484_v36, %s7224_s20  ;;  %v583_v36 = vsel %vm562_vm1, %v580_v42, %v582_v20  ;;  %v513_v38 = vld [vmem:[%s4886_s24 + $0x78] sm:$0xf]  ;;  %v969_v40 = vrot.slane %v509_v2, 4  ;;  %v587_v41 = vrot.slane %v5133_v34, 1  ;;  %v841_v44 = vsel %vm820_vm0, %v838_v54, %v840_v29 }
  0x35   : > { %4480 = vrot.lane.b32.xlu0 %v4479_v39, %s4722_s25  ;;  %1310 = vmatpush1.msra.mxu0 %v1180_v45  ;;  %v4514_v39 = vpack.i.bf16 %v715_v26, %v712_v24  ;;  %v4509_v43 = vpack.i.bf16 %v586_v37, %v583_v36  ;;  %v844_v45 = vsel %vm820_vm0, %v842_v30, %v843_v31  ;;  %v845_v47 = vrot.slane %v5133_v34, 3  ;;  %v5195_v30 = vld [vmem:[%s4886_s24 + $0xa0] sm:$0xff] }
  0x36   : > { %1311 = vmatprep.subr.mxu0 %v1179_v46  ;;  %v589_v46 = vrot.slane %v513_v38, 1  ;;  %v970_v42 = vsel %vm949_vm2, %v967_v14, %v969_v40  ;;  %v588_v49 = vsel %vm562_vm1, %v585_v22, %v587_v41  ;;  %v716_v52 = vrot.slane %v5133_v34, 2  ;;  %v5188_v22 = vld [vmem:[%s4886_s24 + $0x98] sm:$0xf] }
  0x37   : > { %1312 = vmatpush1.msra.mxu0 %v1178_v50  ;;  %v718_v53 = vrot.slane %v513_v38, 2  ;;  %v971_v54 = vrot.slane %v5110_v7, 4  ;;  %v846_v57 = vsel %vm820_vm0, %v843_v31, %v845_v47  ;;  %v974_v2 = vrot.slane %v5133_v34, 4  ;;  %v5198_v31 = vld [vmem:[%s4886_s24 + $0xa8] sm:$0xff] }
  0x38   : > { %1014 = vrot.lane.b32.xlu1 %v961_v48, %s4723_s23  ;;  %3791 = vmatprep.subr.msk.mxu0 %vm949_vm2, %v1213_v55  ;;  %v4519_v48 = vpack.i.bf16 %v844_v45, %v841_v44  ;;  %v590_v50 = vsel %vm562_vm1, %v587_v41, %v589_v46  ;;  %v972_v55 = vrot.slane %v5113_v8, 4  ;;  %v717_v59 = vsel %vm691_vm3, %v714_v18, %v716_v52 }
  0x39   : > { %4490 = vrot.lane.b32.xlu0 %v4489_v51, %s7223_s30  ;;  %3792 = vmatpush2.msk.msra.mxu0 %vm949_vm2, %v1212_v62  ;;  %v847_v51 = vrot.slane %v513_v38, 3  ;;  %v4524_v56 = vpack.i.bf16 %v590_v50, %v588_v49  ;;  %v719_v62 = vsel %vm691_vm3, %v716_v52, %v718_v53  ;;  %v976_v5 = vrot.slane %v513_v38, 4 }
  0x3a   : > { %1343 = vmatprep.subr.mxu0 %v1211_v61  ;;  %v973_v61 = vsel %vm949_vm2, %v971_v54, %v972_v55  ;;  %v723_v13 = vrot.slane %v5169_v1, 2  ;;  %v592_v15 = vrot.slane %v5166_v0, 1  ;;  %v975_v17 = vsel %vm949_vm2, %v972_v55, %v974_v2 }
  0x3b   : > { %1344 = vmatpush2.msra.mxu0 %v1210_v3  ;;  %v848_v58 = vsel %vm820_vm0, %v845_v47, %v847_v51  ;;  %v977_v18 = vsel %vm949_vm2, %v974_v2, %v976_v5  ;;  %v850_v26 = vrot.slane %v5166_v0, 3  ;;  %v852_v29 = vrot.slane %v5169_v1, 3  ;;  %v521_v2 = vld [vmem:[%s4886_s24 + $0xb8] sm:$0xf] }
  0x3c   : > { %4495 = vrot.lane.b32.xlu1 %v4494_v63, %s4722_s25  ;;  %v5162_v63 = vld [vmem:[%s4886_s24 + $0x80] sm:$0xff]  ;;  %v4534_v3 = vpack.i.bf16 %v848_v58, %v846_v57  ;;  %v979_v37 = vrot.slane %v5166_v0, 4  ;;  %v598_v40 = vrot.slane %v5195_v30, 1  ;;  %v599_v41 = vrot.slane %v5198_v31, 1 }
  0x3d   : > { %1016 = vrot.lane.b32.xlu0 %v963_v4, %s4723_s23  ;;  %v4529_v4 = vpack.i.bf16 %v719_v62, %v717_v59  ;;  %v720_v6 = vrot.slane %v5162_v63, 2  ;;  %v591_v14 = vrot.slane %v5162_v63, 1  ;;  %v849_v24 = vrot.slane %v5162_v63, 3 }
  0x3e   : > { %v978_v36 = vrot.slane %v5162_v63, 4  ;;  %v853_v44 = vsel %vm820_vm0, %v850_v26, %v852_v29  ;;  %v854_v46 = vrot.slane %v5188_v22, 3  ;;  %v600_v47 = vsel %vm562_vm1, %v598_v40, %v599_v41 }
  0x3f   : > { %v593_v21 = vsel %vm562_vm1, %v591_v14, %v592_v15  ;;  %v857_v50 = vrot.slane %v5198_v31, 3  ;;  %v981_v51 = vrot.slane %v5169_v1, 4  ;;  %v725_v52 = vrot.slane %v5188_v22, 2 }
  0x40   : > { %4505 = vrot.lane.b32.xlu1 %v4504_v12, %s7223_s30  ;;  %v721_v12 = vrot.slane %v5166_v0, 2  ;;  %v980_v45 = vsel %vm949_vm2, %v978_v36, %v979_v37  ;;  %v727_v53 = vrot.slane %v5195_v30, 2  ;;  %v728_v54 = vrot.slane %v5198_v31, 2 }
  0x41   : > { %4500 = vrot.lane.b32.xlu0 %v4499_v16, %s7224_s20  ;;  %v594_v16 = vrot.slane %v5169_v1, 1  ;;  %v982_v58 = vsel %vm949_vm2, %v979_v37, %v981_v51  ;;  %v726_v59 = vsel %vm691_vm3, %v723_v13, %v725_v52  ;;  %v986_v5 = vrot.slane %v5198_v31, 4 }
  0x42   : > { %v722_v19 = vsel %vm691_vm3, %v720_v6, %v721_v12  ;;  %v724_v20 = vsel %vm691_vm3, %v721_v12, %v723_v13  ;;  %v729_v62 = vsel %vm691_vm3, %v727_v53, %v728_v54  ;;  %v732_v13 = vrot.slane %v521_v2, 2 }
  0x43   : > { %v4559_v6 = vpack.i.bf16 %v729_v62, %v726_v59  ;;  %v983_v14 = vrot.slane %v5188_v22, 4  ;;  %vm1153_vm8 = vcmask 916480   ;;  %vm1570_vm9 = vcmask 523264  }
  0x44   : > { %1020 = vrot.lane.b32.xlu1 %v968_v23, %s4723_s23  ;;  %v595_v23 = vsel %vm562_vm1, %v592_v15, %v594_v16  ;;  %vm2072_vm10 = vcmask 130048   ;;  %vm2671_vm11 = vcmask 719872   ;;  %vm2654_vm12 = vcmask 588800  }
  0x45   : > { %1018 = vrot.lane.b32.xlu0 %v966_v35, %s4723_s23  ;;  %v4544_v35 = vpack.i.bf16 %v724_v20, %v722_v19  ;;  %v4539_v38 = vpack.i.bf16 %v595_v23, %v593_v21  ;;  %v861_v21 = vrot.slane %v521_v2, 3  ;;  %v5246_v23 = vld [vmem:[%s4886_s24 + $0xc0] sm:$0xff]  ;;  %vm2680_vm13 = vcmask 261120  }
  0x46   : > { %v734_v52 = vrot.slane %v5246_v23, 2  ;;  %vm2741_vm14 = vcmask 850944   ;;  %vm4731_vm15 = vmmov 0  }
  0x48   : > { %4515 = vrot.lane.b32.xlu1 %v4514_v39, %s7224_s20  ;;  %v596_v39 = vrot.slane %v5188_v22, 1  ;;  %v984_v22 = vsel %vm949_vm2, %v981_v51, %v983_v14  ;;  %v990_v51 = vrot.slane %v521_v2, 4 }
  0x49   : > { %4510 = vrot.lane.b32.xlu0 %v4509_v43, %s4722_s25  ;;  %v851_v43 = vsel %vm820_vm0, %v849_v24, %v850_v26  ;;  %v5249_v24 = vld [vmem:[%s4886_s24 + $0xc8] sm:$0xff] }
  0x4a   : > { %v597_v49 = vsel %vm562_vm1, %v594_v16, %v596_v39  ;;  %v603_v16 = vrot.slane %v521_v2, 1  ;;  %v606_v39 = vrot.slane %v5249_v24, 1  ;;  %v735_v53 = vrot.slane %v5249_v24, 2  ;;  %v525_v2 = vld [vmem:[%s4886_s24 + $0xd8] sm:$0xf] }
  0x4b   : > { %v4554_v55 = vpack.i.bf16 %v600_v47, %v597_v49  ;;  %v863_v49 = vrot.slane %v5246_v23, 3  ;;  %v864_v47 = vrot.slane %v5249_v24, 3 }
  0x4c   : > { %1022 = vrot.lane.b32.xlu1 %v970_v42, %s4723_s23  ;;  %v856_v42 = vrot.slane %v5195_v30, 3  ;;  %v736_v59 = vsel %vm691_vm3, %v734_v52, %v735_v53 }
  0x4d   : > { %4520 = vrot.lane.b32.xlu0 %v4519_v48, %s7223_s30  ;;  %v4549_v48 = vpack.i.bf16 %v853_v44, %v851_v43 }
  0x4e   : > { %v858_v57 = vsel %vm820_vm0, %v856_v42, %v857_v50 }
  0x50   : > { %4525 = vrot.lane.b32.xlu1 %v4524_v56, %s4722_s25  ;;  %v855_v56 = vsel %vm820_vm0, %v852_v29, %v854_v46 }
  0x51   : > { %1024 = vrot.lane.b32.xlu0 %v973_v61, %s4723_s23  ;;  %v5229_v61 = vld [vmem:[%s4886_s24 + $0xb0] sm:$0xff] }
  0x52   : > { %v730_v12 = vrot.slane %v5229_v61, 2  ;;  %v601_v15 = vrot.slane %v5229_v61, 1  ;;  %v859_v20 = vrot.slane %v5229_v61, 3  ;;  %v988_v37 = vrot.slane %v5229_v61, 4 }
  0x54   : > { %4535 = vrot.lane.b32.xlu1 %v4534_v3, %s7223_s30  ;;  %v4564_v3 = vpack.i.bf16 %v858_v57, %v855_v56  ;;  %v733_v19 = vsel %vm691_vm3, %v730_v12, %v732_v13  ;;  %v602_v26 = vsel %vm562_vm1, %v599_v41, %v601_v15  ;;  %v604_v29 = vsel %vm562_vm1, %v601_v15, %v603_v16 }
  0x55   : > { %4530 = vrot.lane.b32.xlu0 %v4529_v4, %s7224_s20  ;;  %v985_v4 = vrot.slane %v5195_v30, 4  ;;  %v4569_v40 = vpack.i.bf16 %v604_v29, %v602_v26  ;;  %v860_v43 = vsel %vm820_vm0, %v857_v50, %v859_v20  ;;  %v862_v41 = vsel %vm820_vm0, %v859_v20, %v861_v21 }
  0x56   : > { %v4579_v46 = vpack.i.bf16 %v862_v41, %v860_v43  ;;  %v865_v56 = vsel %vm820_vm0, %v863_v49, %v864_v47  ;;  %v992_v13 = vrot.slane %v5246_v23, 4  ;;  %v739_v15 = vrot.slane %v525_v2, 2  ;;  %v5310_v43 = vld [vmem:[%s4886_s24 + $0xf0] sm:$0xff]  ;;  %v529_v41 = vld [vmem:[%s4886_s24 + $0xf8] sm:$0xf] }
  0x57   : > { %v617_v49 = vrot.slane %v529_v41, 1 }
  0x58   : > { %1028 = vrot.lane.b32.xlu1 %v977_v18, %s4723_s23  ;;  %v731_v18 = vsel %vm691_vm3, %v728_v54, %v730_v12 }
  0x59   : > { %1026 = vrot.lane.b32.xlu0 %v975_v17, %s4723_s23  ;;  %v987_v17 = vsel %vm949_vm2, %v985_v4, %v986_v5  ;;  %v4574_v36 = vpack.i.bf16 %v733_v19, %v731_v18  ;;  %v5288_v4 = vld [vmem:[%s4886_s24 + $0xe8] sm:$0xff]  ;;  %v610_v18 = vrot.slane %v525_v2, 1 }
  0x5a   : > { %v613_v20 = vrot.slane %v5288_v4, 1 }
  0x5c   : > { %4545 = vrot.lane.b32.xlu1 %v4544_v35, %s7224_s20  ;;  %v5255_v35 = vld [vmem:[%s4886_s24 + $0xd0] sm:$0xff] }
  0x5d   : > { %4540 = vrot.lane.b32.xlu0 %v4539_v38, %s4722_s25  ;;  %v605_v38 = vrot.slane %v5246_v23, 1  ;;  %v608_v44 = vrot.slane %v5255_v35, 1  ;;  %v866_v50 = vrot.slane %v5255_v35, 3  ;;  %v737_v54 = vrot.slane %v5255_v35, 2 }
  0x5e   : > { %v995_v12 = vrot.slane %v5255_v35, 4 }
  0x5f   : > { %v607_v42 = vsel %vm562_vm1, %v605_v38, %v606_v39  ;;  %v867_v57 = vsel %vm820_vm0, %v864_v47, %v866_v50  ;;  %v738_v62 = vsel %vm691_vm3, %v735_v53, %v737_v54  ;;  %v740_v26 = vsel %vm691_vm3, %v737_v54, %v739_v15 }
  0x60   : > { %1030 = vrot.lane.b32.xlu1 %v980_v45, %s4723_s23  ;;  %v989_v45 = vsel %vm949_vm2, %v986_v5, %v988_v37  ;;  %v4594_v5 = vpack.i.bf16 %v867_v57, %v865_v56  ;;  %v4589_v14 = vpack.i.bf16 %v738_v62, %v736_v59  ;;  %v1000_v56 = vrot.slane %v5288_v4, 4 }
  0x61   : > { %4550 = vrot.lane.b32.xlu0 %v4549_v48, %s7223_s30  ;;  %v609_v48 = vsel %vm562_vm1, %v606_v39, %v608_v44  ;;  %v873_v57 = vrot.slane %v5310_v43, 3  ;;  %v744_v59 = vrot.slane %v5310_v43, 2 }
  0x64   : > { %4555 = vrot.lane.b32.xlu1 %v4554_v55, %s4722_s25  ;;  %v4584_v55 = vpack.i.bf16 %v609_v48, %v607_v42  ;;  %v997_v42 = vrot.slane %v525_v2, 4  ;;  %v615_v48 = vrot.slane %v5310_v43, 1 }
  0x65   : > { %1032 = vrot.lane.b32.xlu0 %v982_v58, %s4723_s23  ;;  %v991_v58 = vsel %vm949_vm2, %v988_v37, %v990_v51  ;;  %v611_v37 = vsel %vm562_vm1, %v608_v44, %v610_v18 }
  0x66   : > { %v998_v51 = vsel %vm949_vm2, %v995_v12, %v997_v42  ;;  %v616_v53 = vsel %vm562_vm1, %v613_v20, %v615_v48  ;;  %v618_v54 = vsel %vm562_vm1, %v615_v48, %v617_v49 }
  0x68   : > { %4565 = vrot.lane.b32.xlu1 %v4564_v3, %s7223_s30  ;;  %v5285_v3 = vld [vmem:[%s4886_s24 + $0xe0] sm:$0xff] }
  0x69   : > { %4560 = vrot.lane.b32.xlu0 %v4559_v6, %s7224_s20  ;;  %v993_v6 = vrot.slane %v5249_v24, 4  ;;  %v741_v16 = vrot.slane %v5285_v3, 2  ;;  %v612_v19 = vrot.slane %v5285_v3, 1  ;;  %v870_v39 = vrot.slane %v5285_v3, 3 }
  0x6b   : > { %v996_v21 = vsel %vm949_vm2, %v993_v6, %v995_v12  ;;  %v614_v38 = vsel %vm562_vm1, %v612_v19, %v613_v20 }
  0x6c   : > { %1036 = vrot.lane.b32.xlu1 %v987_v17, %s4723_s23  ;;  %v742_v17 = vrot.slane %v5288_v4, 2 }
  0x6d   : > { %1034 = vrot.lane.b32.xlu0 %v984_v22, %s4723_s23  ;;  %v994_v22 = vsel %vm949_vm2, %v992_v13, %v993_v6  ;;  %v1002_v6 = vrot.slane %v5310_v43, 4  ;;  %v1004_v13 = vrot.slane %v529_v41, 4 }
  0x6e   : > { %v743_v29 = vsel %vm691_vm3, %v741_v16, %v742_v17  ;;  %v875_v16 = vrot.slane %v529_v41, 3 }
  0x6f   : > { %v1003_v15 = vsel %vm949_vm2, %v1000_v56, %v1002_v6 }
  0x70   : > { %4575 = vrot.lane.b32.xlu1 %v4574_v36, %s7224_s20  ;;  %v868_v36 = vrot.slane %v525_v2, 3  ;;  %v746_v2 = vrot.slane %v529_v41, 2 }
  0x71   : > { %4570 = vrot.lane.b32.xlu0 %v4569_v40, %s4722_s25  ;;  %v871_v40 = vrot.slane %v5288_v4, 3 }
  0x72   : > { %v869_v44 = vsel %vm820_vm0, %v866_v50, %v868_v36  ;;  %v4614_v50 = vpack.i.bf16 %v618_v54, %v616_v53  ;;  %v747_v12 = vsel %vm691_vm3, %v744_v59, %v746_v2 }
  0x73   : > { %v872_v47 = vsel %vm820_vm0, %v870_v39, %v871_v40  ;;  %v874_v62 = vsel %vm820_vm0, %v871_v40, %v873_v57 }
  0x74   : > { %1038 = vrot.lane.b32.xlu1 %v989_v45, %s4723_s23  ;;  %v4604_v45 = vpack.i.bf16 %v743_v29, %v740_v26  ;;  %v4609_v52 = vpack.i.bf16 %v872_v47, %v869_v44 }
  0x75   : > { %4580 = vrot.lane.b32.xlu0 %v4579_v46, %s7223_s30  ;;  %v4599_v46 = vpack.i.bf16 %v614_v38, %v611_v37 }
  0x78   : > { %4585 = vrot.lane.b32.xlu1 %v4584_v55, %s4722_s25  ;;  %v999_v55 = vrot.slane %v5285_v3, 4 }
  0x79   : > { %1040 = vrot.lane.b32.xlu0 %v991_v58, %s4723_s23 }
  0x7a   : > { %v1001_v58 = vsel %vm949_vm2, %v999_v55, %v1000_v56 }
  0x7c   : > { %4595 = vrot.lane.b32.xlu1 %v4594_v5, %s7223_s30  ;;  %v745_v5 = vsel %vm691_vm3, %v742_v17, %v744_v59  ;;  %v1005_v17 = vsel %vm949_vm2, %v1002_v6, %v1004_v13 }
  0x7d   : > { %4590 = vrot.lane.b32.xlu0 %v4589_v14, %s7224_s20 }
  0x80   : > { %1044 = vrot.lane.b32.xlu1 %v996_v21, %s4723_s23 }
  0x81   : > { %1042 = vrot.lane.b32.xlu0 %v994_v22, %s4723_s23  ;;  %v876_v22 = vsel %vm820_vm0, %v873_v57, %v875_v16 }
  0x84   : > { %4605 = vrot.lane.b32.xlu1 %v4604_v45, %s7224_s20 }
  0x85   : > { %4600 = vrot.lane.b32.xlu0 %v4599_v46, %s4722_s25 }
  0x88   : > { %1046 = vrot.lane.b32.xlu1 %v998_v51, %s4723_s23 }
  0x89   : > { %4610 = vrot.lane.b32.xlu0 %v4609_v52, %s7223_s30 }
  0x8c   : > { %4615 = vrot.lane.b32.xlu1 %v4614_v50, %s4722_s25 }
  0x8d   : > { %1048 = vrot.lane.b32.xlu0 %v1001_v58, %s4723_s23 }
  0x90   : > { %921 = vrot.lane.b32.xlu1 %v874_v62, %s7223_s30 }
  0x91   : > { %792 = vrot.lane.b32.xlu0 %v745_v5, %s7224_s20 }
  0x92   : > { %v4461_v14 = vpop.permute.xlu1 %4460 }
  0x93   : > { %v4451_v18 = vpop.permute.xlu0 %4450  ;;  %v4462_v37 = vunpack.i.l.bf16 %v4461_v14  ;;  %v4463_v46 = vunpack.i.h.bf16 %v4461_v14 }
  0x94   : > { %794 = vrot.lane.b32.xlu1 %v747_v12, %s7224_s20  ;;  %v4453_v19 = vunpack.i.h.bf16 %v4451_v18  ;;  %v4452_v20 = vunpack.i.l.bf16 %v4451_v18  ;;  %s4728_s20 = smov 88  }
  0x95   : > { %1050 = vrot.lane.b32.xlu0 %v1003_v15, %s4723_s23 }
  0x96   : > { %v1007_v21 = vpop.permute.xlu1 %1006  ;;  %v1080_v38 = vsel %vm1078_vm5, %v4898_v10, %v4453_v19  ;;  %v1079_v39 = vsel %vm1078_vm5, %v4895_v9, %v4452_v20 }
  0x97   : > { %v4456_v26 = vpop.permute.xlu0 %4455  ;;  %3793 = vmatprep.mubr.msk.f32.mxu0 %vm1226_vm4, %v1007_v21 }
  0x98   : > { %v4458_v29 = vunpack.i.h.bf16 %v4456_v26  ;;  %v4457_v36 = vunpack.i.l.bf16 %v4456_v26  ;;  %1052 = vrot.lane.b32.xlu1 %v1005_v17, %s4723_s23  ;;  %s4726_s23 = smov 16  }
  0x99   : > { %923 = vrot.lane.b32.xlu0 %v876_v22, %s7223_s30  ;;  %s4727_s30 = smov 72  }
  0x9a   : > { %v4466_v40 = vpop.permute.xlu1 %4465  ;;  %v1104_v41 = vsel %vm1103_vm6, %v1079_v39, %v4457_v36  ;;  %v1105_v45 = vsel %vm1103_vm6, %v1080_v38, %v4458_v29 }
  0x9b   : > { %v1009_v42 = vpop.permute.xlu0 %1008  ;;  %v1129_v48 = vsel %vm1128_vm7, %v1104_v41, %v4462_v37  ;;  %v4468_v44 = vunpack.i.h.bf16 %v4466_v40  ;;  %v4467_v47 = vunpack.i.l.bf16 %v4466_v40  ;;  %v1130_v10 = vsel %vm1128_vm7, %v1105_v45, %v4463_v46 }
  0x9c   : > { %v1154_v49 = vsel %vm1153_vm8, %v1129_v48, %v1007_v21  ;;  %v1155_v55 = vsel %vm1153_vm8, %v1130_v10, %v1009_v42 }
  0x9d   : > { %1346 = vmatmul.mubr.f32.vlgmr.msra.gmra.mxu0 %v1154_v49  ;;  %v1082_v56 = vsel %vm1078_vm5, %v4927_v27, %v4468_v44  ;;  %v1081_v50 = vsel %vm1078_vm5, %v4901_v11, %v4467_v47 }
  0x9e   : > { %3794 = vmatprep.mubr.msk.f32.mxu0 %vm1226_vm4, %v1009_v42  ;;  %v4476_v9 = vpop.permute.xlu1 %4475 }
  0x9f   : > { %v4477_v51 = vunpack.i.l.bf16 %v4476_v9  ;;  %v4471_v52 = vpop.permute.xlu0 %4470  ;;  %v4478_v57 = vunpack.i.h.bf16 %v4476_v9 }
  0xa0   : > { %v4473_v53 = vunpack.i.h.bf16 %v4471_v52  ;;  %v4472_v54 = vunpack.i.l.bf16 %v4471_v52 }
  0xa1   : > { %1352 = vmatmul.mubr.f32.gmra.mxu0 %v1155_v55 }
  0xa2   : > { %v1013_v58 = vpop.permute.xlu1 %1012  ;;  %v1106_v59 = vsel %vm1103_vm6, %v1081_v50, %v4472_v54  ;;  %v1107_v62 = vsel %vm1103_vm6, %v1082_v56, %v4473_v53 }
  0xa3   : > { %v1011_v2 = vpop.permute.xlu0 %1010  ;;  %v1131_v5 = vsel %vm1128_vm7, %v1106_v59, %v4477_v51  ;;  %v1132_v27 = vsel %vm1128_vm7, %v1107_v62, %v4478_v57 }
  0xa4   : > { %3795 = vmatprep.mubr.msk.f32.mxu0 %vm1226_vm4, %v1011_v2  ;;  %v1156_v6 = vsel %vm1153_vm8, %v1131_v5, %v1011_v2  ;;  %v1157_v15 = vsel %vm1153_vm8, %v1132_v27, %v1013_v58 }
  0xa5   : > { %1358 = vmatmul.mubr.f32.gmra.mxu0 %v1156_v6 }
  0xa6   : > { %3796 = vmatprep.mubr.msk.f32.mxu0 %vm1226_vm4, %v1013_v58  ;;  %v4486_v11 = vpop.permute.xlu1 %4485 }
  0xa7   : > { %v4481_v12 = vpop.permute.xlu0 %4480  ;;  %v4487_v16 = vunpack.i.l.bf16 %v4486_v11  ;;  %v4488_v20 = vunpack.i.h.bf16 %v4486_v11 }
  0xa8   : > { %v4483_v13 = vunpack.i.h.bf16 %v4481_v12  ;;  %v4482_v14 = vunpack.i.l.bf16 %v4481_v12 }
  0xa9   : > { %1364 = vmatmul.mubr.f32.gmra.mxu0 %v1157_v15 }
  0xaa   : > { %v1083_v18 = vsel %vm1078_vm5, %v4930_v28, %v4482_v14  ;;  %v1015_v19 = vpop.permute.xlu1 %1014  ;;  %v1084_v21 = vsel %vm1078_vm5, %v4984_v60, %v4483_v13 }
  0xab   : > { %v4491_v17 = vpop.permute.xlu0 %4490  ;;  %3797 = vmatprep.mubr.msk.f32.mxu0 %vm1226_vm4, %v1015_v19  ;;  %v1108_v29 = vsel %vm1103_vm6, %v1083_v18, %v4487_v16  ;;  %v1109_v28 = vsel %vm1103_vm6, %v1084_v21, %v4488_v20 }
  0xac   : > { %v4493_v22 = vunpack.i.h.bf16 %v4491_v17  ;;  %v4492_v26 = vunpack.i.l.bf16 %v4491_v17 }
  0xae   : > { %v4496_v36 = vpop.permute.xlu1 %4495  ;;  %v1133_v37 = vsel %vm1128_vm7, %v1108_v29, %v4492_v26  ;;  %v1134_v40 = vsel %vm1128_vm7, %v1109_v28, %v4493_v22 }
  0xaf   : > { %v1017_v38 = vpop.permute.xlu0 %1016  ;;  %v1158_v39 = vsel %vm1153_vm8, %v1133_v37, %v1015_v19  ;;  %v4498_v41 = vunpack.i.h.bf16 %v4496_v36  ;;  %v4497_v45 = vunpack.i.l.bf16 %v4496_v36 }
  0xb0   : > { %1370 = vmatmul.mubr.f32.gmra.mxu0 %v1158_v39  ;;  %v1159_v48 = vsel %vm1153_vm8, %v1134_v40, %v1017_v38 }
  0xb1   : > { %3798 = vmatprep.mubr.msk.f32.mxu0 %vm1226_vm4, %v1017_v38  ;;  %v1086_v47 = vsel %vm1078_vm5, %v5041_v32, %v4498_v41  ;;  %v1085_v10 = vsel %vm1078_vm5, %v5032_v25, %v4497_v45 }
  0xb2   : > { %v4506_v60 = vpop.permute.xlu1 %4505 }
  0xb3   : > { %v4507_v46 = vunpack.i.l.bf16 %v4506_v60  ;;  %v4501_v42 = vpop.permute.xlu0 %4500  ;;  %v4508_v9 = vunpack.i.h.bf16 %v4506_v60 }
  0xb4   : > { %v4503_v49 = vunpack.i.h.bf16 %v4501_v42  ;;  %v4502_v44 = vunpack.i.l.bf16 %v4501_v42  ;;  %1376 = vmatmul.mubr.f32.gmra.mxu0 %v1159_v48 }
  0xb6   : > { %v1021_v51 = vpop.permute.xlu1 %1020  ;;  %v1110_v52 = vsel %vm1103_vm6, %v1085_v10, %v4502_v44  ;;  %v1111_v53 = vsel %vm1103_vm6, %v1086_v47, %v4503_v49 }
  0xb7   : > { %v1019_v54 = vpop.permute.xlu0 %1018  ;;  %v1135_v55 = vsel %vm1128_vm7, %v1110_v52, %v4507_v46  ;;  %v1136_v50 = vsel %vm1128_vm7, %v1111_v53, %v4508_v9 }
  0xb8   : > { %3799 = vmatprep.mubr.msk.f32.mxu0 %vm1226_vm4, %v1019_v54  ;;  %v1160_v56 = vsel %vm1153_vm8, %v1135_v55, %v1019_v54  ;;  %v1161_v59 = vsel %vm1153_vm8, %v1136_v50, %v1021_v51 }
  0xb9   : > { %1382 = vmatmul.mubr.f32.gmra.mxu0 %v1160_v56 }
  0xba   : > { %3800 = vmatprep.mubr.msk.f32.mxu0 %vm1226_vm4, %v1021_v51  ;;  %v4516_v32 = vpop.permute.xlu1 %4515 }
  0xbb   : > { %v4511_v25 = vpop.permute.xlu0 %4510  ;;  %v4517_v62 = vunpack.i.l.bf16 %v4516_v32  ;;  %v4518_v6 = vunpack.i.h.bf16 %v4516_v32 }
  0xbc   : > { %v4513_v57 = vunpack.i.h.bf16 %v4511_v25  ;;  %v4512_v58 = vunpack.i.l.bf16 %v4511_v25 }
  0xbd   : > { %1388 = vmatmul.mubr.f32.gmra.mxu0 %v1161_v59 }
  0xbe   : > { %v1087_v2 = vsel %vm1078_vm5, %v5044_v33, %v4512_v58  ;;  %v1023_v5 = vpop.permute.xlu1 %1022  ;;  %v1088_v11 = vsel %vm1078_vm5, %v5110_v7, %v4513_v57 }
  0xbf   : > { %v4521_v27 = vpop.permute.xlu0 %4520  ;;  %3801 = vmatprep.mubr.msk.f32.mxu0 %vm1226_vm4, %v1023_v5  ;;  %v1112_v14 = vsel %vm1103_vm6, %v1087_v2, %v4517_v62  ;;  %v1113_v33 = vsel %vm1103_vm6, %v1088_v11, %v4518_v6 }
  0xc0   : > { %v4523_v12 = vunpack.i.h.bf16 %v4521_v27  ;;  %v4522_v13 = vunpack.i.l.bf16 %v4521_v27 }
  0xc2   : > { %v4526_v15 = vpop.permute.xlu1 %4525  ;;  %v1137_v16 = vsel %vm1128_vm7, %v1112_v14, %v4522_v13  ;;  %v1138_v20 = vsel %vm1128_vm7, %v1113_v33, %v4523_v12 }
  0xc3   : > { %v1025_v18 = vpop.permute.xlu0 %1024  ;;  %v1162_v19 = vsel %vm1153_vm8, %v1137_v16, %v1023_v5  ;;  %v4528_v17 = vunpack.i.h.bf16 %v4526_v15  ;;  %v4527_v21 = vunpack.i.l.bf16 %v4526_v15 }
  0xc4   : > { %1394 = vmatmul.mubr.f32.gmra.mxu0 %v1162_v19  ;;  %v1163_v29 = vsel %vm1153_vm8, %v1138_v20, %v1025_v18 }
  0xc5   : > { %3802 = vmatprep.mubr.msk.f32.mxu0 %vm1226_vm4, %v1025_v18  ;;  %v1090_v38 = vsel %vm1078_vm5, %v5133_v34, %v4528_v17  ;;  %v1089_v39 = vsel %vm1078_vm5, %v5113_v8, %v4527_v21 }
  0xc6   : > { %v4536_v7 = vpop.permute.xlu1 %4535 }
  0xc7   : > { %v4537_v22 = vunpack.i.l.bf16 %v4536_v7  ;;  %v4531_v26 = vpop.permute.xlu0 %4530  ;;  %v4538_v28 = vunpack.i.h.bf16 %v4536_v7 }
  0xc8   : > { %v4533_v36 = vunpack.i.h.bf16 %v4531_v26  ;;  %v4532_v37 = vunpack.i.l.bf16 %v4531_v26  ;;  %1400 = vmatmul.mubr.f32.gmra.mxu0 %v1163_v29 }
  0xca   : > { %v1029_v40 = vpop.permute.xlu1 %1028  ;;  %v1114_v41 = vsel %vm1103_vm6, %v1089_v39, %v4532_v37  ;;  %v1115_v45 = vsel %vm1103_vm6, %v1090_v38, %v4533_v36 }
  0xcb   : > { %v1027_v60 = vpop.permute.xlu0 %1026  ;;  %v1139_v46 = vsel %vm1128_vm7, %v1114_v41, %v4537_v22  ;;  %v1140_v48 = vsel %vm1128_vm7, %v1115_v45, %v4538_v28 }
  0xcc   : > { %3803 = vmatprep.mubr.msk.f32.mxu0 %vm1226_vm4, %v1027_v60  ;;  %v1164_v42 = vsel %vm1153_vm8, %v1139_v46, %v1027_v60  ;;  %v1165_v47 = vsel %vm1153_vm8, %v1140_v48, %v1029_v40 }
  0xcd   : > { %1406 = vmatmul.mubr.f32.gmra.mxu0 %v1164_v42 }
  0xce   : > { %3804 = vmatprep.mubr.msk.f32.mxu0 %vm1226_vm4, %v1029_v40  ;;  %v4546_v34 = vpop.permute.xlu1 %4545 }
  0xcf   : > { %v4541_v8 = vpop.permute.xlu0 %4540  ;;  %v4547_v10 = vunpack.i.l.bf16 %v4546_v34  ;;  %v4548_v52 = vunpack.i.h.bf16 %v4546_v34 }
  0xd0   : > { %v4543_v49 = vunpack.i.h.bf16 %v4541_v8  ;;  %v4542_v44 = vunpack.i.l.bf16 %v4541_v8 }
  0xd1   : > { %1412 = vmatmul.mubr.f32.gmra.mxu0 %v1165_v47 }
  0xd2   : > { %v1091_v9 = vsel %vm1078_vm5, %v5162_v63, %v4542_v44  ;;  %v1031_v51 = vpop.permute.xlu1 %1030  ;;  %v1092_v54 = vsel %vm1078_vm5, %v5166_v0, %v4543_v49 }
  0xd3   : > { %v4551_v53 = vpop.permute.xlu0 %4550  ;;  %3805 = vmatprep.mubr.msk.f32.mxu0 %vm1226_vm4, %v1031_v51  ;;  %v1116_v50 = vsel %vm1103_vm6, %v1091_v9, %v4547_v10  ;;  %v1117_v63 = vsel %vm1103_vm6, %v1092_v54, %v4548_v52 }
  0xd4   : > { %v4553_v55 = vunpack.i.h.bf16 %v4551_v53  ;;  %v4552_v56 = vunpack.i.l.bf16 %v4551_v53 }
  0xd6   : > { %v4556_v32 = vpop.permute.xlu1 %4555  ;;  %v1141_v25 = vsel %vm1128_vm7, %v1116_v50, %v4552_v56  ;;  %v1142_v59 = vsel %vm1128_vm7, %v1117_v63, %v4553_v55 }
  0xd7   : > { %v1033_v57 = vpop.permute.xlu0 %1032  ;;  %v1166_v58 = vsel %vm1153_vm8, %v1141_v25, %v1031_v51  ;;  %v4558_v62 = vunpack.i.h.bf16 %v4556_v32  ;;  %v4557_v2 = vunpack.i.l.bf16 %v4556_v32 }
  0xd8   : > { %1418 = vmatmul.mubr.f32.gmra.mxu0 %v1166_v58  ;;  %v1167_v27 = vsel %vm1153_vm8, %v1142_v59, %v1033_v57 }
  0xd9   : > { %3806 = vmatprep.mubr.msk.f32.mxu0 %vm1226_vm4, %v1033_v57  ;;  %v1094_v13 = vsel %vm1078_vm5, %v5195_v30, %v4558_v62  ;;  %v1093_v14 = vsel %vm1078_vm5, %v5169_v1, %v4557_v2 }
  0xda   : > { %v4566_v0 = vpop.permute.xlu1 %4565 }
  0xdb   : > { %v4567_v5 = vunpack.i.l.bf16 %v4566_v0  ;;  %v4561_v6 = vpop.permute.xlu0 %4560  ;;  %v4568_v15 = vunpack.i.h.bf16 %v4566_v0 }
  0xdc   : > { %v4563_v11 = vunpack.i.h.bf16 %v4561_v6  ;;  %v4562_v12 = vunpack.i.l.bf16 %v4561_v6  ;;  %1424 = vmatmul.mubr.f32.gmra.mxu0 %v1167_v27 }
  0xde   : > { %v1037_v16 = vpop.permute.xlu1 %1036  ;;  %v1118_v18 = vsel %vm1103_vm6, %v1093_v14, %v4562_v12  ;;  %v1119_v19 = vsel %vm1103_vm6, %v1094_v13, %v4563_v11 }
  0xdf   : > { %v1035_v33 = vpop.permute.xlu0 %1034  ;;  %v1143_v20 = vsel %vm1128_vm7, %v1118_v18, %v4567_v5  ;;  %v1144_v21 = vsel %vm1128_vm7, %v1119_v19, %v4568_v15 }
  0xe0   : > { %3807 = vmatprep.mubr.msk.f32.mxu0 %vm1226_vm4, %v1035_v33  ;;  %v1168_v17 = vsel %vm1153_vm8, %v1143_v20, %v1035_v33  ;;  %v1169_v26 = vsel %vm1153_vm8, %v1144_v21, %v1037_v16 }
  0xe1   : > { %1430 = vmatmul.mubr.f32.gmra.mxu0 %v1168_v17 }
  0xe2   : > { %3808 = vmatprep.mubr.msk.f32.mxu0 %vm1226_vm4, %v1037_v16  ;;  %v4576_v30 = vpop.permute.xlu1 %4575 }
  0xe3   : > { %v4571_v1 = vpop.permute.xlu0 %4570  ;;  %v4577_v29 = vunpack.i.l.bf16 %v4576_v30  ;;  %v4578_v38 = vunpack.i.h.bf16 %v4576_v30 }
  0xe4   : > { %v4573_v7 = vunpack.i.h.bf16 %v4571_v1  ;;  %v4572_v22 = vunpack.i.l.bf16 %v4571_v1 }
  0xe5   : > { %1436 = vmatmul.mubr.f32.gmra.mxu0 %v1169_v26 }
  0xe6   : > { %v1095_v36 = vsel %vm1078_vm5, %v5198_v31, %v4572_v22  ;;  %v1039_v37 = vpop.permute.xlu1 %1038  ;;  %v1096_v28 = vsel %vm1078_vm5, %v5229_v61, %v4573_v7 }
  0xe7   : > { %v4581_v39 = vpop.permute.xlu0 %4580  ;;  %3809 = vmatprep.mubr.msk.f32.mxu0 %vm1226_vm4, %v1039_v37  ;;  %v1120_v45 = vsel %vm1103_vm6, %v1095_v36, %v4577_v29  ;;  %v1121_v31 = vsel %vm1103_vm6, %v1096_v28, %v4578_v38 }
  0xe8   : > { %v4583_v40 = vunpack.i.h.bf16 %v4581_v39  ;;  %v4582_v41 = vunpack.i.l.bf16 %v4581_v39 }
  0xea   : > { %v4586_v60 = vpop.permute.xlu1 %4585  ;;  %v1145_v46 = vsel %vm1128_vm7, %v1120_v45, %v4582_v41  ;;  %v1146_v34 = vsel %vm1128_vm7, %v1121_v31, %v4583_v40 }
  0xeb   : > { %v1041_v42 = vpop.permute.xlu0 %1040  ;;  %v1170_v48 = vsel %vm1153_vm8, %v1145_v46, %v1039_v37  ;;  %v4588_v8 = vunpack.i.h.bf16 %v4586_v60  ;;  %v4587_v49 = vunpack.i.l.bf16 %v4586_v60 }
  0xec   : > { %1442 = vmatmul.mubr.f32.gmra.mxu0 %v1170_v48  ;;  %v1171_v10 = vsel %vm1153_vm8, %v1146_v34, %v1041_v42 }
  0xed   : > { %3810 = vmatprep.mubr.msk.f32.mxu0 %vm1226_vm4, %v1041_v42  ;;  %v1098_v52 = vsel %vm1078_vm5, %v5249_v24, %v4588_v8  ;;  %v1097_v53 = vsel %vm1078_vm5, %v5246_v23, %v4587_v49 }
  0xee   : > { %v4596_v61 = vpop.permute.xlu1 %4595 }
  0xef   : > { %v4597_v44 = vunpack.i.l.bf16 %v4596_v61  ;;  %v4591_v47 = vpop.permute.xlu0 %4590  ;;  %v4598_v54 = vunpack.i.h.bf16 %v4596_v61 }
  0xf0   : > { %v4593_v9 = vunpack.i.h.bf16 %v4591_v47  ;;  %v4592_v51 = vunpack.i.l.bf16 %v4591_v47  ;;  %1448 = vmatmul.mubr.f32.gmra.mxu0 %v1171_v10 }
  0xf2   : > { %v1045_v55 = vpop.permute.xlu1 %1044  ;;  %v1122_v56 = vsel %vm1103_vm6, %v1097_v53, %v4592_v51  ;;  %v1123_v50 = vsel %vm1103_vm6, %v1098_v52, %v4593_v9 }
  0xf3   : > { %v1043_v32 = vpop.permute.xlu0 %1042  ;;  %v1147_v25 = vsel %vm1128_vm7, %v1122_v56, %v4597_v44  ;;  %v1148_v58 = vsel %vm1128_vm7, %v1123_v50, %v4598_v54 }
  0xf4   : > { %3811 = vmatprep.mubr.msk.f32.mxu0 %vm1226_vm4, %v1043_v32  ;;  %v1172_v57 = vsel %vm1153_vm8, %v1147_v25, %v1043_v32  ;;  %v1173_v62 = vsel %vm1153_vm8, %v1148_v58, %v1045_v55  ;;  %v1216_v58 = vlaneseq }
  0xf5   : > { %1454 = vmatmul.mubr.f32.gmra.mxu0 %v1172_v57 }
  0xf6   : > { %3812 = vmatprep.mubr.msk.f32.mxu0 %vm1226_vm4, %v1045_v55  ;;  %v4606_v24 = vpop.permute.xlu1 %4605 }
  0xf7   : > { %v4601_v23 = vpop.permute.xlu0 %4600  ;;  %v4607_v2 = vunpack.i.l.bf16 %v4606_v24  ;;  %v4608_v6 = vunpack.i.h.bf16 %v4606_v24 }
  0xf8   : > { %v4603_v63 = vunpack.i.h.bf16 %v4601_v23  ;;  %v4602_v59 = vunpack.i.l.bf16 %v4601_v23 }
  0xf9   : > { %1460 = vmatmul.mubr.f32.gmra.mxu0 %v1173_v62 }
  0xfa   : > { %v1099_v0 = vsel %vm1078_vm5, %v5255_v35, %v4602_v59  ;;  %v1047_v5 = vpop.permute.xlu1 %1046  ;;  %v1100_v11 = vsel %vm1078_vm5, %v5285_v3, %v4603_v63  ;;  %v1217_v63 = vshrl.u32 %v1216_v58, 7 }
  0xfb   : > { %v4611_v27 = vpop.permute.xlu0 %4610  ;;  %3813 = vmatprep.mubr.msk.f32.mxu0 %vm1226_vm4, %v1047_v5  ;;  %v1124_v14 = vsel %vm1103_vm6, %v1099_v0, %v4607_v2  ;;  %v1125_v35 = vsel %vm1103_vm6, %v1100_v11, %v4608_v6  ;;  %v1214_v0 = vld [vmem:[%s7153_s2] sm:$0x3] }
  0xfc   : > { %v4613_v12 = vunpack.i.h.bf16 %v4611_v27  ;;  %v4612_v13 = vunpack.i.l.bf16 %v4611_v27  ;;  %v1218_v62 = vsub.s32 0, %v1217_v63 }
  0xfe   : > { %v4616_v15 = vpop.permute.xlu1 %4615  ;;  %v1149_v16 = vsel %vm1128_vm7, %v1124_v14, %v4612_v13  ;;  %v1150_v20 = vsel %vm1128_vm7, %v1125_v35, %v4613_v12  ;;  %v5528_v27 = vrot.slane %v1214_v0, %v1218_v62 }
  0xff   : > { %v4617_v18 = vunpack.i.l.bf16 %v4616_v15  ;;  %v1049_v19 = vpop.permute.xlu0 %1048  ;;  %v1174_v33 = vsel %vm1153_vm8, %v1149_v16, %v1047_v5  ;;  %v4618_v7 = vunpack.i.h.bf16 %v4616_v15  ;;  %v1222_v5 = vsub.s32 1, %v1217_v63 }
 0x100   : > { %1466 = vmatmul.mubr.f32.gmra.mxu0 %v1174_v33  ;;  %v1175_v30 = vsel %vm1153_vm8, %v1150_v20, %v1049_v19 }
 0x101   : > { %3814 = vmatprep.mubr.msk.f32.mxu0 %vm1226_vm4, %v1049_v19  ;;  %v1101_v3 = vsel %vm1078_vm5, %v5288_v4, %v4617_v18  ;;  %v1102_v4 = vsel %vm1078_vm5, %v5310_v43, %v4618_v7  ;;  %v1539_v43 = vld [vmem:[%s7154_s3 + $0x8] sm:$0xff]  ;;  %v5530_v12 = vrot.slane %v1214_v0, %v1222_v5 }
 0x102   : > { %v922_v17 = vpop.permute.xlu1 %921  ;;  %3817 = vmatprep.mubr.msk.f32.mxu1 %vm1570_vm9, %v1539_v43 }
 0x103   : > { %v793_v21 = vpop.permute.xlu0 %792 }
 0x104   : > { %v1126_v1 = vsel %vm1103_vm6, %v1101_v3, %v793_v21  ;;  %1472 = vmatmul.mubr.f32.gmra.mxu0 %v1175_v30 }
 0x105   : > { %v1151_v29 = vsel %vm1128_vm7, %v1126_v1, %v922_v17 }
 0x106   : > { %v795_v22 = vpop.permute.xlu1 %794 }
 0x107   : > { %v1051_v26 = vpop.permute.xlu0 %1050  ;;  %v1127_v38 = vsel %vm1103_vm6, %v1102_v4, %v795_v22 }
 0x108   : > { %3815 = vmatprep.mubr.msk.f32.mxu0 %vm1226_vm4, %v1051_v26  ;;  %v1176_v36 = vsel %vm1153_vm8, %v1151_v29, %v1051_v26 }
 0x109   : > { %1478 = vmatmul.mubr.f32.gmra.mxu0 %v1176_v36 }
 0x10a   : > { %v1053_v37 = vpop.permute.xlu1 %1052 }
 0x10b   : > { %v924_v39 = vpop.permute.xlu0 %923  ;;  %3816 = vmatprep.mubr.msk.f32.mxu0 %vm1226_vm4, %v1053_v37 }
 0x10c   : > { %v1152_v28 = vsel %vm1128_vm7, %v1127_v38, %v924_v39 }
 0x10d   : > { %v1177_v40 = vsel %vm1153_vm8, %v1152_v28, %v1053_v37 }
 0x10e   : > { %1484 = vmatmul.mubr.f32.gmra.mxu0 %v1177_v40 }
 0x15d   : > { %v5489_v41 = vpop.f32.mrf.mxu0 }
 0x15f   : > { %v5491_v45 = vpop.f32.mrf.mxu0 }
 0x161   : > { %v5493_v60 = vpop.f32.mrf.mxu0 }
 0x163   : > { %v5495_v46 = vpop.f32.mrf.mxu0 }
 0x165   : > { %v5501_v42 = vpop.f32.mrf.mxu0 }
 0x167   : > { %v5503_v48 = vpop.f32.mrf.mxu0 }
 0x169   : > { %v5505_v31 = vpop.f32.mrf.mxu0 }
 0x16b   : > { %v5507_v34 = vpop.f32.mrf.mxu0 }
 0x170   : > { %v5509_v8 = vpop.f32.mrf.mxu0 }
 0x172   : > { %v5511_v49 = vpop.f32.mrf.mxu0 }
 0x174   : > { %v5513_v61 = vpop.f32.mrf.mxu0 }
 0x176   : > { %v5515_v44 = vpop.f32.mrf.mxu0 }
 0x179   : > { %v5517_v47 = vpop.f32.mrf.mxu0 }
 0x17b   : > { %v5519_v10 = vpop.f32.mrf.mxu0 }
 0x17d   : > { %v5521_v9 = vpop.f32.mrf.mxu0 }
 0x17f   : > { %v5523_v51 = vpop.f32.mrf.mxu0 }
 0x184   : > { %v1395_v52 = vpop.f32.mrf.mxu0 }
 0x186   : > { %v1397_v53 = vpop.f32.mrf.mxu0 }
 0x188   : > { %v1401_v54 = vpop.f32.mrf.mxu0 }
 0x18a   : > { %v1403_v55 = vpop.f32.mrf.mxu0 }
 0x18b   : > { %v5595_v40 = vadd.f32 %v1403_v55, %v5530_v12 }
 0x18d   : > { %v1407_v56 = vpop.f32.mrf.mxu0 }
 0x18e   : > { %v5589_v39 = vadd.f32 %v1407_v56, %v5528_v27 }
 0x18f   : > { %v1409_v50 = vpop.f32.mrf.mxu0 }
 0x190   : > { %v5581_v4 = vadd.f32 %v1409_v50, %v5530_v12  ;;  %v7188_v58 = vmax.f32 %v5589_v39, 0.0 }
 0x191   : > { %v1413_v32 = vpop.f32.mrf.mxu0 }
 0x192   : > { %v5575_v29 = vadd.f32 %v1413_v32, %v5528_v27  ;;  %v5603_v32 = vadd.f32 %v1401_v54, %v5528_v27  ;;  %v7190_v55 = vmax.f32 %v5581_v4, 0.0 }
 0x193   : > { %v1415_v25 = vpop.f32.mrf.mxu0 }
 0x194   : > { %v5567_v7 = vadd.f32 %v1415_v25, %v5530_v12  ;;  %v7194_v56 = vmax.f32 %v5575_v29, 0.0  ;;  %v5609_v25 = vadd.f32 %v1397_v53, %v5530_v12  ;;  %v7185_v53 = vmax.f32 %v5595_v40, 0.0 }
 0x196   : > { %v7196_v43 = vmax.f32 %v5567_v7, 0.0 }
 0x198   : > { %v1419_v57 = vpop.f32.mrf.mxu0 }
 0x199   : > { %v5561_v30 = vadd.f32 %v1419_v57, %v5528_v27  ;;  %v5615_v57 = vadd.f32 %v1395_v52, %v5528_v27  ;;  %v5631_v52 = vadd.f32 %v5521_v9, %v5528_v27  ;;  %v5647_v9 = vadd.f32 %v5517_v47, %v5528_v27 }
 0x19a   : > { %v1421_v24 = vpop.f32.mrf.mxu0  ;;  %v5663_v47 = vadd.f32 %v5513_v61, %v5528_v27 }
 0x19b   : > { %v5553_v3 = vadd.f32 %v1421_v24, %v5530_v12  ;;  %v7199_v28 = vmax.f32 %v5561_v30, 0.0  ;;  %v5624_v24 = vadd.f32 %v5523_v51, %v5530_v12  ;;  %v5640_v51 = vadd.f32 %v5519_v10, %v5530_v12 }
 0x19c   : > { %v1425_v23 = vpop.f32.mrf.mxu0  ;;  %v7176_v62 = vmax.f32 %v5615_v57, 0.0  ;;  %v7178_v5 = vmax.f32 %v5631_v52, 0.0  ;;  %v7181_v61 = vmax.f32 %v5647_v9, 0.0 }
 0x19d   : > { %v5549_v35 = vadd.f32 %v1425_v23, %v5528_v27  ;;  %v7201_v37 = vmax.f32 %v5553_v3, 0.0  ;;  %v7182_v23 = vmax.f32 %v5603_v32, 0.0  ;;  %v7177_v10 = vmax.f32 %v5624_v24, 0.0 }
 0x19e   : > { %v1427_v59 = vpop.f32.mrf.mxu0 }
 0x19f   : > { %v5545_v19 = vadd.f32 %v1427_v59, %v5530_v12  ;;  %v1516_v36 = vmax.f32 %v5549_v35, 0.0  ;;  %v7179_v59 = vmax.f32 %v5609_v25, 0.0  ;;  %v7227_v35 = vmax.f32 %v5567_v7, 0.0  ;;  %v2065_v7 = vld [vmem:[%s7155_s4 + $0x58] sm:$0xff] }
 0x1a1   : > { %v1431_v2 = vpop.f32.mrf.mxu0  ;;  %v1517_v22 = vmax.f32 %v5545_v19, 0.0  ;;  %v7226_v19 = vmax.f32 %v5561_v30, 0.0  ;;  %v1547_v30 = vld [vmem:[%s7154_s3 + $0x48] sm:$0xff] }
 0x1a2   : > { %v5542_v18 = vadd.f32 %v1431_v2, %v5528_v27  ;;  %v5654_v2 = vadd.f32 %v5515_v44, %v5530_v12  ;;  %v5670_v44 = vadd.f32 %v5511_v49, %v5530_v12 }
 0x1a3   : > { %v1433_v6 = vpop.f32.mrf.mxu0 }
 0x1a4   : > { %v5536_v15 = vadd.f32 %v1433_v6, %v5530_v12  ;;  %v1518_v1 = vmax.f32 %v5542_v18, 0.0  ;;  %v7180_v6 = vmax.f32 %v5640_v51, 0.0  ;;  %v7183_v49 = vmax.f32 %v5654_v2, 0.0  ;;  %v1545_v18 = vld [vmem:[%s7154_s3 + $0x38] sm:$0xff] }
 0x1a5   : > { %v1437_v11 = vpop.f32.mrf.mxu0 }
 0x1a6   : > { %v5533_v13 = vadd.f32 %v1437_v11, %v5528_v27  ;;  %v1519_v17 = vmax.f32 %v5536_v15, 0.0  ;;  %v5677_v11 = vadd.f32 %v5509_v8, %v5528_v27  ;;  %v7184_v8 = vmax.f32 %v5663_v47, 0.0  ;;  %v1542_v15 = vld [vmem:[%s7154_s3 + $0x20] sm:$0xff] }
 0x1a7   : > { %v1439_v14 = vpop.f32.mrf.mxu0 }
 0x1a8   : > { %v5539_v16 = vadd.f32 %v1439_v14, %v5530_v12  ;;  %v1520_v20 = vmax.f32 %v5533_v13, 0.0  ;;  %v5684_v14 = vadd.f32 %v5507_v34, %v5530_v12  ;;  %v7186_v34 = vmax.f32 %v5670_v44, 0.0  ;;  %v2067_v13 = vld [vmem:[%s7155_s4 + $0x68] sm:$0xff] }
 0x1aa   : > { %v1521_v33 = vmax.f32 %v5539_v16, 0.0  ;;  %v7225_v16 = vmax.f32 %v5553_v3, 0.0  ;;  %v1544_v3 = vld [vmem:[%s7154_s3 + $0x30] sm:$0xff] }
 0x1ac   : > { %v5556_v21 = vpop.f32.mrf.mxu0  ;;  %1619 = vmatprep.subr.mxu1 %v1521_v33 }
 0x1ad   : > { %1620 = vmatpush1.msra.mxu1 %v1520_v20 }
 0x1ae   : > { %v5570_v26 = vpop.f32.mrf.mxu0  ;;  %1621 = vmatprep.subr.mxu1 %v1519_v17 }
 0x1af   : > { %1622 = vmatpush1.msra.mxu1 %v1518_v1 }
 0x1b0   : > { %v5584_v38 = vpop.f32.mrf.mxu0  ;;  %1623 = vmatprep.subr.mxu1 %v1517_v22 }
 0x1b1   : > { %1624 = vmatpush1.msra.mxu1 %v1516_v36 }
 0x1b2   : > { %v5598_v50 = vpop.f32.mrf.mxu0  ;;  %1625 = vmatprep.subr.mxu1 %v7201_v37 }
 0x1b3   : > { %1626 = vmatpush1.msra.mxu1 %v7199_v28 }
 0x1b4   : > { %1627 = vmatprep.subr.mxu1 %v7196_v43 }
 0x1b5   : > { %v5618_v54 = vpop.f32.mrf.mxu0  ;;  %1628 = vmatpush1.msra.mxu1 %v7194_v56 }
 0x1b6   : > { %1629 = vmatprep.subr.mxu1 %v7190_v55 }
 0x1b7   : > { %v5634_v63 = vpop.f32.mrf.mxu0  ;;  %1630 = vmatpush1.msra.mxu1 %v7188_v58 }
 0x1b8   : > { %1631 = vmatprep.subr.mxu1 %v7185_v53 }
 0x1b9   : > { %1632 = vmatpush1.msra.mxu1 %v7182_v23  ;;  %v5657_v0 = vpop.f32.mrf.mxu0 }
 0x1ba   : > { %1633 = vmatprep.subr.mxu1 %v7179_v59 }
 0x1bb   : > { %1634 = vmatpush1.msra.mxu1 %v7176_v62  ;;  %v1463_v62 = vpop.f32.mrf.mxu0 }
 0x1bc   : > { %1635 = vmatprep.subr.mxu1 %v7177_v10  ;;  %v5691_v10 = vadd.f32 %v5505_v31, %v5528_v27  ;;  %v7187_v31 = vmax.f32 %v5677_v11, 0.0 }
 0x1bd   : > { %1636 = vmatpush1.msra.mxu1 %v7178_v5  ;;  %v5698_v5 = vadd.f32 %v5503_v48, %v5530_v12  ;;  %v7189_v48 = vmax.f32 %v5684_v14, 0.0 }
 0x1be   : > { %1637 = vmatprep.subr.mxu1 %v7180_v6  ;;  %v5705_v6 = vadd.f32 %v5501_v42, %v5528_v27  ;;  %v7192_v42 = vmax.f32 %v5691_v10, 0.0 }
 0x1bf   : > { %1638 = vmatpush1.msra.mxu1 %v7181_v61  ;;  %v5712_v61 = vadd.f32 %v5495_v46, %v5530_v12  ;;  %v7191_v46 = vmax.f32 %v5698_v5, 0.0 }
 0x1c0   : > { %v1467_v59 = vpop.f32.mrf.mxu0  ;;  %1639 = vmatprep.subr.mxu1 %v7183_v49  ;;  %v5719_v49 = vadd.f32 %v5493_v60, %v5528_v27  ;;  %v7193_v60 = vmax.f32 %v5705_v6, 0.0 }
 0x1c1   : > { %1640 = vmatpush1.msra.mxu1 %v7184_v8  ;;  %v5726_v8 = vadd.f32 %v5491_v45, %v5530_v12 }
 0x1c2   : > { %v1469_v23 = vpop.f32.mrf.mxu0  ;;  %1641 = vmatprep.subr.mxu1 %v7186_v34  ;;  %v5733_v34 = vadd.f32 %v5489_v41, %v5528_v27  ;;  %v7197_v45 = vmax.f32 %v5719_v49, 0.0 }
 0x1c3   : > { %1642 = vmatpush1.msra.mxu1 %v7187_v31  ;;  %v7195_v31 = vmax.f32 %v5712_v61, 0.0  ;;  %v5775_v37 = vadd.f32 %v1469_v23, %v5530_v12  ;;  %v5794_v23 = vadd.f32 %v5657_v0, %v5528_v27 }
 0x1c4   : > { %v1473_v53 = vpop.f32.mrf.mxu0  ;;  %1643 = vmatprep.subr.mxu1 %v7189_v48  ;;  %v7198_v48 = vmax.f32 %v5726_v8, 0.0  ;;  %v7200_v41 = vmax.f32 %v5733_v34, 0.0 }
 0x1c5   : > { %1644 = vmatpush1.msra.mxu1 %v7192_v42 }
 0x1c6   : > { %v1475_v58 = vpop.f32.mrf.mxu0  ;;  %1645 = vmatprep.subr.mxu1 %v7191_v46 }
 0x1c7   : > { %1646 = vmatpush1.msra.mxu1 %v7193_v60 }
 0x1c8   : > { %1647 = vmatprep.subr.mxu1 %v7195_v31 }
 0x1c9   : > { %v1479_v55 = vpop.f32.mrf.mxu0  ;;  %1648 = vmatpush1.msra.mxu1 %v7197_v45 }
 0x1ca   : > { %1649 = vmatprep.subr.mxu1 %v7198_v48  ;;  %v5764_v45 = vadd.f32 %v1479_v55, %v5528_v27  ;;  %v5767_v48 = vadd.f32 %v1475_v58, %v5530_v12  ;;  %v5787_v58 = vadd.f32 %v1463_v62, %v5530_v12  ;;  %v7207_v62 = vmax.f32 %v5775_v37, 0.0 }
 0x1cb   : > { %v1481_v46 = vpop.f32.mrf.mxu0  ;;  %1650 = vmatpush1.msra.mxu1 %v7200_v41  ;;  %v5771_v41 = vadd.f32 %v1473_v53, %v5528_v27 }
 0x1cc   : > { %v5758_v31 = vadd.f32 %v1481_v46, %v5530_v12  ;;  %v7204_v55 = vmax.f32 %v5764_v45, 0.0  ;;  %v7205_v53 = vmax.f32 %v5767_v48, 0.0 }
 0x1ce   : > { %v1485_v42 = vpop.f32.mrf.mxu0  ;;  %v7203_v46 = vmax.f32 %v5758_v31, 0.0 }
 0x1cf   : > { %v5755_v60 = vadd.f32 %v1485_v42, %v5528_v27 }
 0x1d0   : > { %v1487_v56 = vpop.f32.mrf.mxu0 }
 0x1d1   : > { %v5761_v43 = vadd.f32 %v1487_v56, %v5530_v12  ;;  %v7202_v42 = vmax.f32 %v5755_v60, 0.0  ;;  %v5781_v56 = vadd.f32 %v1467_v59, %v5528_v27  ;;  %v7206_v59 = vmax.f32 %v5771_v41, 0.0 }
 0x1d3   : > { %v1537_v28 = vmax.f32 %v5761_v43, 0.0  ;;  %v7208_v0 = vmax.f32 %v5781_v56, 0.0  ;;  %v7255_v43 = vmax.f32 %v5771_v41, 0.0 }
 0x1d5   : > { %1667 = vmatprep.subr.mxu1 %v1537_v28 }
 0x1d6   : > { %1668 = vmatpush2.msra.mxu1 %v7202_v42  ;;  %v5801_v42 = vadd.f32 %v5634_v63, %v5530_v12  ;;  %v1529_v63 = vmax.f32 %v5787_v58, 0.0 }
 0x1d7   : > { %1669 = vmatprep.subr.mxu1 %v7203_v46  ;;  %v5808_v46 = vadd.f32 %v5618_v54, %v5528_v27  ;;  %v7210_v54 = vmax.f32 %v5794_v23, 0.0 }
 0x1d8   : > { %1670 = vmatpush2.msra.mxu1 %v7204_v55  ;;  %v5815_v55 = vadd.f32 %v5598_v50, %v5530_v12  ;;  %v7209_v50 = vmax.f32 %v5801_v42, 0.0  ;;  %v7259_v41 = vmax.f32 %v5801_v42, 0.0  ;;  %v1562_v42 = vld [vmem:[%s7154_s3 + $0xc0] sm:$0xff] }
 0x1d9   : > { %1671 = vmatprep.subr.mxu1 %v7205_v53  ;;  %v5822_v53 = vadd.f32 %v5584_v38, %v5528_v27  ;;  %v1526_v38 = vmax.f32 %v5808_v46, 0.0  ;;  %v1565_v46 = vld [vmem:[%s7154_s3 + $0xd8] sm:$0xff] }
 0x1da   : > { %1672 = vmatpush2.msra.mxu1 %v7206_v59  ;;  %v5829_v59 = vadd.f32 %v5570_v26, %v5530_v12  ;;  %v7260_v58 = vmax.f32 %v5815_v55, 0.0 }
 0x1db   : > { %1673 = vmatprep.subr.mxu1 %v7207_v62  ;;  %v5836_v62 = vadd.f32 %v5556_v21, %v5528_v27  ;;  %v7212_v12 = vmax.f32 %v5822_v53, 0.0  ;;  %v2069_v27 = vld [vmem:[%s7155_s4 + $0x78] sm:$0xff] }
 0x1dc   : > { %1674 = vmatpush2.msra.mxu1 %v7208_v0  ;;  %v7211_v0 = vmax.f32 %v5815_v55, 0.0  ;;  %v1523_v26 = vmax.f32 %v5829_v59, 0.0  ;;  %v1564_v55 = vld [vmem:[%s7154_s3 + $0xd0] sm:$0xff]  ;;  %v1566_v59 = vld [vmem:[%s7154_s3 + $0xe0] sm:$0xff] }
 0x1dd   : > { %1675 = vmatprep.subr.mxu1 %v1529_v63  ;;  %v7213_v21 = vmax.f32 %v5836_v62, 0.0 }
 0x1de   : > { %1676 = vmatpush2.msra.mxu1 %v7210_v54  ;;  %v4725_v54 = vmov 0.0  }
 0x1df   : > { %1677 = vmatprep.subr.mxu1 %v7209_v50  ;;  %v1538_v50 = vld [vmem:[%s7154_s3] sm:$0xff]  ;;  %2121 = vmatprep.subr.mxu0 %v4725_v54 }
 0x1e0   : > { %1678 = vmatpush2.msra.mxu1 %v1526_v38  ;;  %2122 = vmatpush1.msra.mxu0 %v2069_v27  ;;  %v1540_v27 = vld [vmem:[%s7154_s3 + $0x10] sm:$0xff] }
 0x1e1   : > { %1679 = vmatprep.subr.mxu1 %v7211_v0  ;;  %v1541_v0 = vld [vmem:[%s7154_s3 + $0x18] sm:$0xff]  ;;  %2123 = vmatprep.subr.mxu0 %v4725_v54 }
 0x1e2   : > { %1680 = vmatpush2.msra.mxu1 %v7212_v12  ;;  %v2068_v12 = vld [vmem:[%s7155_s4 + $0x70] sm:$0xff] }
 0x1e3   : > { %1681 = vmatprep.subr.mxu1 %v1523_v26  ;;  %2124 = vmatpush1.msra.mxu0 %v2068_v12  ;;  %v7238_v12 = vmax.f32 %v5647_v9, 0.0  ;;  %v1553_v9 = vld [vmem:[%s7154_s3 + $0x78] sm:$0xff] }
 0x1e4   : > { %1682 = vmatpush2.msra.mxu1 %v7213_v21  ;;  %v1543_v21 = vld [vmem:[%s7154_s3 + $0x28] sm:$0xff]  ;;  %2125 = vmatprep.subr.mxu0 %v4725_v54 }
 0x1e5   : > { %1684 = vmatmul.mubr.f32.vlgmr.msra.gmra.mxu1 %v1538_v50  ;;  %1861 = vmatprep.subr.mxu1 %v1521_v33  ;;  %v2066_v33 = vld [vmem:[%s7155_s4 + $0x60] sm:$0xff]  ;;  %v7237_v50 = vmax.f32 %v5640_v51, 0.0 }
 0x1e6   : > { %1862 = vmatpush1.msra.mxu1 %v1520_v20  ;;  %3818 = vmatprep.mubr.msk.f32.mxu1 %vm1570_vm9, %v1541_v0  ;;  %v7228_v20 = vmax.f32 %v5575_v29, 0.0  ;;  %v7232_v29 = vmax.f32 %v5603_v32, 0.0  ;;  %v7235_v32 = vmax.f32 %v5624_v24, 0.0  ;;  %v7236_v0 = vmax.f32 %v5631_v52, 0.0  ;;  %v1550_v51 = vld [vmem:[%s7154_s3 + $0x60] sm:$0xff] }
 0x1e7   : > { %1863 = vmatprep.subr.mxu1 %v1519_v17  ;;  %2126 = vmatpush1.msra.mxu0 %v2067_v13  ;;  %v7229_v17 = vmax.f32 %v5581_v4, 0.0  ;;  %v7233_v4 = vmax.f32 %v5609_v25, 0.0  ;;  %v1548_v25 = vld [vmem:[%s7154_s3 + $0x50] sm:$0xff]  ;;  %v7239_v24 = vmax.f32 %v5654_v2, 0.0  ;;  %v7240_v52 = vmax.f32 %v5663_v47, 0.0 }
 0x1e8   : > { %1864 = vmatpush1.msra.mxu1 %v1518_v1  ;;  %2127 = vmatprep.subr.mxu0 %v4725_v54  ;;  %v7230_v1 = vmax.f32 %v5589_v39, 0.0  ;;  %v1549_v39 = vld [vmem:[%s7154_s3 + $0x58] sm:$0xff]  ;;  %v7243_v2 = vmax.f32 %v5684_v14, 0.0  ;;  %v7244_v47 = vmax.f32 %v5691_v10, 0.0  ;;  %v7245_v13 = vmax.f32 %v5698_v5, 0.0  ;;  %v1554_v5 = vld [vmem:[%s7154_s3 + $0x80] sm:$0xff] }
 0x1e9   : > { %1690 = vmatmul.mubr.f32.gmra.mxu1 %v1540_v27  ;;  %1865 = vmatprep.subr.mxu1 %v1517_v22  ;;  %v7231_v22 = vmax.f32 %v5595_v40, 0.0  ;;  %v7234_v40 = vmax.f32 %v5615_v57, 0.0  ;;  %v1551_v57 = vld [vmem:[%s7154_s3 + $0x68] sm:$0xff]  ;;  %v7242_v27 = vmax.f32 %v5677_v11, 0.0  ;;  %v7247_v10 = vmax.f32 %v5712_v61, 0.0 }
 0x1ea   : > { %1866 = vmatpush1.msra.mxu1 %v1516_v36  ;;  %3819 = vmatprep.mubr.msk.f32.mxu1 %vm1570_vm9, %v1543_v21  ;;  %v1546_v36 = vld [vmem:[%s7154_s3 + $0x40] sm:$0xff]  ;;  %v7241_v21 = vmax.f32 %v5670_v44, 0.0  ;;  %v1552_v44 = vld [vmem:[%s7154_s3 + $0x70] sm:$0xff]  ;;  %v1555_v11 = vld [vmem:[%s7154_s3 + $0x88] sm:$0xff]  ;;  %v7248_v14 = vmax.f32 %v5719_v49, 0.0  ;;  %v7251_v61 = vmax.f32 %v5755_v60, 0.0 }
 0x1eb   : > { %1867 = vmatprep.subr.mxu1 %v7225_v16  ;;  %2128 = vmatpush1.msra.mxu0 %v2066_v33  ;;  %v7249_v16 = vmax.f32 %v5726_v8, 0.0  ;;  %v1556_v49 = vld [vmem:[%s7154_s3 + $0x90] sm:$0xff]  ;;  %v7252_v8 = vmax.f32 %v5758_v31, 0.0  ;;  %v1558_v31 = vld [vmem:[%s7154_s3 + $0xa0] sm:$0xff]  ;;  %v7256_v60 = vmax.f32 %v5775_v37, 0.0  ;;  %v7257_v33 = vmax.f32 %v5781_v56, 0.0 }
 0x1ec   : > { %1868 = vmatpush1.msra.mxu1 %v7226_v19  ;;  %2129 = vmatprep.subr.mxu0 %v4725_v54  ;;  %v7253_v19 = vmax.f32 %v5764_v45, 0.0  ;;  %v1561_v45 = vld [vmem:[%s7154_s3 + $0xb8] sm:$0xff]  ;;  %v1560_v37 = vld [vmem:[%s7154_s3 + $0xb0] sm:$0xff]  ;;  %v1563_v56 = vld [vmem:[%s7154_s3 + $0xc8] sm:$0xff] }
 0x1ed   : > { %1696 = vmatmul.mubr.f32.gmra.mxu1 %v1542_v15  ;;  %1869 = vmatprep.subr.mxu1 %v7227_v35  ;;  %v7246_v15 = vmax.f32 %v5705_v6, 0.0  ;;  %v1557_v6 = vld [vmem:[%s7154_s3 + $0x98] sm:$0xff]  ;;  %v3833_v35 = vld [vmem:[%s7154_s3 + $0x100] sm:$0xff] }
 0x1ee   : > { %1870 = vmatpush1.msra.mxu1 %v7228_v20  ;;  %3820 = vmatprep.mubr.msk.f32.mxu1 %vm1570_vm9, %v1545_v18  ;;  %v7250_v18 = vmax.f32 %v5733_v34, 0.0  ;;  %v1559_v34 = vld [vmem:[%s7154_s3 + $0xa8] sm:$0xff]  ;;  %v3836_v20 = vld [vmem:[%s7154_s3 + $0x118] sm:$0xff] }
 0x1ef   : > { %1871 = vmatprep.subr.mxu1 %v7229_v17  ;;  %2130 = vmatpush1.msra.mxu0 %v2065_v7  ;;  %v3838_v17 = vld [vmem:[%s7154_s3 + $0x128] sm:$0xff]  ;;  %v3840_v7 = vld [vmem:[%s7154_s3 + $0x138] sm:$0xff] }
 0x1f0   : > { %1872 = vmatpush1.msra.mxu1 %v7230_v1  ;;  %2131 = vmatprep.subr.mxu0 %v4725_v54  ;;  %v3837_v1 = vld [vmem:[%s7154_s3 + $0x120] sm:$0xff] }
 0x1f1   : > { %1702 = vmatmul.mubr.f32.gmra.mxu1 %v1544_v3  ;;  %1873 = vmatprep.subr.mxu1 %v7231_v22  ;;  %v3835_v3 = vld [vmem:[%s7154_s3 + $0x110] sm:$0xff]  ;;  %v2063_v22 = vld [vmem:[%s7155_s4 + $0x48] sm:$0xff] }
 0x1f2   : > { %1874 = vmatpush1.msra.mxu1 %v7232_v29  ;;  %3821 = vmatprep.mubr.msk.f32.mxu1 %vm1570_vm9, %v1547_v30  ;;  %v2064_v30 = vld [vmem:[%s7155_s4 + $0x50] sm:$0xff]  ;;  %v3912_v29 = vld [vmem:[%s7155_s4 + $0x108] sm:$0xff] }
 0x1f3   : > { %1875 = vmatprep.subr.mxu1 %v7233_v4  ;;  %2132 = vmatpush1.msra.mxu0 %v2064_v30  ;;  %v3842_v4 = vld [vmem:[%s7154_s3 + $0x148] sm:$0xff] }
 0x1f4   : > { %1876 = vmatpush1.msra.mxu1 %v7234_v40  ;;  %2133 = vmatprep.subr.mxu0 %v4725_v54  ;;  %v2062_v40 = vld [vmem:[%s7155_s4 + $0x40] sm:$0xff] }
 0x1f5   : > { %1708 = vmatmul.mubr.f32.gmra.mxu1 %v1546_v36  ;;  %1877 = vmatprep.subr.mxu1 %v7235_v32  ;;  %v3839_v36 = vld [vmem:[%s7154_s3 + $0x130] sm:$0xff]  ;;  %v3841_v32 = vld [vmem:[%s7154_s3 + $0x140] sm:$0xff] }
 0x1f6   : > { %1878 = vmatpush1.msra.mxu1 %v7236_v0  ;;  %3822 = vmatprep.mubr.msk.f32.mxu1 %vm1570_vm9, %v1549_v39  ;;  %v3911_v39 = vld [vmem:[%s7155_s4 + $0x100] sm:$0xff]  ;;  %v3844_v0 = vld [vmem:[%s7154_s3 + $0x158] sm:$0xff] }
 0x1f7   : > { %1879 = vmatprep.subr.mxu1 %v7237_v50  ;;  %2134 = vmatpush1.msra.mxu0 %v2063_v22  ;;  %v3843_v50 = vld [vmem:[%s7154_s3 + $0x150] sm:$0xff] }
 0x1f8   : > { %1880 = vmatpush1.msra.mxu1 %v7238_v12  ;;  %2135 = vmatprep.subr.mxu0 %v4725_v54  ;;  %v2061_v12 = vld [vmem:[%s7155_s4 + $0x38] sm:$0xff] }
 0x1f9   : > { %1714 = vmatmul.mubr.f32.gmra.mxu1 %v1548_v25  ;;  %1881 = vmatprep.subr.mxu1 %v7239_v24  ;;  %v3910_v25 = vld [vmem:[%s7155_s4 + $0xf8] sm:$0xff]  ;;  %v3909_v24 = vld [vmem:[%s7155_s4 + $0xf0] sm:$0xff] }
 0x1fa   : > { %1882 = vmatpush1.msra.mxu1 %v7240_v52  ;;  %3823 = vmatprep.mubr.msk.f32.mxu1 %vm1570_vm9, %v1551_v57  ;;  %v3846_v57 = vld [vmem:[%s7154_s3 + $0x168] sm:$0xff]  ;;  %v3845_v52 = vld [vmem:[%s7154_s3 + $0x160] sm:$0xff] }
 0x1fb   : > { %1883 = vmatprep.subr.mxu1 %v7241_v21  ;;  %2136 = vmatpush1.msra.mxu0 %v2062_v40  ;;  %v3908_v21 = vld [vmem:[%s7155_s4 + $0xe8] sm:$0xff] }
 0x1fc   : > { %1884 = vmatpush1.msra.mxu1 %v7242_v27  ;;  %2137 = vmatprep.subr.mxu0 %v4725_v54  ;;  %v3907_v27 = vld [vmem:[%s7155_s4 + $0xe0] sm:$0xff] }
 0x1fd   : > { %1720 = vmatmul.mubr.f32.gmra.mxu1 %v1550_v51  ;;  %1885 = vmatprep.subr.mxu1 %v7243_v2  ;;  %v3848_v51 = vld [vmem:[%s7154_s3 + $0x178] sm:$0xff]  ;;  %v3847_v2 = vld [vmem:[%s7154_s3 + $0x170] sm:$0xff] }
 0x1fe   : > { %1886 = vmatpush1.msra.mxu1 %v7244_v47  ;;  %3824 = vmatprep.mubr.msk.f32.mxu1 %vm1570_vm9, %v1553_v9  ;;  %v2060_v9 = vld [vmem:[%s7155_s4 + $0x30] sm:$0xff]  ;;  %v3850_v47 = vld [vmem:[%s7154_s3 + $0x188] sm:$0xff] }
 0x1ff   : > { %1887 = vmatprep.subr.mxu1 %v7245_v13  ;;  %2138 = vmatpush1.msra.mxu0 %v2061_v12  ;;  %v3906_v13 = vld [vmem:[%s7155_s4 + $0xd8] sm:$0xff] }
 0x200   : > { %1888 = vmatpush1.msra.mxu1 %v7246_v15  ;;  %2139 = vmatprep.subr.mxu0 %v4725_v54  ;;  %v3852_v15 = vld [vmem:[%s7154_s3 + $0x198] sm:$0xff] }
 0x201   : > { %1726 = vmatmul.mubr.f32.gmra.mxu1 %v1552_v44  ;;  %1889 = vmatprep.subr.mxu1 %v7247_v10  ;;  %v2059_v44 = vld [vmem:[%s7155_s4 + $0x28] sm:$0xff]  ;;  %v3905_v10 = vld [vmem:[%s7155_s4 + $0xd0] sm:$0xff] }
 0x202   : > { %1890 = vmatpush1.msra.mxu1 %v7248_v14  ;;  %3825 = vmatprep.mubr.msk.f32.mxu1 %vm1570_vm9, %v1555_v11  ;;  %v3849_v11 = vld [vmem:[%s7154_s3 + $0x180] sm:$0xff]  ;;  %v3851_v14 = vld [vmem:[%s7154_s3 + $0x190] sm:$0xff] }
 0x203   : > { %1891 = vmatprep.subr.mxu1 %v7249_v16  ;;  %2140 = vmatpush1.msra.mxu0 %v2060_v9  ;;  %v2058_v16 = vld [vmem:[%s7155_s4 + $0x20] sm:$0xff] }
 0x204   : > { %1892 = vmatpush1.msra.mxu1 %v7250_v18  ;;  %2141 = vmatprep.subr.mxu0 %v4725_v54  ;;  %v3853_v18 = vld [vmem:[%s7154_s3 + $0x1a0] sm:$0xff] }
 0x205   : > { %1732 = vmatmul.mubr.f32.gmra.mxu1 %v1554_v5  ;;  %1909 = vmatprep.subr.mxu1 %v1537_v28  ;;  %v7254_v28 = vmax.f32 %v5767_v48, 0.0  ;;  %v7258_v48 = vmax.f32 %v5794_v23, 0.0  ;;  %v7261_v23 = vmax.f32 %v5822_v53, 0.0  ;;  %v1567_v53 = vld [vmem:[%s7154_s3 + $0xe8] sm:$0xff] }
 0x206   : > { %1910 = vmatpush2.msra.mxu1 %v7251_v61  ;;  %3826 = vmatprep.mubr.msk.f32.mxu1 %vm1570_vm9, %v1557_v6  ;;  %v3854_v5 = vld [vmem:[%s7154_s3 + $0x1a8] sm:$0xff]  ;;  %v3856_v61 = vld [vmem:[%s7154_s3 + $0x1b8] sm:$0xff] }
 0x207   : > { %1911 = vmatprep.subr.mxu1 %v7252_v8  ;;  %2142 = vmatpush1.msra.mxu0 %v2059_v44  ;;  %v3904_v6 = vld [vmem:[%s7155_s4 + $0xc8] sm:$0xff]  ;;  %v3903_v8 = vld [vmem:[%s7155_s4 + $0xc0] sm:$0xff] }
 0x208   : > { %1912 = vmatpush2.msra.mxu1 %v7253_v19  ;;  %2143 = vmatprep.subr.mxu0 %v4725_v54  ;;  %v3858_v19 = vld [vmem:[%s7154_s3 + $0x1c8] sm:$0xff] }
 0x209   : > { %1738 = vmatmul.mubr.f32.gmra.mxu1 %v1556_v49  ;;  %1913 = vmatprep.subr.mxu1 %v7254_v28  ;;  %v2057_v49 = vld [vmem:[%s7155_s4 + $0x18] sm:$0xff] }
 0x20a   : > { %1914 = vmatpush2.msra.mxu1 %v7255_v43  ;;  %3827 = vmatprep.mubr.msk.f32.mxu1 %vm1570_vm9, %v1559_v34  ;;  %v3855_v34 = vld [vmem:[%s7154_s3 + $0x1b0] sm:$0xff]  ;;  %v3902_v28 = vld [vmem:[%s7155_s4 + $0xb8] sm:$0xff] }
 0x20b   : > { %1915 = vmatprep.subr.mxu1 %v7256_v60  ;;  %2144 = vmatpush1.msra.mxu0 %v2058_v16  ;;  %v2056_v43 = vld [vmem:[%s7155_s4 + $0x10] sm:$0xff]  ;;  %v3860_v60 = vld [vmem:[%s7154_s3 + $0x1d8] sm:$0xff] }
 0x20c   : > { %1916 = vmatpush2.msra.mxu1 %v7257_v33  ;;  %2145 = vmatprep.subr.mxu0 %v4725_v54  ;;  %v3859_v33 = vld [vmem:[%s7154_s3 + $0x1d0] sm:$0xff] }
 0x20d   : > { %1744 = vmatmul.mubr.f32.gmra.mxu1 %v1558_v31  ;;  %1917 = vmatprep.subr.mxu1 %v1529_v63  ;;  %v7262_v63 = vmax.f32 %v5836_v62, 0.0  ;;  %v1569_v62 = vld [vmem:[%s7154_s3 + $0xf8] sm:$0xff]  ;;  %v3857_v31 = vld [vmem:[%s7154_s3 + $0x1c0] sm:$0xff] }
 0x20e   : > { %1918 = vmatpush2.msra.mxu1 %v7258_v48  ;;  %3828 = vmatprep.mubr.msk.f32.mxu1 %vm1570_vm9, %v1561_v45  ;;  %v3901_v45 = vld [vmem:[%s7155_s4 + $0xb0] sm:$0xff]  ;;  %v3862_v48 = vld [vmem:[%s7154_s3 + $0x1e8] sm:$0xff] }
 0x20f   : > { %1919 = vmatprep.subr.mxu1 %v7259_v41  ;;  %2146 = vmatpush1.msra.mxu0 %v2057_v49  ;;  %v3900_v41 = vld [vmem:[%s7155_s4 + $0xa8] sm:$0xff] }
 0x210   : > { %1920 = vmatpush2.msra.mxu1 %v1526_v38  ;;  %v1568_v38 = vld [vmem:[%s7154_s3 + $0xf0] sm:$0xff]  ;;  %2147 = vmatprep.subr.mxu0 %v4725_v54 }
 0x211   : > { %1750 = vmatmul.mubr.f32.gmra.mxu1 %v1560_v37  ;;  %1921 = vmatprep.subr.mxu1 %v7260_v58  ;;  %v2055_v37 = vld [vmem:[%s7155_s4 + $0x8] sm:$0xff]  ;;  %v3864_v58 = vld [vmem:[%s7154_s3 + $0x1f8] sm:$0xff] }
 0x212   : > { %1922 = vmatpush2.msra.mxu1 %v7261_v23  ;;  %3829 = vmatprep.mubr.msk.f32.mxu1 %vm1570_vm9, %v1563_v56  ;;  %v3861_v56 = vld [vmem:[%s7154_s3 + $0x1e0] sm:$0xff] }
 0x213   : > { %1923 = vmatprep.subr.mxu1 %v1523_v26  ;;  %v3834_v26 = vld [vmem:[%s7154_s3 + $0x108] sm:$0xff]  ;;  %2148 = vmatpush1.msra.mxu0 %v2056_v43  ;;  %v3899_v23 = vld [vmem:[%s7155_s4 + $0xa0] sm:$0xff] }
 0x214   : > { %1924 = vmatpush2.msra.mxu1 %v7262_v63  ;;  %2149 = vmatprep.subr.mxu0 %v4725_v54  ;;  %v3863_v63 = vld [vmem:[%s7154_s3 + $0x1f0] sm:$0xff] }
 0x215   : > { %1756 = vmatmul.mubr.f32.gmra.mxu1 %v1562_v42  ;;  %2285 = vmatprep.subr.mxu1 %v4725_v54  ;;  %v2054_v42 = vld [vmem:[%s7155_s4] sm:$0xff] }
 0x216   : > { %3830 = vmatprep.mubr.msk.f32.mxu1 %vm1570_vm9, %v1565_v46  ;;  %2150 = vmatpush1.msra.mxu0 %v2055_v37  ;;  %v3898_v46 = vld [vmem:[%s7155_s4 + $0x98] sm:$0xff] }
 0x217   : > { %2151 = vmatprep.subr.mxu0 %v4725_v54 }
 0x218   : > { %2152 = vmatpush1.msra.mxu0 %v2054_v42 }
 0x219   : > { %1762 = vmatmul.mubr.f32.gmra.mxu1 %v1564_v55  ;;  %2181 = vmatprep.subr.mxu0 %v4725_v54  ;;  %v2071_v55 = vld [vmem:[%s7155_s4 + $0x88] sm:$0xff] }
 0x21a   : > { %3831 = vmatprep.mubr.msk.f32.mxu1 %vm1570_vm9, %v1567_v53  ;;  %v3897_v53 = vld [vmem:[%s7155_s4 + $0x90] sm:$0xff]  ;;  %2182 = vmatpush2.msra.mxu0 %v2071_v55 }
 0x21b   : > { %2183 = vmatprep.subr.mxu0 %v4725_v54 }
 0x21d   : > { %1768 = vmatmul.mubr.f32.gmra.mxu1 %v1566_v59  ;;  %v3914_v59 = vld [vmem:[%s7155_s4 + $0x118] sm:$0xff] }
 0x21e   : > { %3832 = vmatprep.mubr.msk.f32.mxu1 %vm1570_vm9, %v1569_v62  ;;  %v2070_v62 = vld [vmem:[%s7155_s4 + $0x80] sm:$0xff] }
 0x21f   : > { %2184 = vmatpush2.msra.mxu0 %v2070_v62 }
 0x221   : > { %1774 = vmatmul.mubr.f32.gmra.mxu1 %v1568_v38  ;;  %v3913_v38 = vld [vmem:[%s7155_s4 + $0x110] sm:$0xff] }
 0x222   : > { %3865 = vmatprep.mubr.msk.f32.mxu1 %vm1570_vm9, %v3834_v26 }
 0x225   : > { %1926 = vmatmul.mubr.f32.vlgmr.msra.gmra.mxu1 %v3833_v35 }
 0x226   : > { %3866 = vmatprep.mubr.msk.f32.mxu1 %vm1570_vm9, %v3836_v20  ;;  %2286 = vmatpush1.msra.mxu1 %v3912_v29 }
 0x227   : > { %2287 = vmatprep.subr.mxu1 %v4725_v54 }
 0x228   : > { %2288 = vmatpush1.msra.mxu1 %v3911_v39 }
 0x229   : > { %1932 = vmatmul.mubr.f32.gmra.mxu1 %v3835_v3  ;;  %2289 = vmatprep.subr.mxu1 %v4725_v54 }
 0x22a   : > { %3867 = vmatprep.mubr.msk.f32.mxu1 %vm1570_vm9, %v3838_v17  ;;  %2290 = vmatpush1.msra.mxu1 %v3910_v25 }
 0x22b   : > { %2291 = vmatprep.subr.mxu1 %v4725_v54 }
 0x22c   : > { %2292 = vmatpush1.msra.mxu1 %v3909_v24 }
 0x22d   : > { %1938 = vmatmul.mubr.f32.gmra.mxu1 %v3837_v1  ;;  %2293 = vmatprep.subr.mxu1 %v4725_v54 }
 0x22e   : > { %3868 = vmatprep.mubr.msk.f32.mxu1 %vm1570_vm9, %v3840_v7  ;;  %2294 = vmatpush1.msra.mxu1 %v3908_v21 }
 0x22f   : > { %2295 = vmatprep.subr.mxu1 %v4725_v54 }
 0x230   : > { %2296 = vmatpush1.msra.mxu1 %v3907_v27 }
 0x231   : > { %1944 = vmatmul.mubr.f32.gmra.mxu1 %v3839_v36  ;;  %2297 = vmatprep.subr.mxu1 %v4725_v54 }
 0x232   : > { %3869 = vmatprep.mubr.msk.f32.mxu1 %vm1570_vm9, %v3842_v4  ;;  %2298 = vmatpush1.msra.mxu1 %v3906_v13 }
 0x233   : > { %2299 = vmatprep.subr.mxu1 %v4725_v54 }
 0x234   : > { %2300 = vmatpush1.msra.mxu1 %v3905_v10 }
 0x235   : > { %1950 = vmatmul.mubr.f32.gmra.mxu1 %v3841_v32  ;;  %2301 = vmatprep.subr.mxu1 %v4725_v54 }
 0x236   : > { %3870 = vmatprep.mubr.msk.f32.mxu1 %vm1570_vm9, %v3844_v0  ;;  %2302 = vmatpush1.msra.mxu1 %v3904_v6 }
 0x237   : > { %2303 = vmatprep.subr.mxu1 %v4725_v54 }
 0x238   : > { %2304 = vmatpush1.msra.mxu1 %v3903_v8 }
 0x239   : > { %1956 = vmatmul.mubr.f32.gmra.mxu1 %v3843_v50  ;;  %2305 = vmatprep.subr.mxu1 %v4725_v54 }
 0x23a   : > { %3871 = vmatprep.mubr.msk.f32.mxu1 %vm1570_vm9, %v3846_v57  ;;  %2306 = vmatpush1.msra.mxu1 %v3902_v28 }
 0x23b   : > { %2307 = vmatprep.subr.mxu1 %v4725_v54 }
 0x23c   : > { %2308 = vmatpush1.msra.mxu1 %v3901_v45 }
 0x23d   : > { %1962 = vmatmul.mubr.f32.gmra.mxu1 %v3845_v52  ;;  %2309 = vmatprep.subr.mxu1 %v4725_v54 }
 0x23e   : > { %3872 = vmatprep.mubr.msk.f32.mxu1 %vm1570_vm9, %v3848_v51  ;;  %2310 = vmatpush1.msra.mxu1 %v3900_v41 }
 0x23f   : > { %2311 = vmatprep.subr.mxu1 %v4725_v54 }
 0x240   : > { %2312 = vmatpush1.msra.mxu1 %v3899_v23 }
 0x241   : > { %1968 = vmatmul.mubr.f32.gmra.mxu1 %v3847_v2  ;;  %2313 = vmatprep.subr.mxu1 %v4725_v54 }
 0x242   : > { %3873 = vmatprep.mubr.msk.f32.mxu1 %vm1570_vm9, %v3850_v47  ;;  %2314 = vmatpush1.msra.mxu1 %v3898_v46 }
 0x243   : > { %2315 = vmatprep.subr.mxu1 %v4725_v54 }
 0x244   : > { %2316 = vmatpush1.msra.mxu1 %v3897_v53 }
 0x245   : > { %1974 = vmatmul.mubr.f32.gmra.mxu1 %v3849_v11  ;;  %2345 = vmatprep.subr.mxu1 %v4725_v54 }
 0x246   : > { %3874 = vmatprep.mubr.msk.f32.mxu1 %vm1570_vm9, %v3852_v15  ;;  %2346 = vmatpush2.msra.mxu1 %v3914_v59 }
 0x247   : > { %2347 = vmatprep.subr.mxu1 %v4725_v54 }
 0x248   : > { %2348 = vmatpush2.msra.mxu1 %v3913_v38 }
 0x249   : > { %1980 = vmatmul.mubr.f32.gmra.mxu1 %v3851_v14 }
 0x24a   : > { %3875 = vmatprep.mubr.msk.f32.mxu1 %vm1570_vm9, %v3854_v5 }
 0x24d   : > { %1986 = vmatmul.mubr.f32.gmra.mxu1 %v3853_v18 }
 0x24e   : > { %3876 = vmatprep.mubr.msk.f32.mxu1 %vm1570_vm9, %v3856_v61 }
 0x251   : > { %1992 = vmatmul.mubr.f32.gmra.mxu1 %v3855_v34 }
 0x252   : > { %3877 = vmatprep.mubr.msk.f32.mxu1 %vm1570_vm9, %v3858_v19 }
 0x255   : > { %1998 = vmatmul.mubr.f32.gmra.mxu1 %v3857_v31 }
 0x256   : > { %3878 = vmatprep.mubr.msk.f32.mxu1 %vm1570_vm9, %v3860_v60 }
 0x259   : > { %2004 = vmatmul.mubr.f32.gmra.mxu1 %v3859_v33 }
 0x25a   : > { %3879 = vmatprep.mubr.msk.f32.mxu1 %vm1570_vm9, %v3862_v48 }
 0x25d   : > { %2010 = vmatmul.mubr.f32.gmra.mxu1 %v3861_v56 }
 0x25e   : > { %3880 = vmatprep.mubr.msk.f32.mxu1 %vm1570_vm9, %v3864_v58 }
 0x261   : > { %2016 = vmatmul.mubr.f32.gmra.mxu1 %v3863_v63 }
 0x2a5   : > { %v1685_v26 = vpop.f32.mrf.mxu1 }
 0x2a7   : > { %v1687_v35 = vpop.f32.mrf.mxu1 }
 0x2a9   : > { %v1691_v20 = vpop.f32.mrf.mxu1 }
 0x2ab   : > { %v1693_v3 = vpop.f32.mrf.mxu1 }
 0x2ad   : > { %v1697_v17 = vpop.f32.mrf.mxu1 }
 0x2af   : > { %v1699_v30 = vpop.f32.mrf.mxu1 }
 0x2b1   : > { %v1703_v1 = vpop.f32.mrf.mxu1 }
 0x2b3   : > { %v1705_v7 = vpop.f32.mrf.mxu1 }
 0x2b5   : > { %v1709_v22 = vpop.f32.mrf.mxu1 }
 0x2b7   : > { %v1711_v29 = vpop.f32.mrf.mxu1 }
 0x2b9   : > { %v6317_v36 = vpop.f32.mrf.mxu1 }
 0x2bb   : > { %v6319_v4 = vpop.f32.mrf.mxu1 }
 0x2bd   : > { %v6321_v39 = vpop.f32.mrf.mxu1 }
 0x2bf   : > { %v6323_v40 = vpop.f32.mrf.mxu1 }
 0x2c1   : > { %v6325_v32 = vpop.f32.mrf.mxu1 }
 0x2c3   : > { %v6327_v0 = vpop.f32.mrf.mxu1 }
 0x2c5   : > { %v6329_v25 = vpop.f32.mrf.mxu1 }
 0x2c7   : > { %v6331_v50 = vpop.f32.mrf.mxu1 }
 0x2c9   : > { %v6333_v57 = vpop.f32.mrf.mxu1 }
 0x2cb   : > { %v6335_v12 = vpop.f32.mrf.mxu1 }
 0x2cd   : > { %v6337_v24 = vpop.f32.mrf.mxu1 }
 0x2cf   : > { %v6339_v52 = vpop.f32.mrf.mxu1 }
 0x2d1   : > { %v6341_v51 = vpop.f32.mrf.mxu1 }
 0x2d3   : > { %v6343_v21 = vpop.f32.mrf.mxu1 }
 0x2d5   : > { %v6345_v9 = vpop.f32.mrf.mxu1 }
 0x2d7   : > { %v6347_v27 = vpop.f32.mrf.mxu1 }
 0x2d9   : > { %v6349_v2 = vpop.f32.mrf.mxu1 }
 0x2db   : > { %v6351_v47 = vpop.f32.mrf.mxu1 }
 0x2dd   : > { %v6353_v44 = vpop.f32.mrf.mxu1 }
 0x2df   : > { %v6355_v13 = vpop.f32.mrf.mxu1 }
 0x2e1   : > { %v6357_v11 = vpop.f32.mrf.mxu1 }
 0x2e3   : > { %v6359_v15 = vpop.f32.mrf.mxu1 }
 0x2e5   : > { %v1927_v10 = vpop.f32.mrf.mxu1 }
 0x2e6   : > { %v2022_v16 = vmax.f32 %v1685_v26, %v1927_v10 }
 0x2e7   : > { %v1929_v14 = vpop.f32.mrf.mxu1 }
 0x2e8   : > { %v2023_v5 = vmax.f32 %v1687_v35, %v1929_v14 }
 0x2e9   : > { %v1933_v6 = vpop.f32.mrf.mxu1 }
 0x2ea   : > { %3881 = vmatprep.mubr.msk.f32.mxu0 %vm2072_vm10, %v2023_v5  ;;  %3915 = vmatprep.mubr.msk.f32.mxu1 %vm2072_vm10, %v2023_v5  ;;  %v2024_v49 = vmax.f32 %v1691_v20, %v1933_v6 }
 0x2eb   : > { %v1935_v18 = vpop.f32.mrf.mxu1  ;;  %2186 = vmatmul.mubr.f32.vlgmr.msra.gmra.mxu0 %v2022_v16  ;;  %2350 = vmatmul.mubr.f32.vlgmr.msra.gmra.mxu1 %v2022_v16 }
 0x2ec   : > { %v2025_v61 = vmax.f32 %v1693_v3, %v1935_v18  ;;  %v2718_v18 = vld [vmem:[%s7156_s5 + $0xe8] sm:$0xff] }
 0x2ed   : > { %v1939_v8 = vpop.f32.mrf.mxu1 }
 0x2ee   : > { %3882 = vmatprep.mubr.msk.f32.mxu0 %vm2072_vm10, %v2025_v61  ;;  %3916 = vmatprep.mubr.msk.f32.mxu1 %vm2072_vm10, %v2025_v61  ;;  %v2026_v28 = vmax.f32 %v1697_v17, %v1939_v8  ;;  %v2702_v61 = vld [vmem:[%s7156_s5 + $0x68] sm:$0xff]  ;;  %v2701_v8 = vld [vmem:[%s7156_s5 + $0x60] sm:$0xff] }
 0x2ef   : > { %v1941_v34 = vpop.f32.mrf.mxu1  ;;  %2191 = vmatmul.mubr.f32.gmra.mxu0 %v2024_v49  ;;  %2355 = vmatmul.mubr.f32.gmra.mxu1 %v2024_v49  ;;  %v2717_v49 = vld [vmem:[%s7156_s5 + $0xe0] sm:$0xff] }
 0x2f0   : > { %v2027_v19 = vmax.f32 %v1699_v30, %v1941_v34  ;;  %v2716_v34 = vld [vmem:[%s7156_s5 + $0xd8] sm:$0xff] }
 0x2f1   : > { %v1945_v43 = vpop.f32.mrf.mxu1 }
 0x2f2   : > { %3883 = vmatprep.mubr.msk.f32.mxu0 %vm2072_vm10, %v2027_v19  ;;  %3917 = vmatprep.mubr.msk.f32.mxu1 %vm2072_vm10, %v2027_v19  ;;  %v2028_v45 = vmax.f32 %v1703_v1, %v1945_v43  ;;  %v2700_v19 = vld [vmem:[%s7156_s5 + $0x58] sm:$0xff]  ;;  %v2699_v43 = vld [vmem:[%s7156_s5 + $0x50] sm:$0xff] }
 0x2f3   : > { %v1947_v31 = vpop.f32.mrf.mxu1  ;;  %2196 = vmatmul.mubr.f32.gmra.mxu0 %v2026_v28  ;;  %2360 = vmatmul.mubr.f32.gmra.mxu1 %v2026_v28  ;;  %v2715_v28 = vld [vmem:[%s7156_s5 + $0xd0] sm:$0xff] }
 0x2f4   : > { %v2029_v60 = vmax.f32 %v1705_v7, %v1947_v31  ;;  %v2714_v31 = vld [vmem:[%s7156_s5 + $0xc8] sm:$0xff] }
 0x2f5   : > { %v1951_v33 = vpop.f32.mrf.mxu1 }
 0x2f6   : > { %3884 = vmatprep.mubr.msk.f32.mxu0 %vm2072_vm10, %v2029_v60  ;;  %3918 = vmatprep.mubr.msk.f32.mxu1 %vm2072_vm10, %v2029_v60  ;;  %v2030_v41 = vmax.f32 %v1709_v22, %v1951_v33  ;;  %v2698_v60 = vld [vmem:[%s7156_s5 + $0x48] sm:$0xff]  ;;  %v2697_v33 = vld [vmem:[%s7156_s5 + $0x40] sm:$0xff] }
 0x2f7   : > { %v1953_v48 = vpop.f32.mrf.mxu1  ;;  %2201 = vmatmul.mubr.f32.gmra.mxu0 %v2028_v45  ;;  %2365 = vmatmul.mubr.f32.gmra.mxu1 %v2028_v45  ;;  %v2713_v45 = vld [vmem:[%s7156_s5 + $0xc0] sm:$0xff] }
 0x2f8   : > { %v2031_v37 = vmax.f32 %v1711_v29, %v1953_v48  ;;  %v2712_v48 = vld [vmem:[%s7156_s5 + $0xb8] sm:$0xff] }
 0x2f9   : > { %v1957_v56 = vpop.f32.mrf.mxu1 }
 0x2fa   : > { %3885 = vmatprep.mubr.msk.f32.mxu0 %vm2072_vm10, %v2031_v37  ;;  %3919 = vmatprep.mubr.msk.f32.mxu1 %vm2072_vm10, %v2031_v37  ;;  %v2032_v42 = vmax.f32 %v6317_v36, %v1957_v56  ;;  %v2696_v37 = vld [vmem:[%s7156_s5 + $0x38] sm:$0xff]  ;;  %v2695_v56 = vld [vmem:[%s7156_s5 + $0x30] sm:$0xff] }
 0x2fb   : > { %v1959_v58 = vpop.f32.mrf.mxu1  ;;  %2206 = vmatmul.mubr.f32.gmra.mxu0 %v2030_v41  ;;  %2370 = vmatmul.mubr.f32.gmra.mxu1 %v2030_v41  ;;  %v2711_v41 = vld [vmem:[%s7156_s5 + $0xb0] sm:$0xff] }
 0x2fc   : > { %v2033_v23 = vmax.f32 %v6319_v4, %v1959_v58  ;;  %v2710_v58 = vld [vmem:[%s7156_s5 + $0xa8] sm:$0xff] }
 0x2fd   : > { %v1963_v46 = vpop.f32.mrf.mxu1 }
 0x2fe   : > { %3886 = vmatprep.mubr.msk.f32.mxu0 %vm2072_vm10, %v2033_v23  ;;  %3920 = vmatprep.mubr.msk.f32.mxu1 %vm2072_vm10, %v2033_v23  ;;  %v2034_v53 = vmax.f32 %v6321_v39, %v1963_v46  ;;  %v2694_v23 = vld [vmem:[%s7156_s5 + $0x28] sm:$0xff]  ;;  %v2693_v46 = vld [vmem:[%s7156_s5 + $0x20] sm:$0xff] }
 0x2ff   : > { %v1965_v63 = vpop.f32.mrf.mxu1  ;;  %2211 = vmatmul.mubr.f32.gmra.mxu0 %v2032_v42  ;;  %2375 = vmatmul.mubr.f32.gmra.mxu1 %v2032_v42  ;;  %v2709_v42 = vld [vmem:[%s7156_s5 + $0xa0] sm:$0xff] }
 0x300   : > { %v2035_v55 = vmax.f32 %v6323_v40, %v1965_v63  ;;  %v2708_v63 = vld [vmem:[%s7156_s5 + $0x98] sm:$0xff] }
 0x301   : > { %v1969_v59 = vpop.f32.mrf.mxu1 }
 0x302   : > { %3887 = vmatprep.mubr.msk.f32.mxu0 %vm2072_vm10, %v2035_v55  ;;  %3921 = vmatprep.mubr.msk.f32.mxu1 %vm2072_vm10, %v2035_v55  ;;  %v2036_v26 = vmax.f32 %v6325_v32, %v1969_v59  ;;  %v2692_v55 = vld [vmem:[%s7156_s5 + $0x18] sm:$0xff] }
 0x303   : > { %v1971_v62 = vpop.f32.mrf.mxu1  ;;  %2216 = vmatmul.mubr.f32.gmra.mxu0 %v2034_v53  ;;  %2380 = vmatmul.mubr.f32.gmra.mxu1 %v2034_v53 }
 0x304   : > { %v2037_v38 = vmax.f32 %v6327_v0, %v1971_v62 }
 0x305   : > { %v1975_v35 = vpop.f32.mrf.mxu1 }
 0x306   : > { %3888 = vmatprep.mubr.msk.f32.mxu0 %vm2072_vm10, %v2037_v38  ;;  %3922 = vmatprep.mubr.msk.f32.mxu1 %vm2072_vm10, %v2037_v38  ;;  %v2038_v17 = vmax.f32 %v6329_v25, %v1975_v35 }
 0x307   : > { %v1977_v20 = vpop.f32.mrf.mxu1  ;;  %2221 = vmatmul.mubr.f32.gmra.mxu0 %v2036_v26  ;;  %2385 = vmatmul.mubr.f32.gmra.mxu1 %v2036_v26 }
 0x308   : > { %v2039_v3 = vmax.f32 %v6331_v50, %v1977_v20 }
 0x309   : > { %v1981_v30 = vpop.f32.mrf.mxu1 }
 0x30a   : > { %3889 = vmatprep.mubr.msk.f32.mxu0 %vm2072_vm10, %v2039_v3  ;;  %3923 = vmatprep.mubr.msk.f32.mxu1 %vm2072_vm10, %v2039_v3  ;;  %v2040_v22 = vmax.f32 %v6333_v57, %v1981_v30  ;;  %v2691_v30 = vld [vmem:[%s7156_s5 + $0x10] sm:$0xff] }
 0x30b   : > { %v1983_v1 = vpop.f32.mrf.mxu1  ;;  %2226 = vmatmul.mubr.f32.gmra.mxu0 %v2038_v17  ;;  %2390 = vmatmul.mubr.f32.gmra.mxu1 %v2038_v17  ;;  %v2707_v17 = vld [vmem:[%s7156_s5 + $0x90] sm:$0xff] }
 0x30c   : > { %v2041_v7 = vmax.f32 %v6335_v12, %v1983_v1 }
 0x30d   : > { %v1987_v29 = vpop.f32.mrf.mxu1 }
 0x30e   : > { %3890 = vmatprep.mubr.msk.f32.mxu0 %vm2072_vm10, %v2041_v7  ;;  %3924 = vmatprep.mubr.msk.f32.mxu1 %vm2072_vm10, %v2041_v7  ;;  %v2042_v39 = vmax.f32 %v6337_v24, %v1987_v29  ;;  %v2690_v29 = vld [vmem:[%s7156_s5 + $0x8] sm:$0xff] }
 0x30f   : > { %v1989_v36 = vpop.f32.mrf.mxu1  ;;  %2231 = vmatmul.mubr.f32.gmra.mxu0 %v2040_v22  ;;  %2395 = vmatmul.mubr.f32.gmra.mxu1 %v2040_v22  ;;  %v2706_v22 = vld [vmem:[%s7156_s5 + $0x88] sm:$0xff] }
 0x310   : > { %v2043_v4 = vmax.f32 %v6339_v52, %v1989_v36 }
 0x311   : > { %v1993_v40 = vpop.f32.mrf.mxu1 }
 0x312   : > { %3891 = vmatprep.mubr.msk.f32.mxu0 %vm2072_vm10, %v2043_v4  ;;  %3925 = vmatprep.mubr.msk.f32.mxu1 %vm2072_vm10, %v2043_v4  ;;  %v2044_v25 = vmax.f32 %v6341_v51, %v1993_v40 }
 0x313   : > { %v1995_v32 = vpop.f32.mrf.mxu1  ;;  %2236 = vmatmul.mubr.f32.gmra.mxu0 %v2042_v39  ;;  %2400 = vmatmul.mubr.f32.gmra.mxu1 %v2042_v39 }
 0x314   : > { %v2045_v0 = vmax.f32 %v6343_v21, %v1995_v32  ;;  %v2705_v32 = vld [vmem:[%s7156_s5 + $0x80] sm:$0xff] }
 0x315   : > { %v1999_v50 = vpop.f32.mrf.mxu1 }
 0x316   : > { %3892 = vmatprep.mubr.msk.f32.mxu0 %vm2072_vm10, %v2045_v0  ;;  %3926 = vmatprep.mubr.msk.f32.mxu1 %vm2072_vm10, %v2045_v0  ;;  %v2046_v24 = vmax.f32 %v6345_v9, %v1999_v50  ;;  %v2689_v0 = vld [vmem:[%s7156_s5] sm:$0xff] }
 0x317   : > { %v2001_v57 = vpop.f32.mrf.mxu1  ;;  %2241 = vmatmul.mubr.f32.gmra.mxu0 %v2044_v25  ;;  %2405 = vmatmul.mubr.f32.gmra.mxu1 %v2044_v25 }
 0x318   : > { %v2047_v12 = vmax.f32 %v6347_v27, %v2001_v57 }
 0x319   : > { %v2005_v52 = vpop.f32.mrf.mxu1 }
 0x31a   : > { %3893 = vmatprep.mubr.msk.f32.mxu0 %vm2072_vm10, %v2047_v12  ;;  %3927 = vmatprep.mubr.msk.f32.mxu1 %vm2072_vm10, %v2047_v12  ;;  %v2048_v10 = vmax.f32 %v6349_v2, %v2005_v52 }
 0x31b   : > { %v2007_v21 = vpop.f32.mrf.mxu1  ;;  %2246 = vmatmul.mubr.f32.gmra.mxu0 %v2046_v24  ;;  %2410 = vmatmul.mubr.f32.gmra.mxu1 %v2046_v24 }
 0x31c   : > { %v2049_v51 = vmax.f32 %v6351_v47, %v2007_v21 }
 0x31d   : > { %v2011_v14 = vpop.f32.mrf.mxu1 }
 0x31e   : > { %3894 = vmatprep.mubr.msk.f32.mxu0 %vm2072_vm10, %v2049_v51  ;;  %3928 = vmatprep.mubr.msk.f32.mxu1 %vm2072_vm10, %v2049_v51  ;;  %v2050_v5 = vmax.f32 %v6353_v44, %v2011_v14  ;;  %v2720_v44 = vld [vmem:[%s7156_s5 + $0xf8] sm:$0xff] }
 0x31f   : > { %v2013_v27 = vpop.f32.mrf.mxu1  ;;  %2251 = vmatmul.mubr.f32.gmra.mxu0 %v2048_v10  ;;  %2415 = vmatmul.mubr.f32.gmra.mxu1 %v2048_v10 }
 0x320   : > { %v2051_v9 = vmax.f32 %v6355_v13, %v2013_v27  ;;  %v2704_v13 = vld [vmem:[%s7156_s5 + $0x78] sm:$0xff]  ;;  %3979 = vmatprep.subr.mxu0 %v2720_v44 }
 0x321   : > { %v2017_v16 = vpop.f32.mrf.mxu1  ;;  %3980 = vmatpush3.msra.mxu0 %v2704_v13 }
 0x322   : > { %3895 = vmatprep.mubr.msk.f32.mxu0 %vm2072_vm10, %v2051_v9  ;;  %3929 = vmatprep.mubr.msk.f32.mxu1 %vm2072_vm10, %v2051_v9  ;;  %v2052_v6 = vmax.f32 %v6357_v11, %v2017_v16  ;;  %v2703_v11 = vld [vmem:[%s7156_s5 + $0x70] sm:$0xff] }
 0x323   : > { %v2019_v47 = vpop.f32.mrf.mxu1  ;;  %2256 = vmatmul.mubr.f32.gmra.mxu0 %v2050_v5  ;;  %2420 = vmatmul.mubr.f32.gmra.mxu1 %v2050_v5 }
 0x324   : > { %v2053_v2 = vmax.f32 %v6359_v15, %v2019_v47  ;;  %v2719_v15 = vld [vmem:[%s7156_s5 + $0xf0] sm:$0xff] }
 0x325   : > { %3981 = vmatprep.subr.mxu0 %v2719_v15 }
 0x326   : > { %3896 = vmatprep.mubr.msk.f32.mxu0 %vm2072_vm10, %v2053_v2  ;;  %3930 = vmatprep.mubr.msk.f32.mxu1 %vm2072_vm10, %v2053_v2 }
 0x327   : > { %2261 = vmatmul.mubr.f32.gmra.mxu0 %v2052_v6  ;;  %2425 = vmatmul.mubr.f32.gmra.mxu1 %v2052_v6 }
 0x328   : > { %3982 = vmatpush3.msra.mxu0 %v2703_v11 }
 0x329   : > { %3983 = vmatprep.subr.mxu0 %v2718_v18 }
 0x32a   : > { %3984 = vmatpush3.msra.mxu0 %v2702_v61 }
 0x32b   : > { %3985 = vmatprep.subr.mxu0 %v2717_v49 }
 0x32c   : > { %3986 = vmatpush3.msra.mxu0 %v2701_v8 }
 0x32d   : > { %3987 = vmatprep.subr.mxu0 %v2716_v34 }
 0x32e   : > { %3988 = vmatpush3.msra.mxu0 %v2700_v19 }
 0x32f   : > { %3989 = vmatprep.subr.mxu0 %v2715_v28 }
 0x330   : > { %3990 = vmatpush3.msra.mxu0 %v2699_v43 }
 0x331   : > { %3991 = vmatprep.subr.mxu0 %v2714_v31 }
 0x332   : > { %3992 = vmatpush3.msra.mxu0 %v2698_v60 }
 0x333   : > { %3993 = vmatprep.subr.mxu0 %v2713_v45 }
 0x334   : > { %3994 = vmatpush3.msra.mxu0 %v2697_v33 }
 0x335   : > { %3995 = vmatprep.subr.mxu0 %v2712_v48 }
 0x336   : > { %3996 = vmatpush3.msra.mxu0 %v2696_v37 }
 0x337   : > { %3997 = vmatprep.subr.mxu0 %v2711_v41 }
 0x338   : > { %3998 = vmatpush3.msra.mxu0 %v2695_v56 }
 0x339   : > { %3999 = vmatprep.subr.mxu0 %v2710_v58 }
 0x33a   : > { %4000 = vmatpush3.msra.mxu0 %v2694_v23 }
 0x33b   : > { %4001 = vmatprep.subr.mxu0 %v2709_v42 }
 0x33c   : > { %4002 = vmatpush3.msra.mxu0 %v2693_v46 }
 0x33d   : > { %4003 = vmatprep.subr.mxu0 %v2708_v63 }
 0x33e   : > { %4004 = vmatpush3.msra.mxu0 %v2692_v55 }
 0x33f   : > { %4005 = vmatprep.subr.mxu0 %v2707_v17 }
 0x340   : > { %4006 = vmatpush3.msra.mxu0 %v2691_v30 }
 0x341   : > { %4007 = vmatprep.subr.mxu0 %v2706_v22 }
 0x342   : > { %4008 = vmatpush3.msra.mxu0 %v2690_v29 }
 0x343   : > { %4009 = vmatprep.subr.mxu0 %v2705_v32 }
 0x344   : > { %4010 = vmatpush3.msra.mxu0 %v2689_v0  ;;  %v6564_v0 = vld [vmem:[%s7156_s5 + $0x160] sm:$0xff] }
 0x345   : > { %4183 = vmatprep.subr.mxu0 %v6564_v0 }
 0x3ab   : > { %v2187_v53 = vpop.f32.mrf.mxu0  ;;  %v2351_v59 = vpop.f32.mrf.mxu1 }
 0x3ac   : > { %v6507_v4 = vmax.f32 %v2187_v53, %v2351_v59 }
 0x3ad   : > { %v2189_v62 = vpop.f32.mrf.mxu0  ;;  %v2353_v38 = vpop.f32.mrf.mxu1 }
 0x3ae   : > { %v2510_v10 = vrot.slane %v6507_v4, 2  ;;  %v2462_v14 = vrot.slane %v6507_v4, 1  ;;  %v2558_v31 = vrot.slane %v6507_v4, 3 }
 0x3af   : > { %v2192_v26 = vpop.f32.mrf.mxu0  ;;  %v2356_v35 = vpop.f32.mrf.mxu1 }
 0x3b0   : > { %v6505_v36 = vmax.f32 %v2192_v26, %v2356_v35 }
 0x3b1   : > { %v2194_v20 = vpop.f32.mrf.mxu0  ;;  %v2358_v3 = vpop.f32.mrf.mxu1 }
 0x3b2   : > { %v2463_v12 = vrot.slane %v6505_v36, 1  ;;  %v2511_v24 = vrot.slane %v6505_v36, 2  ;;  %v2559_v34 = vrot.slane %v6505_v36, 3 }
 0x3b3   : > { %v2197_v1 = vpop.f32.mrf.mxu0  ;;  %v2361_v7 = vpop.f32.mrf.mxu1 }
 0x3b4   : > { %v6515_v25 = vmax.f32 %v2197_v1, %v2361_v7  ;;  %v2512_v6 = vsel %vm691_vm3, %v2510_v10, %v2511_v24  ;;  %v2464_v13 = vsel %vm562_vm1, %v2462_v14, %v2463_v12  ;;  %v2560_v48 = vsel %vm820_vm0, %v2558_v31, %v2559_v34 }
 0x3b5   : > { %v2199_v39 = vpop.f32.mrf.mxu0  ;;  %v2363_v40 = vpop.f32.mrf.mxu1 }
 0x3b6   : > { %v2513_v5 = vrot.slane %v6515_v25, 2  ;;  %v2465_v16 = vrot.slane %v6515_v25, 1  ;;  %v2561_v43 = vrot.slane %v6515_v25, 3 }
 0x3b7   : > { %v2202_v50 = vpop.f32.mrf.mxu0  ;;  %v2366_v57 = vpop.f32.mrf.mxu1 }
 0x3b8   : > { %v6519_v52 = vmax.f32 %v2202_v50, %v2366_v57 }
 0x3b9   : > { %v2204_v21 = vpop.f32.mrf.mxu0  ;;  %v2368_v51 = vpop.f32.mrf.mxu1 }
 0x3ba   : > { %v2466_v27 = vrot.slane %v6519_v52, 1  ;;  %v2514_v9 = vrot.slane %v6519_v52, 2  ;;  %v2562_v8 = vrot.slane %v6519_v52, 3 }
 0x3bb   : > { %v2207_v47 = vpop.f32.mrf.mxu0  ;;  %v2371_v2 = vpop.f32.mrf.mxu1 }
 0x3bc   : > { %v2515_v44 = vsel %vm691_vm3, %v2513_v5, %v2514_v9  ;;  %v2467_v15 = vsel %vm562_vm1, %v2465_v16, %v2466_v27  ;;  %v2563_v33 = vsel %vm820_vm0, %v2561_v43, %v2562_v8  ;;  %v6543_v58 = vmax.f32 %v2207_v47, %v2371_v2 }
 0x3bd   : > { %v2209_v11 = vpop.f32.mrf.mxu0  ;;  %v2373_v18 = vpop.f32.mrf.mxu1  ;;  %v4624_v61 = vpack.i.bf16 %v2515_v44, %v2512_v6  ;;  %v4619_v49 = vpack.i.bf16 %v2467_v15, %v2464_v13 }
 0x3be   : > { %v2516_v35 = vrot.slane %v6543_v58, 2  ;;  %v2468_v20 = vrot.slane %v6543_v58, 1  ;;  %v2564_v9 = vrot.slane %v6543_v58, 3 }
 0x3bf   : > { %v2212_v19 = vpop.f32.mrf.mxu0  ;;  %4625 = vrot.lane.b32.xlu1 %v4624_v61, %s4726_s23  ;;  %4620 = vrot.lane.b32.xlu0 %v4619_v49, %s4727_s30  ;;  %v2376_v28 = vpop.f32.mrf.mxu1 }
 0x3c0   : > { %v6541_v56 = vmax.f32 %v2212_v19, %v2376_v28 }
 0x3c1   : > { %v2214_v60 = vpop.f32.mrf.mxu0  ;;  %v2378_v45 = vpop.f32.mrf.mxu1 }
 0x3c2   : > { %v2469_v53 = vrot.slane %v6541_v56, 1  ;;  %v2517_v59 = vrot.slane %v6541_v56, 2  ;;  %v2565_v51 = vrot.slane %v6541_v56, 3 }
 0x3c3   : > { %v2217_v37 = vpop.f32.mrf.mxu0  ;;  %2584 = vrot.lane.b32.xlu1 %v2563_v33, %s4728_s20  ;;  %2582 = vrot.lane.b32.xlu0 %v2560_v48, %s4728_s20  ;;  %v2381_v41 = vpop.f32.mrf.mxu1 }
 0x3c4   : > { %v6545_v46 = vmax.f32 %v2217_v37, %v2381_v41  ;;  %v2518_v29 = vsel %vm691_vm3, %v2516_v35, %v2517_v59  ;;  %v2470_v40 = vsel %vm562_vm1, %v2468_v20, %v2469_v53  ;;  %v2566_v2 = vsel %vm820_vm0, %v2564_v9, %v2565_v51 }
 0x3c5   : > { %v2219_v23 = vpop.f32.mrf.mxu0  ;;  %v2383_v42 = vpop.f32.mrf.mxu1 }
 0x3c6   : > { %v2519_v30 = vrot.slane %v6545_v46, 2  ;;  %v2471_v1 = vrot.slane %v6545_v46, 1  ;;  %v2567_v27 = vrot.slane %v6545_v46, 3 }
 0x3c7   : > { %v2222_v63 = vpop.f32.mrf.mxu0  ;;  %v2386_v55 = vpop.f32.mrf.mxu1 }
 0x3c8   : > { %v6549_v62 = vmax.f32 %v2222_v63, %v2386_v55 }
 0x3c9   : > { %v2224_v38 = vpop.f32.mrf.mxu0  ;;  %v2388_v26 = vpop.f32.mrf.mxu1 }
 0x3ca   : > { %v2472_v3 = vrot.slane %v6549_v62, 1  ;;  %v2520_v17 = vrot.slane %v6549_v62, 2  ;;  %v2568_v21 = vrot.slane %v6549_v62, 3 }
 0x3cb   : > { %v2227_v7 = vpop.f32.mrf.mxu0  ;;  %v2391_v22 = vpop.f32.mrf.mxu1 }
 0x3cc   : > { %v2521_v39 = vsel %vm691_vm3, %v2519_v30, %v2520_v17  ;;  %v2473_v32 = vsel %vm562_vm1, %v2471_v1, %v2472_v3  ;;  %v2569_v47 = vsel %vm820_vm0, %v2567_v27, %v2568_v21  ;;  %v6579_v15 = vmax.f32 %v2227_v7, %v2391_v22 }
 0x3cd   : > { %v2229_v50 = vpop.f32.mrf.mxu0  ;;  %v2393_v57 = vpop.f32.mrf.mxu1  ;;  %v4634_v12 = vpack.i.bf16 %v2521_v39, %v2518_v29  ;;  %v4629_v24 = vpack.i.bf16 %v2473_v32, %v2470_v40 }
 0x3ce   : > { %v2522_v60 = vrot.slane %v6579_v15, 2  ;;  %v2474_v45 = vrot.slane %v6579_v15, 1  ;;  %v2570_v39 = vrot.slane %v6579_v15, 3 }
 0x3cf   : > { %v2232_v10 = vpop.f32.mrf.mxu0  ;;  %4635 = vrot.lane.b32.xlu1 %v4634_v12, %s4726_s23  ;;  %4630 = vrot.lane.b32.xlu0 %v4629_v24, %s4727_s30  ;;  %v2396_v14 = vpop.f32.mrf.mxu1 }
 0x3d0   : > { %v6577_v13 = vmax.f32 %v2232_v10, %v2396_v14 }
 0x3d1   : > { %v2234_v5 = vpop.f32.mrf.mxu0  ;;  %v2398_v16 = vpop.f32.mrf.mxu1 }
 0x3d2   : > { %v2475_v34 = vrot.slane %v6577_v13, 1  ;;  %v2523_v19 = vrot.slane %v6577_v13, 2  ;;  %v2571_v17 = vrot.slane %v6577_v13, 3 }
 0x3d3   : > { %v2237_v6 = vpop.f32.mrf.mxu0  ;;  %2588 = vrot.lane.b32.xlu1 %v2569_v47, %s4728_s20  ;;  %2586 = vrot.lane.b32.xlu0 %v2566_v2, %s4728_s20  ;;  %v2401_v44 = vpop.f32.mrf.mxu1 }
 0x3d4   : > { %v6581_v61 = vmax.f32 %v2237_v6, %v2401_v44  ;;  %v2524_v63 = vsel %vm691_vm3, %v2522_v60, %v2523_v19  ;;  %v2476_v53 = vsel %vm562_vm1, %v2474_v45, %v2475_v34  ;;  %v2572_v57 = vsel %vm820_vm0, %v2570_v39, %v2571_v17 }
 0x3d5   : > { %v2239_v11 = vpop.f32.mrf.mxu0  ;;  %v2403_v18 = vpop.f32.mrf.mxu1  ;;  %v2607_v60 = vrot.slane %v6505_v36, 4 }
 0x3d6   : > { %v2525_v37 = vrot.slane %v6581_v61, 2  ;;  %v2477_v41 = vrot.slane %v6581_v61, 1  ;;  %v2573_v29 = vrot.slane %v6581_v61, 3  ;;  %v2621_v39 = vrot.slane %v6581_v61, 4 }
 0x3d7   : > { %v2242_v49 = vpop.f32.mrf.mxu0  ;;  %v2406_v8 = vpop.f32.mrf.mxu1 }
 0x3d8   : > { %v6585_v28 = vmax.f32 %v2242_v49, %v2406_v8 }
 0x3d9   : > { %v2244_v43 = vpop.f32.mrf.mxu0  ;;  %v2408_v31 = vpop.f32.mrf.mxu1 }
 0x3da   : > { %v2478_v33 = vrot.slane %v6585_v28, 1  ;;  %v2526_v48 = vrot.slane %v6585_v28, 2  ;;  %v2574_v3 = vrot.slane %v6585_v28, 3 }
 0x3db   : > { %v2247_v23 = vpop.f32.mrf.mxu0  ;;  %v2411_v42 = vpop.f32.mrf.mxu1 }
 0x3dc   : > { %v2527_v55 = vsel %vm691_vm3, %v2525_v37, %v2526_v48  ;;  %v2479_v59 = vsel %vm562_vm1, %v2477_v41, %v2478_v33  ;;  %v6601_v7 = vmax.f32 %v2247_v23, %v2411_v42  ;;  %v2575_v50 = vsel %vm820_vm0, %v2573_v29, %v2574_v3 }
 0x3dd   : > { %v2249_v38 = vpop.f32.mrf.mxu0  ;;  %v2413_v26 = vpop.f32.mrf.mxu1  ;;  %v4644_v35 = vpack.i.bf16 %v2527_v55, %v2524_v63  ;;  %v4639_v20 = vpack.i.bf16 %v2479_v59, %v2476_v53  ;;  %v2606_v33 = vrot.slane %v6507_v4, 4  ;;  %v2613_v23 = vrot.slane %v6541_v56, 4 }
 0x3de   : > { %v2528_v51 = vrot.slane %v6601_v7, 2  ;;  %v2480_v11 = vrot.slane %v6601_v7, 1  ;;  %v2576_v41 = vrot.slane %v6601_v7, 3  ;;  %v2612_v42 = vrot.slane %v6543_v58, 4 }
 0x3df   : > { %v2252_v30 = vpop.f32.mrf.mxu0  ;;  %4645 = vrot.lane.b32.xlu1 %v4644_v35, %s4726_s23  ;;  %4640 = vrot.lane.b32.xlu0 %v4639_v20, %s4727_s30  ;;  %v2416_v1 = vpop.f32.mrf.mxu1  ;;  %v2608_v37 = vsel %vm949_vm2, %v2606_v33, %v2607_v60  ;;  %v2619_v59 = vrot.slane %v6577_v13, 4  ;;  %v2618_v38 = vrot.slane %v6579_v15, 4  ;;  %v2610_v26 = vrot.slane %v6519_v52, 4  ;;  %v2726_v60 = vld [vmem:[%s7156_s5 + $0x128] sm:$0xff] }
 0x3e0   : > { %v6603_v22 = vmax.f32 %v2252_v30, %v2416_v1  ;;  %v2614_v55 = vsel %vm949_vm2, %v2612_v42, %v2613_v23  ;;  %v2609_v20 = vrot.slane %v6515_v25, 4  ;;  %v2624_v17 = vrot.slane %v6601_v7, 4  ;;  %v2724_v42 = vld [vmem:[%s7156_s5 + $0x118] sm:$0xff] }
 0x3e1   : > { %v2254_v40 = vpop.f32.mrf.mxu0  ;;  %v2418_v32 = vpop.f32.mrf.mxu1  ;;  %v2620_v35 = vsel %vm949_vm2, %v2618_v38, %v2619_v59  ;;  %v2616_v30 = vrot.slane %v6549_v62, 4  ;;  %v2615_v1 = vrot.slane %v6545_v46, 4  ;;  %v2721_v59 = vld [vmem:[%s7156_s5 + $0x100] sm:$0xff] }
 0x3e2   : > { %v2529_v12 = vrot.slane %v6603_v22, 2  ;;  %v2481_v47 = vrot.slane %v6603_v22, 1  ;;  %v2577_v48 = vrot.slane %v6603_v22, 3  ;;  %v2625_v3 = vrot.slane %v6603_v22, 4 }
 0x3e3   : > { %v2257_v24 = vpop.f32.mrf.mxu0  ;;  %2592 = vrot.lane.b32.xlu1 %v2575_v50, %s4728_s20  ;;  %2590 = vrot.lane.b32.xlu0 %v2572_v57, %s4728_s20  ;;  %v2421_v21 = vpop.f32.mrf.mxu1  ;;  %v2611_v13 = vsel %vm949_vm2, %v2609_v20, %v2610_v26  ;;  %v2617_v29 = vsel %vm949_vm2, %v2615_v1, %v2616_v30  ;;  %v2622_v22 = vrot.slane %v6585_v28, 4 }
 0x3e4   : > { %v6613_v27 = vmax.f32 %v2257_v24, %v2421_v21  ;;  %v2530_v9 = vsel %vm691_vm3, %v2528_v51, %v2529_v12  ;;  %v2482_v43 = vsel %vm562_vm1, %v2480_v11, %v2481_v47  ;;  %v2578_v36 = vsel %vm820_vm0, %v2576_v41, %v2577_v48  ;;  %v2725_v41 = vld [vmem:[%s7156_s5 + $0x120] sm:$0xff] }
 0x3e5   : > { %v2259_v10 = vpop.f32.mrf.mxu0  ;;  %v2423_v14 = vpop.f32.mrf.mxu1  ;;  %v2626_v52 = vsel %vm949_vm2, %v2624_v17, %v2625_v3  ;;  %v2623_v40 = vsel %vm949_vm2, %v2621_v39, %v2622_v22 }
 0x3e6   : > { %v2531_v49 = vrot.slane %v6613_v27, 2  ;;  %v2483_v34 = vrot.slane %v6613_v27, 1  ;;  %v2579_v53 = vrot.slane %v6613_v27, 3  ;;  %v2627_v62 = vrot.slane %v6613_v27, 4 }
 0x3e7   : > { %2546 = vrot.lane.b32.xlu1 %v2530_v9, %s4726_s23  ;;  %v2262_v5 = vpop.f32.mrf.mxu0  ;;  %v2426_v16 = vpop.f32.mrf.mxu1 }
 0x3e8   : > { %v2445_v2 = vmax.f32 %v2262_v5, %v2426_v16 }
 0x3e9   : > { %v2264_v6 = vpop.f32.mrf.mxu0  ;;  %v2428_v44 = vpop.f32.mrf.mxu1 }
 0x3ea   : > { %v2484_v18 = vrot.slane %v2445_v2, 1  ;;  %v2532_v8 = vrot.slane %v2445_v2, 2  ;;  %v2580_v63 = vrot.slane %v2445_v2, 3  ;;  %v2628_v32 = vrot.slane %v2445_v2, 4  ;;  %v2732_v2 = vld [vmem:[%s7156_s5 + $0x158] sm:$0xff]  ;;  %v2731_v44 = vld [vmem:[%s7156_s5 + $0x150] sm:$0xff] }
 0x3ec   : > { %v2533_v19 = vsel %vm691_vm3, %v2531_v49, %v2532_v8  ;;  %v2485_v31 = vsel %vm562_vm1, %v2483_v34, %v2484_v18  ;;  %v2581_v56 = vsel %vm820_vm0, %v2579_v53, %v2580_v63  ;;  %v2629_v50 = vsel %vm949_vm2, %v2627_v62, %v2628_v32  ;;  %v2728_v18 = vld [vmem:[%s7156_s5 + $0x138] sm:$0xff]  ;;  %v2727_v8 = vld [vmem:[%s7156_s5 + $0x130] sm:$0xff]  ;;  %v2722_v53 = vld [vmem:[%s7156_s5 + $0x108] sm:$0xff] }
 0x3ed   : > { %2548 = vrot.lane.b32.xlu1 %v2533_v19, %s4726_s23  ;;  %v4649_v45 = vpack.i.bf16 %v2485_v31, %v2482_v43  ;;  %vm3540_vm0 = vcmask 982016   ;;  %s7116_s23 = scalar_lea.hbm %s7166_s15, %s3975_s26 }
 0x3ef   : > { %4650 = vrot.lane.b32.xlu0 %v4649_v45, %s4727_s30  ;;  %s4730_s30 = smov 64  }
 0x3f1   : > { %2630 = vrot.lane.b32.xlu1 %v2608_v37, %s4729_s16 }
 0x3f3   : > { %2594 = vrot.lane.b32.xlu0 %v2578_v36, %s4728_s20 }
 0x3f5   : > { %2634 = vrot.lane.b32.xlu1 %v2614_v55, %s4729_s16  ;;  %v2723_v55 = vld [vmem:[%s7156_s5 + $0x110] sm:$0xff] }
 0x3f7   : > { %2596 = vrot.lane.b32.xlu0 %v2581_v56, %s4728_s20  ;;  %s488_s20 = sand.u32 1, %s4711_s19  }
 0x3f8   : > { %s3787_s18 = sshll.u32 %s488_s20, 3 }
 0x3f9   : > { %2638 = vrot.lane.b32.xlu1 %v2620_v35, %s4729_s16  ;;  %s490_s17 = scalar_lea.vmem [#allocation2], %s3787_s18  ;;  %s4665_s18 = scalar_lea.vmem %s4664_s22, 256 }
 0x3fa   : > { %s3724_s27 = sshll.u32 %s490_s17, 4  ;;  %s3725_s27 = int_to_ptr.vmem [resolvable:$true] %s3724_s27 }
 0x3fb   : > { %2632 = vrot.lane.b32.xlu0 %v2611_v13, %s4729_s16  ;;  %s4659_s0 = scalar_lea.vmem %s3725_s27, 128  ;;  %p4666_p0 = scmp.lt.s32.totalorder %s3725_s27, %s4664_s22 }
 0x3fc   : > { %p4660_p11 = scmp.ne.s32.totalorder %s3725_s27, %s4659_s0  ;;  %p4667_p1 = scmp.lt.s32.totalorder %s4665_s18, %s4659_s0 }
 0x3fd   : > { %2642 = vrot.lane.b32.xlu1 %v2626_v52, %s4729_s16 }
 0x3fe   : > { %p4661_p12 = pnand %p4660_p11, %p4851_p5  ;;  %p4668_p2 = por %p4667_p1, %p4666_p0 }
 0x3ff   : > { %2636 = vrot.lane.b32.xlu0 %v2617_v29, %s4729_s16 }
 0x400   : > { %p4662_p13 = pneg %p4661_p12 }
 0x402   : > { %p4669_p3 = pnand %p4668_p2, %p4662_p13 }
 0x403   : > { %2640 = vrot.lane.b32.xlu0 %v2623_v40, %s4729_s16 }
 0x407   : > { %2644 = vrot.lane.b32.xlu0 %v2629_v50, %s4729_s16 }
 0x431   : > { %v4626_v57 = vpop.permute.xlu1 %4625  ;;  %v4621_v12 = vpop.permute.xlu0 %4620 }
 0x432   : > { %v4628_v24 = vunpack.i.h.bf16 %v4626_v57  ;;  %v4627_v21 = vunpack.i.l.bf16 %v4626_v57  ;;  %v4623_v28 = vunpack.i.h.bf16 %v4621_v12  ;;  %v4622_v51 = vunpack.i.l.bf16 %v4621_v12 }
 0x434   : > { %v2663_v10 = vsel %vm2072_vm10, %v4622_v51, %v4627_v21  ;;  %v2664_v5 = vsel %vm2072_vm10, %v4623_v28, %v4628_v24  ;;  %v2655_v47 = vsel %vm2654_vm12, %v6507_v4, %v4622_v51  ;;  %v2656_v11 = vsel %vm2654_vm12, %v6515_v25, %v4623_v28  ;;  %v2730_v4 = vld [vmem:[%s7156_s5 + $0x148] sm:$0xff] }
 0x435   : > { %v6665_v14 = vpop.permute.xlu1 %2584  ;;  %v6667_v9 = vpop.permute.xlu0 %2582 }
 0x436   : > { %v2672_v16 = vsel %vm2671_vm11, %v2663_v10, %v6667_v9  ;;  %v2673_v6 = vsel %vm2671_vm11, %v2664_v5, %v6665_v14 }
 0x437   : > { %2830 = vmatprep.mubr.f32.mxu0 %v2672_v16 }
 0x438   : > { %2831 = vmatmul.mubr.f32.vlgmr.msra.gmra.mxu0 %v2655_v47 }
 0x439   : > { %2835 = vmatprep.mubr.f32.mxu0 %v2673_v6  ;;  %4184 = vmatpush3.msra.mxu0 %v6564_v0  ;;  %v2729_v0 = vld [vmem:[%s7156_s5 + $0x140] sm:$0xff] }
 0x43a   : > { %4185 = vmatprep.subr.mxu0 %v2732_v2 }
 0x43b   : > { %4186 = vmatpush3.msra.mxu0 %v2732_v2 }
 0x43c   : > { %2836 = vmatmul.mubr.f32.gmra.mxu0 %v2656_v11  ;;  %4187 = vmatprep.subr.mxu0 %v2731_v44 }
 0x43d   : > { %4188 = vmatpush3.msra.mxu0 %v2731_v44 }
 0x43e   : > { %4189 = vmatprep.subr.mxu0 %v2730_v4 }
 0x43f   : > { %4190 = vmatpush3.msra.mxu0 %v2730_v4 }
 0x440   : > { %4191 = vmatprep.subr.mxu0 %v2729_v0 }
 0x441   : > { %v4636_v25 = vpop.permute.xlu1 %4635  ;;  %v4631_v49 = vpop.permute.xlu0 %4630  ;;  %4192 = vmatpush3.msra.mxu0 %v2729_v0 }
 0x442   : > { %v4638_v34 = vunpack.i.h.bf16 %v4636_v25  ;;  %v4637_v19 = vunpack.i.l.bf16 %v4636_v25  ;;  %v4633_v43 = vunpack.i.h.bf16 %v4631_v49  ;;  %v4632_v31 = vunpack.i.l.bf16 %v4631_v49  ;;  %4193 = vmatprep.subr.mxu0 %v2728_v18  ;;  %v2984_v49 = vld [vmem:[%s7158_s7] sm:$0xff] }
 0x443   : > { %4194 = vmatpush3.msra.mxu0 %v2728_v18 }
 0x444   : > { %v2665_v45 = vsel %vm2072_vm10, %v4632_v31, %v4637_v19  ;;  %4195 = vmatprep.subr.mxu0 %v2727_v8  ;;  %v2666_v37 = vsel %vm2072_vm10, %v4633_v43, %v4638_v34  ;;  %v2657_v36 = vsel %vm2654_vm12, %v6543_v58, %v4632_v31  ;;  %v2658_v58 = vsel %vm2654_vm12, %v6545_v46, %v4633_v43  ;;  %v3205_v34 = vld [vmem:[%s7159_s8 + $0x70] sm:$0xff]  ;;  %v3204_v19 = vld [vmem:[%s7159_s8 + $0x68] sm:$0xff]  ;;  %v3203_v43 = vld [vmem:[%s7159_s8 + $0x60] sm:$0xff] }
 0x445   : > { %v6701_v33 = vpop.permute.xlu1 %2588  ;;  %v6703_v48 = vpop.permute.xlu0 %2586  ;;  %4196 = vmatpush3.msra.mxu0 %v2727_v8  ;;  %v3206_v8 = vld [vmem:[%s7159_s8 + $0x78] sm:$0xff] }
 0x446   : > { %v2674_v23 = vsel %vm2671_vm11, %v2665_v45, %v6703_v48  ;;  %4197 = vmatprep.subr.mxu0 %v2726_v60  ;;  %v2675_v63 = vsel %vm2671_vm11, %v2666_v37, %v6701_v33  ;;  %4265 = vmatprep.subr.mxu1 %v3206_v8  ;;  %v3202_v31 = vld [vmem:[%s7159_s8 + $0x58] sm:$0xff]  ;;  %v3200_v45 = vld [vmem:[%s7159_s8 + $0x48] sm:$0xff]  ;;  %v3197_v37 = vld [vmem:[%s7159_s8 + $0x30] sm:$0xff] }
 0x447   : > { %2840 = vmatprep.mubr.f32.mxu0 %v2674_v23  ;;  %4198 = vmatpush3.msra.mxu0 %v2726_v60  ;;  %v3201_v60 = vld [vmem:[%s7159_s8 + $0x50] sm:$0xff] }
 0x448   : > { %2841 = vmatmul.mubr.f32.gmra.mxu0 %v2657_v36  ;;  %4199 = vmatprep.subr.mxu0 %v2725_v41 }
 0x449   : > { %2845 = vmatprep.mubr.f32.mxu0 %v2675_v63  ;;  %4200 = vmatpush3.msra.mxu0 %v2725_v41  ;;  %v3196_v41 = vld [vmem:[%s7159_s8 + $0x28] sm:$0xff] }
 0x44a   : > { %4201 = vmatprep.subr.mxu0 %v2724_v42  ;;  %4266 = vmatpush3.msra.mxu1 %v3206_v8 }
 0x44b   : > { %4202 = vmatpush3.msra.mxu0 %v2724_v42  ;;  %4267 = vmatprep.subr.mxu1 %v3205_v34 }
 0x44c   : > { %2846 = vmatmul.mubr.f32.gmra.mxu0 %v2658_v58  ;;  %4203 = vmatprep.subr.mxu0 %v2723_v55 }
 0x44d   : > { %4204 = vmatpush3.msra.mxu0 %v2723_v55  ;;  %4268 = vmatpush3.msra.mxu1 %v3205_v34 }
 0x44e   : > { %4205 = vmatprep.subr.mxu0 %v2722_v53  ;;  %4269 = vmatprep.subr.mxu1 %v3204_v19 }
 0x44f   : > { %4206 = vmatpush3.msra.mxu0 %v2722_v53  ;;  %4270 = vmatpush3.msra.mxu1 %v3204_v19 }
 0x450   : > { %4207 = vmatprep.subr.mxu0 %v2721_v59  ;;  %4271 = vmatprep.subr.mxu1 %v3203_v43 }
 0x451   : > { %v4646_v56 = vpop.permute.xlu1 %4645  ;;  %v4641_v38 = vpop.permute.xlu0 %4640  ;;  %4208 = vmatpush3.msra.mxu0 %v2721_v59  ;;  %4272 = vmatpush3.msra.mxu1 %v3203_v43 }
 0x452   : > { %v4648_v26 = vunpack.i.h.bf16 %v4646_v56  ;;  %v4647_v46 = vunpack.i.l.bf16 %v4646_v56  ;;  %v4643_v35 = vunpack.i.h.bf16 %v4641_v38  ;;  %v4642_v20 = vunpack.i.l.bf16 %v4641_v38  ;;  %4273 = vmatprep.subr.mxu1 %v3202_v31 }
 0x453   : > { %4274 = vmatpush3.msra.mxu1 %v3202_v31 }
 0x454   : > { %v2667_v3 = vsel %vm2072_vm10, %v4642_v20, %v4647_v46  ;;  %v2668_v30 = vsel %vm2072_vm10, %v4643_v35, %v4648_v26  ;;  %v2659_v1 = vsel %vm2654_vm12, %v6579_v15, %v4642_v20  ;;  %v2660_v39 = vsel %vm2654_vm12, %v6581_v61, %v4643_v35  ;;  %4275 = vmatprep.subr.mxu1 %v3201_v60 }
 0x455   : > { %v2593_v13 = vpop.permute.xlu1 %2592  ;;  %v2591_v17 = vpop.permute.xlu0 %2590  ;;  %4276 = vmatpush3.msra.mxu1 %v3201_v60  ;;  %v2985_v60 = vld [vmem:[%s7158_s7 + $0x8] sm:$0xff] }
 0x456   : > { %v2676_v52 = vsel %vm2671_vm11, %v2667_v3, %v2591_v17  ;;  %v2677_v29 = vsel %vm2671_vm11, %v2668_v30, %v2593_v13  ;;  %4277 = vmatprep.subr.mxu1 %v3200_v45 }
 0x457   : > { %2850 = vmatprep.mubr.f32.mxu0 %v2676_v52  ;;  %4278 = vmatpush3.msra.mxu1 %v3200_v45  ;;  %v2986_v45 = vld [vmem:[%s7158_s7 + $0x10] sm:$0xff] }
 0x458   : > { %2851 = vmatmul.mubr.f32.gmra.mxu0 %v2659_v1 }
 0x459   : > { %2855 = vmatprep.mubr.f32.mxu0 %v2677_v29  ;;  %v2547_v22 = vpop.permute.xlu1 %2546 }
 0x45c   : > { %2856 = vmatmul.mubr.f32.gmra.mxu0 %v2660_v39 }
 0x45f   : > { %v2549_v40 = vpop.permute.xlu1 %2548 }
 0x461   : > { %v4651_v32 = vpop.permute.xlu0 %4650 }
 0x462   : > { %v4652_v62 = vunpack.i.l.bf16 %v4651_v32  ;;  %v4653_v12 = vunpack.i.h.bf16 %v4651_v32  ;;  %v3931_v32 = vld [vmem:[%s7157_s6] ss:$0 sm:$0xff] }
 0x463   : > { %v2631_v50 = vpop.permute.xlu1 %2630 }
 0x464   : > { %v2669_v57 = vsel %vm2072_vm10, %v4652_v62, %v2547_v22  ;;  %v2661_v15 = vsel %vm2654_vm12, %v6601_v7, %v4652_v62  ;;  %v2670_v61 = vsel %vm2072_vm10, %v4653_v12, %v2549_v40  ;;  %v2662_v5 = vsel %vm2654_vm12, %v6613_v27, %v4653_v12 }
 0x465   : > { %v2595_v24 = vpop.permute.xlu0 %2594  ;;  %v2681_v16 = vsel %vm2680_vm13, %v6667_v9, %v2631_v50 }
 0x466   : > { %v2678_v21 = vsel %vm2671_vm11, %v2669_v57, %v2595_v24 }
 0x467   : > { %2860 = vmatprep.mubr.f32.mxu0 %v2678_v21  ;;  %v2635_v28 = vpop.permute.xlu1 %2634 }
 0x468   : > { %2861 = vmatmul.mubr.f32.gmra.mxu0 %v2661_v15  ;;  %v2683_v6 = vsel %vm2680_vm13, %v6703_v48, %v2635_v28  ;;  %v3198_v48 = vld [vmem:[%s7159_s8 + $0x38] sm:$0xff] }
 0x469   : > { %v2597_v51 = vpop.permute.xlu0 %2596 }
 0x46a   : > { %v2679_v10 = vsel %vm2671_vm11, %v2670_v61, %v2597_v51 }
 0x46b   : > { %2865 = vmatprep.mubr.f32.mxu0 %v2679_v10  ;;  %v2639_v2 = vpop.permute.xlu1 %2638 }
 0x46c   : > { %2866 = vmatmul.mubr.f32.gmra.mxu0 %v2662_v5  ;;  %v2685_v9 = vsel %vm2680_vm13, %v2591_v17, %v2639_v2 }
 0x46d   : > { %v2633_v47 = vpop.permute.xlu0 %2632  ;;  %4209 = vmatprep.mubr.msk.f32.mxu0 %vm2741_vm14, %v2681_v16 }
 0x46e   : > { %v2682_v7 = vsel %vm2680_vm13, %v6665_v14, %v2633_v47 }
 0x46f   : > { %v2643_v11 = vpop.permute.xlu1 %2642 }
 0x470   : > { %4210 = vmatmul.mubr.msk.f32.vlgmr.msra.gmra.mxu0 %vm2741_vm14, %v2682_v7  ;;  %v2687_v0 = vsel %vm2680_vm13, %v2595_v24, %v2643_v11 }
 0x471   : > { %v2637_v44 = vpop.permute.xlu0 %2636  ;;  %4212 = vmatprep.mubr.msk.f32.mxu0 %vm2741_vm14, %v2683_v6 }
 0x472   : > { %v2684_v27 = vsel %vm2680_vm13, %v6701_v33, %v2637_v44  ;;  %v3199_v33 = vld [vmem:[%s7159_s8 + $0x40] sm:$0xff] }
 0x473   : > { %4279 = vmatprep.subr.mxu1 %v3199_v33 }
 0x474   : > { %4213 = vmatmul.mubr.msk.f32.gmra.mxu0 %vm2741_vm14, %v2684_v27  ;;  %4280 = vmatpush3.msra.mxu1 %v3199_v33  ;;  %v2987_v33 = vld [vmem:[%s7158_s7 + $0x18] sm:$0xff] }
 0x475   : > { %v2641_v4 = vpop.permute.xlu0 %2640  ;;  %4215 = vmatprep.mubr.msk.f32.mxu0 %vm2741_vm14, %v2685_v9  ;;  %4281 = vmatprep.subr.mxu1 %v3198_v48 }
 0x476   : > { %v2686_v14 = vsel %vm2680_vm13, %v2593_v13, %v2641_v4  ;;  %4282 = vmatpush3.msra.mxu1 %v3198_v48  ;;  %v3944_v48 = vld [vmem:[%s7158_s7 + $0x20] sm:$0xff] }
 0x477   : > { %4283 = vmatprep.subr.mxu1 %v3197_v37 }
 0x478   : > { %4216 = vmatmul.mubr.msk.f32.gmra.mxu0 %vm2741_vm14, %v2686_v14  ;;  %4284 = vmatpush3.msra.mxu1 %v3197_v37  ;;  %v3945_v37 = vld [vmem:[%s7158_s7 + $0x28] sm:$0xff] }
 0x479   : > { %v2645_v18 = vpop.permute.xlu0 %2644  ;;  %4218 = vmatprep.mubr.msk.f32.mxu0 %vm2741_vm14, %v2687_v0  ;;  %4285 = vmatprep.subr.mxu1 %v3196_v41 }
 0x47a   : > { %v2688_v25 = vsel %vm2680_vm13, %v2597_v51, %v2645_v18  ;;  %4286 = vmatpush3.msra.mxu1 %v3196_v41  ;;  %v3967_v41 = vld [vmem:[%s7159_s8 + $0xf8] sm:$0xff] }
 0x47c   : > { %4219 = vmatmul.mubr.msk.f32.gmra.mxu0 %vm2741_vm14, %v2688_v25 }
 0x47d   : > { %4237 = vmatprep.mubr.msk.f32.mxu0 %vm1570_vm9, %v2984_v49 }
 0x4f8   : > { %v4011_v23 = vpop.f32.mrf.mxu0 }
 0x4fa   : > { %v4012_v36 = vpop.f32.mrf.mxu0 }
 0x4fb   : > { %v4013_v27 = vadd.f32 %v4012_v36, %v4011_v23  ;;  %v3946_v23 = vld [vmem:[%s7158_s7 + $0x30] sm:$0xff] }
 0x4fc   : > { %v4014_v42 = vpop.f32.mrf.mxu0  ;;  %v3966_v36 = vld [vmem:[%s7159_s8 + $0xf0] sm:$0xff] }
 0x4fd   : > { %v2833_v49 = vadd.f32 %v4013_v27, %v3931_v32  ;;  %v3419_v27 = vld [vmem:[%s7160_s9 + $0x58] sm:$0xff] }
 0x4fe   : > { %v4015_v63 = vpop.f32.mrf.mxu0 }
 0x4ff   : > { %v4016_v7 = vadd.f32 %v4015_v63, %v4014_v42  ;;  %v3947_v42 = vld [vmem:[%s7158_s7 + $0x38] sm:$0xff]  ;;  %v3965_v63 = vld [vmem:[%s7159_s8 + $0xe8] sm:$0xff] }
 0x501   : > { %v2838_v14 = vadd.f32 %v4016_v7, %v3931_v32  ;;  %v3421_v7 = vld [vmem:[%s7160_s9 + $0x68] sm:$0xff] }
 0x508   : > { %v4017_v55 = vpop.f32.mrf.mxu0 }
 0x50a   : > { %v4018_v58 = vpop.f32.mrf.mxu0 }
 0x50b   : > { %v4019_v51 = vadd.f32 %v4018_v58, %v4017_v55  ;;  %v3964_v55 = vld [vmem:[%s7159_s8 + $0xe0] sm:$0xff]  ;;  %v3963_v58 = vld [vmem:[%s7159_s8 + $0xd8] sm:$0xff] }
 0x50c   : > { %v4020_v53 = vpop.f32.mrf.mxu0 }
 0x50d   : > { %v2843_v11 = vadd.f32 %v4019_v51, %v3931_v32 }
 0x50e   : > { %v4021_v59 = vpop.f32.mrf.mxu0 }
 0x50f   : > { %v4022_v24 = vadd.f32 %v4021_v59, %v4020_v53  ;;  %v3962_v53 = vld [vmem:[%s7159_s8 + $0xd0] sm:$0xff]  ;;  %v3195_v59 = vld [vmem:[%s7159_s8 + $0x20] sm:$0xff] }
 0x510   : > { %4287 = vmatprep.subr.mxu1 %v3195_v59 }
 0x511   : > { %v2848_v2 = vadd.f32 %v4022_v24, %v3931_v32  ;;  %4288 = vmatpush3.msra.mxu1 %v3195_v59 }
 0x518   : > { %v4023_v56 = vpop.f32.mrf.mxu0 }
 0x51a   : > { %v4024_v38 = vpop.f32.mrf.mxu0 }
 0x51b   : > { %v4025_v50 = vadd.f32 %v4024_v38, %v4023_v56  ;;  %v3961_v56 = vld [vmem:[%s7159_s8 + $0xc8] sm:$0xff]  ;;  %v3960_v38 = vld [vmem:[%s7159_s8 + $0xc0] sm:$0xff] }
 0x51c   : > { %v4026_v26 = vpop.f32.mrf.mxu0 }
 0x51d   : > { %v2853_v5 = vadd.f32 %v4025_v50, %v3931_v32 }
 0x51e   : > { %v4027_v46 = vpop.f32.mrf.mxu0 }
 0x51f   : > { %v4028_v39 = vadd.f32 %v4027_v46, %v4026_v26  ;;  %v3194_v26 = vld [vmem:[%s7159_s8 + $0x18] sm:$0xff] }
 0x520   : > { %v3959_v46 = vld [vmem:[%s7159_s8 + $0xb8] sm:$0xff]  ;;  %4289 = vmatprep.subr.mxu1 %v3194_v26 }
 0x521   : > { %v2858_v21 = vadd.f32 %v4028_v39, %v3931_v32  ;;  %4290 = vmatpush3.msra.mxu1 %v3194_v26 }
 0x528   : > { %v4029_v35 = vpop.f32.mrf.mxu0 }
 0x52a   : > { %v4030_v20 = vpop.f32.mrf.mxu0 }
 0x52b   : > { %v4031_v40 = vadd.f32 %v4030_v20, %v4029_v35  ;;  %v3193_v35 = vld [vmem:[%s7159_s8 + $0x10] sm:$0xff] }
 0x52c   : > { %v4032_v3 = vpop.f32.mrf.mxu0  ;;  %v3958_v20 = vld [vmem:[%s7159_s8 + $0xb0] sm:$0xff]  ;;  %4291 = vmatprep.subr.mxu1 %v3193_v35 }
 0x52d   : > { %v2863_v28 = vadd.f32 %v4031_v40, %v3931_v32  ;;  %4292 = vmatpush3.msra.mxu1 %v3193_v35 }
 0x52e   : > { %v4033_v13 = vpop.f32.mrf.mxu0 }
 0x52f   : > { %v4034_v29 = vadd.f32 %v4033_v13, %v4032_v3  ;;  %v3192_v3 = vld [vmem:[%s7159_s8 + $0x8] sm:$0xff] }
 0x530   : > { %v4211_v17 = vpop.f32.mrf.mxu0  ;;  %v3957_v13 = vld [vmem:[%s7159_s8 + $0xa8] sm:$0xff]  ;;  %4293 = vmatprep.subr.mxu1 %v3192_v3 }
 0x531   : > { %v2868_v57 = vadd.f32 %v4034_v29, %v3931_v32  ;;  %v2943_v25 = vadd.f32 %v4211_v17, %v2838_v14  ;;  %v3956_v17 = vld [vmem:[%s7159_s8 + $0xa0] sm:$0xff]  ;;  %4294 = vmatpush3.msra.mxu1 %v3192_v3  ;;  %v3417_v14 = vld [vmem:[%s7160_s9 + $0x48] sm:$0xff] }
 0x532   : > { %v2937_v30 = vpop.f32.mrf.mxu0  ;;  %v3191_v29 = vld [vmem:[%s7159_s8] sm:$0xff] }
 0x533   : > { %v2938_v34 = vadd.f32 %v2937_v30, %v2833_v49  ;;  %v2977_v43 = vmax.f32 %v2943_v25, 0.0  ;;  %v3955_v30 = vld [vmem:[%s7159_s8 + $0x98] sm:$0xff]  ;;  %4295 = vmatprep.subr.mxu1 %v3191_v29 }
 0x534   : > { %v4214_v52 = vpop.f32.mrf.mxu0  ;;  %4296 = vmatpush3.msra.mxu1 %v3191_v29  ;;  %v3431_v25 = vld [vmem:[%s7160_s9 + $0xb8] sm:$0xff] }
 0x535   : > { %v2953_v9 = vadd.f32 %v4214_v52, %v2848_v2  ;;  %v2976_v31 = vmax.f32 %v2938_v34, 0.0  ;;  %v3954_v52 = vld [vmem:[%s7159_s8 + $0x90] sm:$0xff]  ;;  %v3436_v2 = vld [vmem:[%s7160_s9 + $0xe0] sm:$0xff]  ;;  %v3415_v49 = vld [vmem:[%s7160_s9 + $0x38] sm:$0xff] }
 0x536   : > { %v2947_v1 = vpop.f32.mrf.mxu0  ;;  %v3414_v34 = vld [vmem:[%s7160_s9 + $0x30] sm:$0xff]  ;;  %v3525_v29 = vld [vmem:[%s7162_s11 + $0x38] sm:$0xff] }
 0x537   : > { %v2948_v0 = vadd.f32 %v2947_v1, %v2843_v11  ;;  %v2979_v8 = vmax.f32 %v2953_v9, 0.0  ;;  %v3953_v1 = vld [vmem:[%s7159_s8 + $0x88] sm:$0xff]  ;;  %v3434_v9 = vld [vmem:[%s7160_s9 + $0xd0] sm:$0xff] }
 0x538   : > { %v4217_v22 = vpop.f32.mrf.mxu0  ;;  %v3418_v11 = vld [vmem:[%s7160_s9 + $0x50] sm:$0xff] }
 0x539   : > { %v2963_v10 = vadd.f32 %v4217_v22, %v2858_v21  ;;  %v2978_v19 = vmax.f32 %v2948_v0, 0.0  ;;  %v3952_v22 = vld [vmem:[%s7159_s8 + $0x80] sm:$0xff] }
 0x53a   : > { %v2957_v62 = vpop.f32.mrf.mxu0  ;;  %v3432_v0 = vld [vmem:[%s7160_s9 + $0xc0] sm:$0xff] }
 0x53b   : > { %v2958_v6 = vadd.f32 %v2957_v62, %v2853_v5  ;;  %v2981_v4 = vmax.f32 %v2963_v10, 0.0  ;;  %v3423_v10 = vld [vmem:[%s7160_s9 + $0x78] sm:$0xff]  ;;  %v3438_v5 = vld [vmem:[%s7160_s9 + $0xf0] sm:$0xff] }
 0x53c   : > { %v4220_v12 = vpop.f32.mrf.mxu0 }
 0x53d   : > { %v2973_v15 = vadd.f32 %v4220_v12, %v2868_v57  ;;  %v2980_v18 = vmax.f32 %v2958_v6, 0.0  ;;  %v3420_v6 = vld [vmem:[%s7160_s9 + $0x60] sm:$0xff] }
 0x53e   : > { %v2967_v61 = vpop.f32.mrf.mxu0 }
 0x53f   : > { %v2983_v16 = vmax.f32 %v2973_v15, 0.0  ;;  %v2968_v47 = vadd.f32 %v2967_v61, %v2863_v28  ;;  %v3439_v61 = vld [vmem:[%s7160_s9 + $0xf8] sm:$0xff] }
 0x540   : > { %4120 = vmatprep.subr.mxu1 %v3439_v61  ;;  %v3519_v61 = vld [vmem:[%s7162_s11 + $0x8] sm:$0xff] }
 0x541   : > { %v2982_v44 = vmax.f32 %v2968_v47, 0.0  ;;  %4221 = vmatprep.subr.mxu0 %v2983_v16  ;;  %v3437_v47 = vld [vmem:[%s7160_s9 + $0xe8] sm:$0xff] }
 0x542   : > { %4222 = vmatpush3.msra.mxu0 %v2983_v16 }
 0x543   : > { %4223 = vmatprep.subr.mxu0 %v2982_v44 }
 0x544   : > { %4224 = vmatpush3.msra.mxu0 %v2982_v44 }
 0x545   : > { %4225 = vmatprep.subr.mxu0 %v2981_v4 }
 0x546   : > { %4226 = vmatpush3.msra.mxu0 %v2981_v4 }
 0x547   : > { %4227 = vmatprep.subr.mxu0 %v2980_v18 }
 0x548   : > { %4228 = vmatpush3.msra.mxu0 %v2980_v18 }
 0x549   : > { %4229 = vmatprep.subr.mxu0 %v2979_v8 }
 0x54a   : > { %4230 = vmatpush3.msra.mxu0 %v2979_v8 }
 0x54b   : > { %4231 = vmatprep.subr.mxu0 %v2978_v19 }
 0x54c   : > { %4232 = vmatpush3.msra.mxu0 %v2978_v19 }
 0x54d   : > { %4233 = vmatprep.subr.mxu0 %v2977_v43 }
 0x54e   : > { %4234 = vmatpush3.msra.mxu0 %v2977_v43 }
 0x54f   : > { %4235 = vmatprep.subr.mxu0 %v2976_v31 }
 0x550   : > { %4236 = vmatpush3.msra.mxu0 %v2976_v31 }
 0x551   : > { %4238 = vmatmul.mubr.msk.f32.vlgmr.msra.gmra.mxu0 %vm1570_vm9, %v2985_v60  ;;  %4243 = vmatprep.subr.mxu0 %v2983_v16  ;;  %v3412_v60 = vld [vmem:[%s7160_s9 + $0x20] sm:$0xff] }
 0x552   : > { %4244 = vmatpush3.msra.mxu0 %v2983_v16  ;;  %4240 = vmatprep.mubr.msk.f32.mxu0 %vm1570_vm9, %v2986_v45  ;;  %v3422_v16 = vld [vmem:[%s7160_s9 + $0x70] sm:$0xff]  ;;  %v3427_v45 = vld [vmem:[%s7160_s9 + $0x98] sm:$0xff] }
 0x553   : > { %4245 = vmatprep.subr.mxu0 %v2982_v44 }
 0x554   : > { %4246 = vmatpush3.msra.mxu0 %v2982_v44  ;;  %v3435_v44 = vld [vmem:[%s7160_s9 + $0xd8] sm:$0xff] }
 0x555   : > { %4247 = vmatprep.subr.mxu0 %v2981_v4  ;;  %4241 = vmatmul.mubr.msk.f32.gmra.mxu0 %vm1570_vm9, %v2987_v33  ;;  %v3411_v33 = vld [vmem:[%s7160_s9 + $0x18] sm:$0xff] }
 0x556   : > { %4248 = vmatpush3.msra.mxu0 %v2981_v4  ;;  %4259 = vmatprep.mubr.msk.f32.mxu0 %vm1570_vm9, %v3944_v48  ;;  %v3433_v4 = vld [vmem:[%s7160_s9 + $0xc8] sm:$0xff]  ;;  %v3426_v48 = vld [vmem:[%s7160_s9 + $0x90] sm:$0xff] }
 0x557   : > { %4249 = vmatprep.subr.mxu0 %v2980_v18 }
 0x558   : > { %4250 = vmatpush3.msra.mxu0 %v2980_v18  ;;  %v3416_v18 = vld [vmem:[%s7160_s9 + $0x40] sm:$0xff] }
 0x559   : > { %4251 = vmatprep.subr.mxu0 %v2979_v8 }
 0x55a   : > { %4252 = vmatpush3.msra.mxu0 %v2979_v8  ;;  %v3430_v8 = vld [vmem:[%s7160_s9 + $0xb0] sm:$0xff] }
 0x55b   : > { %4253 = vmatprep.subr.mxu0 %v2978_v19 }
 0x55c   : > { %4254 = vmatpush3.msra.mxu0 %v2978_v19  ;;  %v3429_v19 = vld [vmem:[%s7160_s9 + $0xa8] sm:$0xff] }
 0x55d   : > { %4255 = vmatprep.subr.mxu0 %v2977_v43 }
 0x55e   : > { %4256 = vmatpush3.msra.mxu0 %v2977_v43  ;;  %v3413_v43 = vld [vmem:[%s7160_s9 + $0x28] sm:$0xff] }
 0x55f   : > { %4257 = vmatprep.subr.mxu0 %v2976_v31 }
 0x560   : > { %4258 = vmatpush3.msra.mxu0 %v2976_v31  ;;  %v3428_v31 = vld [vmem:[%s7160_s9 + $0xa0] sm:$0xff] }
 0x561   : > { %4260 = vmatmul.mubr.msk.f32.vlgmr.msra.gmra.mxu0 %vm1570_vm9, %v3945_v37  ;;  %4303 = vmatprep.subr.mxu0 %v3967_v41  ;;  %v3410_v37 = vld [vmem:[%s7160_s9 + $0x10] sm:$0xff] }
 0x562   : > { %4262 = vmatprep.mubr.msk.f32.mxu0 %vm1570_vm9, %v3946_v23  ;;  %4304 = vmatpush3.msra.mxu0 %v3967_v41  ;;  %v3425_v41 = vld [vmem:[%s7160_s9 + $0x88] sm:$0xff] }
 0x563   : > { %4305 = vmatprep.subr.mxu0 %v3966_v36  ;;  %v3409_v23 = vld [vmem:[%s7160_s9 + $0x8] sm:$0xff] }
 0x564   : > { %4306 = vmatpush3.msra.mxu0 %v3966_v36  ;;  %v3424_v36 = vld [vmem:[%s7160_s9 + $0x80] sm:$0xff] }
 0x565   : > { %4263 = vmatmul.mubr.msk.f32.gmra.mxu0 %vm1570_vm9, %v3947_v42  ;;  %4307 = vmatprep.subr.mxu0 %v3965_v63  ;;  %v3408_v42 = vld [vmem:[%s7160_s9] sm:$0xff] }
 0x566   : > { %4308 = vmatpush3.msra.mxu0 %v3965_v63 }
 0x567   : > { %4309 = vmatprep.subr.mxu0 %v3964_v55 }
 0x568   : > { %4310 = vmatpush3.msra.mxu0 %v3964_v55 }
 0x569   : > { %4311 = vmatprep.subr.mxu0 %v3963_v58 }
 0x56a   : > { %4312 = vmatpush3.msra.mxu0 %v3963_v58  ;;  %v3532_v58 = vld [vmem:[%s7162_s11 + $0x70] sm:$0xff] }
 0x56b   : > { %4313 = vmatprep.subr.mxu0 %v3962_v53 }
 0x56c   : > { %4314 = vmatpush3.msra.mxu0 %v3962_v53  ;;  %v3531_v53 = vld [vmem:[%s7162_s11 + $0x68] sm:$0xff] }
 0x56d   : > { %4315 = vmatprep.subr.mxu0 %v3961_v56 }
 0x56e   : > { %4316 = vmatpush3.msra.mxu0 %v3961_v56 }
 0x56f   : > { %4317 = vmatprep.subr.mxu0 %v3960_v38 }
 0x570   : > { %4318 = vmatpush3.msra.mxu0 %v3960_v38  ;;  %v3530_v38 = vld [vmem:[%s7162_s11 + $0x60] sm:$0xff] }
 0x571   : > { %4319 = vmatprep.subr.mxu0 %v3959_v46 }
 0x572   : > { %4320 = vmatpush3.msra.mxu0 %v3959_v46 }
 0x573   : > { %4321 = vmatprep.subr.mxu0 %v3958_v20 }
 0x574   : > { %4322 = vmatpush3.msra.mxu0 %v3958_v20  ;;  %v3529_v20 = vld [vmem:[%s7162_s11 + $0x58] sm:$0xff] }
 0x575   : > { %4323 = vmatprep.subr.mxu0 %v3957_v13 }
 0x576   : > { %4324 = vmatpush3.msra.mxu0 %v3957_v13 }
 0x577   : > { %4325 = vmatprep.subr.mxu0 %v3956_v17 }
 0x578   : > { %4326 = vmatpush3.msra.mxu0 %v3956_v17  ;;  %v3528_v17 = vld [vmem:[%s7162_s11 + $0x50] sm:$0xff] }
 0x579   : > { %4327 = vmatprep.subr.mxu0 %v3955_v30 }
 0x57a   : > { %4328 = vmatpush3.msra.mxu0 %v3955_v30 }
 0x57b   : > { %4329 = vmatprep.subr.mxu0 %v3954_v52 }
 0x57c   : > { %4330 = vmatpush3.msra.mxu0 %v3954_v52  ;;  %v3527_v52 = vld [vmem:[%s7162_s11 + $0x48] sm:$0xff] }
 0x57d   : > { %4331 = vmatprep.subr.mxu0 %v3953_v1 }
 0x57e   : > { %4332 = vmatpush3.msra.mxu0 %v3953_v1  ;;  %v3526_v1 = vld [vmem:[%s7162_s11 + $0x40] sm:$0xff] }
 0x57f   : > { %4333 = vmatprep.subr.mxu0 %v3952_v22 }
 0x580   : > { %4334 = vmatpush3.msra.mxu0 %v3952_v22  ;;  %v3524_v22 = vld [vmem:[%s7162_s11 + $0x30] sm:$0xff] }
 0x581   : > { %4341 = vmatprep.subr.mxu0 %v4725_v54 }
 0x611   : > { %v4239_v39 = vpop.f32.mrf.mxu0 }
 0x613   : > { %v3066_v40 = vpop.f32.mrf.mxu0 }
 0x615   : > { %v4242_v32 = vpop.f32.mrf.mxu0 }
 0x617   : > { %v3076_v62 = vpop.f32.mrf.mxu0 }
 0x621   : > { %v4261_v50 = vpop.f32.mrf.mxu0 }
 0x622   : > { %v3188_v24 = vmax.f32 %v4239_v39, %v4261_v50  ;;  %v3523_v39 = vld [vmem:[%s7162_s11 + $0x28] sm:$0xff] }
 0x623   : > { %v3168_v57 = vpop.f32.mrf.mxu0 }
 0x624   : > { %v3187_v12 = vmax.f32 %v3066_v40, %v3168_v57 }
 0x625   : > { %v4264_v21 = vpop.f32.mrf.mxu0 }
 0x626   : > { %4297 = vmatprep.mubr.f32.mxu1 %v3187_v12  ;;  %4335 = vmatprep.mubr.f32.mxu0 %v3187_v12  ;;  %v3190_v51 = vmax.f32 %v4242_v32, %v4264_v21 }
 0x627   : > { %v3178_v15 = vpop.f32.mrf.mxu0  ;;  %4298 = vmatmul.mubr.f32.vlgmr.msra.gmra.mxu1 %v3188_v24  ;;  %4336 = vmatmul.mubr.f32.vlgmr.msra.gmra.mxu0 %v3188_v24 }
 0x628   : > { %v3189_v28 = vmax.f32 %v3076_v62, %v3178_v15  ;;  %4121 = vmatpush3.msra.mxu1 %v3423_v10  ;;  %4342 = vmatpush3.msra.mxu0 %v3532_v58  ;;  %v3522_v15 = vld [vmem:[%s7162_s11 + $0x20] sm:$0xff] }
 0x629   : > { %4122 = vmatprep.subr.mxu1 %v3438_v5  ;;  %4343 = vmatprep.subr.mxu0 %v4725_v54  ;;  %v3518_v10 = vld [vmem:[%s7162_s11] sm:$0xff]  ;;  %v3625_v5 = vld [vmem:[%s7164_s13 + $0x50] sm:$0xf] }
 0x62a   : > { %4300 = vmatprep.mubr.f32.mxu1 %v3189_v28  ;;  %4338 = vmatprep.mubr.f32.mxu0 %v3189_v28  ;;  %v3521_v28 = vld [vmem:[%s7162_s11 + $0x18] sm:$0xff] }
 0x62b   : > { %4301 = vmatmul.mubr.f32.gmra.mxu1 %v3190_v51  ;;  %4339 = vmatmul.mubr.f32.gmra.mxu0 %v3190_v51  ;;  %v3520_v51 = vld [vmem:[%s7162_s11 + $0x10] sm:$0xff] }
 0x62c   : > { %4123 = vmatpush3.msra.mxu1 %v3422_v16  ;;  %4344 = vmatpush3.msra.mxu0 %v3531_v53  ;;  %v3624_v16 = vld [vmem:[%s7164_s13 + $0x48] sm:$0xff] }
 0x62d   : > { %4124 = vmatprep.subr.mxu1 %v3437_v47  ;;  %4345 = vmatprep.subr.mxu0 %v4725_v54  ;;  %v3623_v47 = vld [vmem:[%s7164_s13 + $0x40] sm:$0xff] }
 0x62e   : > { %4125 = vmatpush3.msra.mxu1 %v3421_v7  ;;  %4346 = vmatpush3.msra.mxu0 %v3530_v38  ;;  %v3622_v7 = vld [vmem:[%s7164_s13 + $0x38] sm:$0xff] }
 0x62f   : > { %4126 = vmatprep.subr.mxu1 %v3436_v2  ;;  %4347 = vmatprep.subr.mxu0 %v4725_v54  ;;  %v3621_v2 = vld [vmem:[%s7164_s13 + $0x30] sm:$0xff] }
 0x630   : > { %4127 = vmatpush3.msra.mxu1 %v3420_v6  ;;  %4348 = vmatpush3.msra.mxu0 %v3529_v20  ;;  %v3620_v6 = vld [vmem:[%s7164_s13 + $0x28] sm:$0xff] }
 0x631   : > { %4128 = vmatprep.subr.mxu1 %v3435_v44  ;;  %4349 = vmatprep.subr.mxu0 %v4725_v54  ;;  %v3619_v44 = vld [vmem:[%s7164_s13 + $0x20] sm:$0xff] }
 0x632   : > { %4129 = vmatpush3.msra.mxu1 %v3419_v27  ;;  %4350 = vmatpush3.msra.mxu0 %v3528_v17  ;;  %v3618_v27 = vld [vmem:[%s7164_s13 + $0x18] sm:$0xff] }
 0x633   : > { %4130 = vmatprep.subr.mxu1 %v3434_v9  ;;  %4351 = vmatprep.subr.mxu0 %v4725_v54 }
 0x634   : > { %4131 = vmatpush3.msra.mxu1 %v3418_v11  ;;  %4352 = vmatpush3.msra.mxu0 %v3527_v52  ;;  %v3968_v11 = vld [vmem:[%s7161_s10] ss:$0 sm:$0xff] }
 0x635   : > { %4132 = vmatprep.subr.mxu1 %v3433_v4  ;;  %4353 = vmatprep.subr.mxu0 %v4725_v54 }
 0x636   : > { %4133 = vmatpush3.msra.mxu1 %v3417_v14  ;;  %4354 = vmatpush3.msra.mxu0 %v3526_v1 }
 0x637   : > { %4134 = vmatprep.subr.mxu1 %v3432_v0  ;;  %4355 = vmatprep.subr.mxu0 %v4725_v54 }
 0x638   : > { %4135 = vmatpush3.msra.mxu1 %v3416_v18  ;;  %4356 = vmatpush3.msra.mxu0 %v3525_v29 }
 0x639   : > { %4136 = vmatprep.subr.mxu1 %v3431_v25  ;;  %4357 = vmatprep.subr.mxu0 %v4725_v54  ;;  %v3617_v25 = vld [vmem:[%s7164_s13 + $0x10] sm:$0xff] }
 0x63a   : > { %4137 = vmatpush3.msra.mxu1 %v3415_v49  ;;  %4358 = vmatpush3.msra.mxu0 %v3524_v22  ;;  %v3616_v49 = vld [vmem:[%s7164_s13 + $0x8] sm:$0xff] }
 0x63b   : > { %4138 = vmatprep.subr.mxu1 %v3430_v8  ;;  %4359 = vmatprep.subr.mxu0 %v4725_v54  ;;  %v3615_v8 = vld [vmem:[%s7164_s13] sm:$0xff] }
 0x63c   : > { %4139 = vmatpush3.msra.mxu1 %v3414_v34  ;;  %4360 = vmatpush3.msra.mxu0 %v3523_v39  ;;  %v3969_v34 = vld [vmem:[%s7163_s12] ss:$0 sm:$0xff] }
 0x63d   : > { %4140 = vmatprep.subr.mxu1 %v3429_v19  ;;  %4361 = vmatprep.subr.mxu0 %v4725_v54 }
 0x63e   : > { %4141 = vmatpush3.msra.mxu1 %v3413_v43  ;;  %4362 = vmatpush3.msra.mxu0 %v3522_v15 }
 0x63f   : > { %4142 = vmatprep.subr.mxu1 %v3428_v31  ;;  %4363 = vmatprep.subr.mxu0 %v4725_v54 }
 0x640   : > { %4143 = vmatpush3.msra.mxu1 %v3412_v60  ;;  %4364 = vmatpush3.msra.mxu0 %v3521_v28 }
 0x641   : > { %4144 = vmatprep.subr.mxu1 %v3427_v45  ;;  %4365 = vmatprep.subr.mxu0 %v4725_v54  ;;  %v3971_v45 = vld [vmem:[%s7165_s14] ss:$0 sm:$0xff] }
 0x642   : > { %4145 = vmatpush3.msra.mxu1 %v3411_v33  ;;  %4366 = vmatpush3.msra.mxu0 %v3520_v51 }
 0x643   : > { %4146 = vmatprep.subr.mxu1 %v3426_v48  ;;  %4367 = vmatprep.subr.mxu0 %v4725_v54 }
 0x644   : > { %4147 = vmatpush3.msra.mxu1 %v3410_v37  ;;  %4368 = vmatpush3.msra.mxu0 %v3519_v61 }
 0x645   : > { %4148 = vmatprep.subr.mxu1 %v3425_v41  ;;  %4369 = vmatprep.subr.mxu0 %v4725_v54 }
 0x646   : > { %4149 = vmatpush3.msra.mxu1 %v3409_v23  ;;  %4371 = vmatprep.mubr.msk.f32.mxu0 %vm4731_vm15, %v4725_v54 }
 0x647   : > { %4150 = vmatprep.subr.mxu1 %v3424_v36  ;;  %4370 = vmatpush3.msra.mxu0 %v3518_v10 }
 0x648   : > { %4151 = vmatpush3.msra.mxu1 %v3408_v42 }
 0x649   : > { %4374 = vmatprep.subr.mxu1 %v4725_v54 }
 0x6e7   : > { %v4299_v63 = vpop.f32.mrf.mxu1  ;;  %v4337_v55 = vpop.f32.mrf.mxu0 }
 0x6e8   : > { %v3395_v3 = vmax.f32 %v4299_v63, %v4337_v55 }
 0x6e9   : > { %v3273_v59 = vpop.f32.mrf.mxu1  ;;  %v3375_v56 = vpop.f32.mrf.mxu0 }
 0x6ea   : > { %v3394_v26 = vmax.f32 %v3273_v59, %v3375_v56 }
 0x6eb   : > { %v4302_v46 = vpop.f32.mrf.mxu1  ;;  %v4340_v35 = vpop.f32.mrf.mxu0 }
 0x6ec   : > { %v3397_v13 = vmax.f32 %v4302_v46, %v4340_v35 }
 0x6ed   : > { %v3283_v40 = vpop.f32.mrf.mxu1  ;;  %v3385_v32 = vpop.f32.mrf.mxu0 }
 0x6ee   : > { %v4654_v30 = vpack.i.bf16 %v3395_v3, %v3397_v13  ;;  %v3396_v50 = vmax.f32 %v3283_v40, %v3385_v32 }
 0x6f0   : > { %4655 = vrot.lane.b32.xlu1 %v4654_v30, %s4730_s30  ;;  %s3711_s30 = scalar_lea.sflag [#allocation3], %s488_s20 }
 0x762   : > { %v4656_v62 = vpop.permute.xlu1 %4655 }
 0x763   : > { %v4658_v57 = vunpack.i.h.bf16 %v4656_v62  ;;  %v4657_v12 = vunpack.i.l.bf16 %v4656_v62 }
 0x765   : > { %v3406_v24 = vsel %vm1570_vm9, %v3394_v26, %v4658_v57  ;;  %v3407_v21 = vsel %vm1570_vm9, %v3396_v50, %v4657_v12 }
 0x766   : > { %3511 = vmatprep.mubr.f32.mxu1 %v3407_v21 }
 0x767   : > { %3512 = vmatmul.mubr.f32.vlgmr.msra.gmra.mxu1 %v3406_v24 }
 0x768   : > { %4396 = vmatprep.mubr.msk.f32.mxu1 %vm4731_vm15, %v4725_v54  ;;  %4375 = vmatpush3.msk.msra.mxu1 %vm949_vm2, %v3625_v5 }
 0x769   : > { %4376 = vmatprep.subr.mxu1 %v4725_v54 }
 0x76a   : > { %4377 = vmatpush3.msra.mxu1 %v3624_v16 }
 0x76b   : > { %4378 = vmatprep.subr.mxu1 %v4725_v54 }
 0x76c   : > { %4379 = vmatpush3.msra.mxu1 %v3623_v47 }
 0x76d   : > { %4380 = vmatprep.subr.mxu1 %v4725_v54 }
 0x76e   : > { %4381 = vmatpush3.msra.mxu1 %v3622_v7 }
 0x76f   : > { %4382 = vmatprep.subr.mxu1 %v4725_v54 }
 0x770   : > { %4383 = vmatpush3.msra.mxu1 %v3621_v2 }
 0x771   : > { %4384 = vmatprep.subr.mxu1 %v4725_v54 }
 0x772   : > { %4385 = vmatpush3.msra.mxu1 %v3620_v6 }
 0x773   : > { %4386 = vmatprep.subr.mxu1 %v4725_v54 }
 0x774   : > { %4387 = vmatpush3.msra.mxu1 %v3619_v44 }
 0x775   : > { %4388 = vmatprep.subr.mxu1 %v4725_v54 }
 0x776   : > { %4389 = vmatpush3.msra.mxu1 %v3618_v27 }
 0x777   : > { %4390 = vmatprep.subr.mxu1 %v4725_v54 }
 0x778   : > { %4391 = vmatpush3.msra.mxu1 %v3617_v25 }
 0x779   : > { %4392 = vmatprep.subr.mxu1 %v4725_v54 }
 0x77a   : > { %4393 = vmatpush3.msra.mxu1 %v3616_v49 }
 0x77b   : > { %4394 = vmatprep.subr.mxu1 %v4725_v54 }
 0x77c   : > { %4395 = vmatpush3.msra.mxu1 %v3615_v8 }
 0x827   : > { %v4152_v9 = vpop.f32.mrf.mxu1 }
 0x829   : > { %v4153_v4 = vpop.f32.mrf.mxu1 }
 0x82a   : > { %v4154_v14 = vadd.f32 %v4153_v4, %v4152_v9 }
 0x82c   : > { %v3514_v0 = vadd.f32 %v4154_v14, %v3968_v11 }
 0x82e   : > { %v3517_v18 = vmax.f32 %v3514_v0, 0.0 }
 0x830   : > { %4372 = vmatmul.mubr.msk.f32.vlgmr.msra.gmra.mxu0 %vm3540_vm0, %v3517_v18 }
 0x8f0   : > { %v3610_v19 = vpop.f32.mrf.mxu0 }
 0x8f1   : > { %v3611_v43 = vadd.f32 %v3969_v34, %v3610_v19 }
 0x8f2   : > { %v4373_v31 = vpop.f32.mrf.mxu0 }
 0x8f3   : > { %v3614_v60 = vmax.f32 %v3611_v43, 0.0 }
 0x8f5   : > { %4397 = vmatmul.mubr.msk.f32.vlgmr.msra.gmra.mxu1 %vm1128_vm7, %v3614_v60 }
 0x9b5   : > { %v3705_v54 = vpop.f32.mrf.mxu1 }
 0x9b6   : > { %v3706_v33 = vadd.f32 %v3971_v45, %v3705_v54 }
 0x9b7   : > { %v4398_v48 = vpop.f32.mrf.mxu1 }
 0x9b8   : > { %3709 = vst [vmem:[%s490_s17] sm:$0xff] %v3706_v33 }
 0x9b9   : > { %4672 = shalt.err (!%p4669_p3)
}
 0x9ba   : > { %s4673_s16 = scalar_lea.hbm %s7116_s23, 128  ;;  %s4677_s17 = scalar_lea.hbm %s7166_s15, 256 }
 0x9bb   : > { %p4674_p4 = scmp.ne.s32.totalorder %s7116_s23, %s4673_s16  ;;  %p4678_p9 = scmp.lt.s32.totalorder %s7116_s23, %s7166_s15 }
 0x9bc   : > { %p4679_p10 = scmp.lt.s32.totalorder %s4677_s17, %s4673_s16 }
 0x9bd   : > { %p4675_p7 = pnand %p4674_p4, %p4851_p5 }
 0x9be   : > { %p4680_p11 = por %p4679_p10, %p4678_p9 }
 0x9bf   : > { %p4676_p8 = pneg %p4675_p7 }
 0x9c1   : > { %p4681_p12 = pnand %p4680_p11, %p4676_p8 }
 0x9c3   : > { %4684 = shalt.err (!%p4681_p12)
}
 0x9c4   : > { %4399 = dma.vmem_to_hbm [thread:$0]  (%p4851_p5), %s3725_s27, 128, %s7116_s23, %s3711_s30  }
 0x9c5 PF: > { %s7263_s0 = sld [smem:[#allocation5_spill]]  ;;  %p4405_p13 = scmp.ge.s32.totalorder %s4719_s21, 2 }
 0x9c7   : > { %p4402_p0 = pnand %p4405_p13, %p4855_p6 }
 0x9c9   : > { %p4403_p1 = pneg %p4402_p0 }
 0x9cb   : > { %s3736_s22 = sand.u32 1, %s7263_s0  }
 0x9cc   : > { %s3737_s18 = scalar_lea.sflag [#allocation3], %s3736_s22 }
 0x9cd   : > { %4702 = dma.done.wait (%p4403_p1), %s3737_s18, 128  }
 0x9ce   : > { %4704 = vsyncadd (%p4403_p1), %s3737_s18, 4294967168  ;;  %s7265_s21 = sld [smem:[#allocation7_spill]]  ;;  %s7268_s18 = smov %s4711_s19 }
 0x9cf   : > { %s7266_s16 = sld [smem:[#allocation6_spill]] }
 0x9d0   : > { %s7267_s20 = sld [smem:[#allocation8_spill]] }
 0x9d4   : > { %p25_p2 = scmp.ge.s32.totalorder %s7265_s21, 4  }
 0x9d5   : > { %s7269_s19 = smov %s7266_s16 }
 0x9d6   :  { %27 = sbr.rel (!%p25_p2) target bundleno = 5 (0x5), region = 119 }
 0x9db   :  { %3742 = vsyncpa [#allocation3], 1 }
 0x9dc   :  { %3744 = vsyncpa [#allocation3 + $0x1], 1 }

</bundles_post_ra>
